<compile_context>
chip_gen: v5e
topology: v5e:2x2
jax: 0.10.0
libtpu: 0.0.40
codegen_flags: <defaults>
</compile_context>

<pallas_src>
import math
import numpy as np
import jax
import jax.numpy as jnp
from jax.experimental import pallas as pl
from jax.experimental.pallas import tpu as pltpu

LEAKY_SLOPE = 0.01          # PyTorch nn.LeakyReLU default
KH = KW = 3                 # conv kernel
POOL = 4                    # AvgPool2d(4)


def _leaky_relu(v):
    return jnp.where(v >= 0, v, LEAKY_SLOPE * v)


# ======================================================================
# Fused Pallas kernel: one grid step == TB images of the batch.
# ======================================================================
def auxnet_kernel(xp_ref, z_ref,                       # (TB,C,H+2,W+2) , (TB,n_aux)
                  wcb_ref, cbb_ref, pool_ref,          # conv w lane-bcast, conv b, pool mats
                  wt_ref, bt_ref,                      # transform_nn
                  wg1_ref, bg1_ref, wg2_ref, bg2_ref,  # gate MLP
                  wo_ref, bo_ref,                      # output linear (lane-padded)
                  o_ref):                              # (TB, lane_out)
    TB = xp_ref.shape[0]
    C = xp_ref.shape[1]
    H = xp_ref.shape[2] - 2
    W = xp_ref.shape[3] - 2
    lanes = cbb_ref.shape[1]              # cout * W  (lane-dense conv width, = 128 here)
    cout = lanes // W
    n_pr = pool_ref.shape[0]              # number of pool rows (H // POOL)

    # ---- Conv2d(C, cout, 3, padding=1) + ReLU: lane-dense shifted FMAs on the VPU ------
    # acc[b, h, co*W + w] accumulates conv[b, co, h, w]; one 128-lane FMA per (ci,dh,dw).
    acc = jnp.zeros((TB, H, lanes), jnp.float32)
    for ci in range(C):
        chan = xp_ref[:, ci, :, :]                                # (TB, H+2, W+2)
        for dh in range(KH):
            for dw in range(KW):
                patch = chan[:, dh:dh + H, dw:dw + W]             # (TB, H, W)
                patch_t = jnp.concatenate([patch] * cout, axis=-1)  # (TB, H, lanes)
                wrow = wcb_ref[(ci * KH + dh) * KW + dw, :]       # (lanes,) lane-bcast w
                acc = acc + wrow * patch_t
    m = jnp.maximum(acc + cbb_ref[...], 0.0)                      # (TB, H, lanes)

    # ---- AvgPool2d(4) + flatten (torch NCHW order) via exact row-sums + MXU matmuls ----
    # x_flat[b, co*16 + r*4 + c] = mean of the 4x4 window; P_r folds the lane pooling,
    # the 1/16 scale and the flatten permutation into one (128,128) constant matrix.
    x_flat = jnp.zeros((TB, pool_ref.shape[2]), jnp.float32)
    for r in range(n_pr):
        rp = jnp.sum(m[:, POOL * r:POOL * r + POOL, :], axis=1)   # (TB, lanes) exact f32
        x_flat = x_flat + jnp.dot(rp, pool_ref[r],
                                  preferred_element_type=jnp.float32)

    # ---- transform_nn: Linear(n_aux, n_feat) + LeakyReLU, batched (TB,8)@(8,128) -------
    zt = _leaky_relu(
        jnp.dot(z_ref[...], wt_ref[...], preferred_element_type=jnp.float32)
        + bt_ref[...])

    # ---- gate_nn on [x, z'] with one shared (2*TB,128)@(128,32) matmul (eval mode) -----
    gate_in = jnp.concatenate([x_flat, zt], axis=0)               # (2*TB, n_feat)
    h = _leaky_relu(
        jnp.dot(gate_in, wg1_ref[...], preferred_element_type=jnp.float32)
        + bg1_ref[...])
    logits = jnp.sum(h * wg2_ref[...], axis=-1, keepdims=True) + bg2_ref[...]  # (2*TB,1)

    gx = logits[:TB]                                              # (TB, 1)
    gz = logits[TB:]
    mx = jnp.maximum(gx, gz)
    ex = jnp.exp(gx - mx)
    ez = jnp.exp(gz - mx)
    inv = 1.0 / (ex + ez)
    xc = (ex * inv) * x_flat + (ez * inv) * zt                    # (TB, n_feat)

    # ---- net.output: Linear(n_feat, n_out) padded to 128 output lanes ------------------
    o_ref[...] = (jnp.dot(xc, wo_ref[...], preferred_element_type=jnp.float32)
                  + bo_ref[...])


# ======================================================================
# Host wrappers
# ======================================================================
def _pinned(shape):
    """Full-array block that stays resident in VMEM across the batch grid."""
    zeros = (0,) * len(shape)
    return pl.BlockSpec(shape, lambda b, _z=zeros: _z)


def prepare_params(p, hw=16, pool=POOL):
    """One-time host-side repack:
       * conv weights -> lane-broadcast (C*KH*KW, cout*W) rows, conv bias -> (1, cout*W)
       * pool/flatten -> (n_pr, cout*W, n_feat) matrices P_r producing torch flatten order
       * output Linear zero-padded to a lane-dense 128-wide store."""
    conv_w = np.asarray(p["conv_w"], np.float32)          # (cout, cin, 3, 3)
    conv_b = np.asarray(p["conv_b"], np.float32)
    cout, cin, kh, kw = conv_w.shape
    H = W = hw
    n_feat, n_out = np.asarray(p["wo"]).shape
    assert H % pool == 0 and W % pool == 0, (H, W, pool)
    n_pr, n_pc = H // pool, W // pool
    assert n_feat == cout * n_pr * n_pc, (n_feat, cout, n_pr, n_pc)

    lanes = cout * W
    wcb = np.zeros((cin * kh * kw, lanes), np.float32)
    for ci in range(cin):
        for dh in range(kh):
            for dw in range(kw):
                wcb[(ci * kh + dh) * kw + dw] = np.repeat(conv_w[:, ci, dh, dw], W)
    cbb = np.repeat(conv_b, W)[None, :].astype(np.float32)          # (1, lanes)

    pool_m = np.zeros((n_pr, lanes, n_feat), np.float32)
    scale = 1.0 / (pool * pool)
    for r in range(n_pr):
        for co in range(cout):
            for w in range(W):
                c = w // pool
                pool_m[r, co * W + w, co * n_pr * n_pc + r * n_pc + c] = scale

    lane_out = ((n_out + 127) // 128) * 128
    wo_pad = np.zeros((n_feat, lane_out), np.float32)
    wo_pad[:, :n_out] = np.asarray(p["wo"], np.float32)
    bo_pad = np.zeros((1, lane_out), np.float32)
    bo_pad[:, :n_out] = np.asarray(p["bo"], np.float32)

    return {
        "wcb": jnp.asarray(wcb), "cbb": jnp.asarray(cbb), "pool": jnp.asarray(pool_m),
        "wt": p["wt"], "bt": p["bt"],
        "wg1": p["wg1"], "bg1": p["bg1"], "wg2_row": p["wg2_row"], "bg2": p["bg2"],
        "wo_pad": jnp.asarray(wo_pad), "bo_pad": jnp.asarray(bo_pad),
        "n_out": n_out,
    }


def auxnet_forward(x, z, kp, block_b=256):
    """x: (B, C, H, W) NCHW image, z: (B, n_aux), kp: prepare_params(init_params(...))."""
    B, C, H, W = x.shape
    n_aux = z.shape[1]
    n_out = kp["n_out"]
    lane_out = kp["wo_pad"].shape[1]

    # TB images per grid step (TB=256 keeps VMEM fine on v5e/v6e/v7x and fills MXU rows).
    if B <= block_b:
        TB, B_pad = B, B
    else:
        TB = block_b
        B_pad = ((B + TB - 1) // TB) * TB
    if B_pad != B:
        x = jnp.pad(x, ((0, B_pad - B), (0, 0), (0, 0), (0, 0)))
        z = jnp.pad(z, ((0, B_pad - B), (0, 0)))

    # TODO(synk): the border pad could be moved in-kernel (DMA interior into a zeroed VMEM
    # scratch) to avoid one extra HBM round trip of the input batch.
    xpad = jnp.pad(x, ((0, 0), (0, 0), (1, 1), (1, 1)))            # (B_pad, C, H+2, W+2)

    out = pl.pallas_call(
        auxnet_kernel,
        out_shape=jax.ShapeDtypeStruct((B_pad, lane_out), jnp.float32),
        grid=(B_pad // TB,),
        in_specs=[
            pl.BlockSpec((TB, C, H + 2, W + 2), lambda b: (b, 0, 0, 0)),   # images
            pl.BlockSpec((TB, n_aux), lambda b: (b, 0)),                   # aux features
            _pinned(kp["wcb"].shape), _pinned(kp["cbb"].shape),
            _pinned(kp["pool"].shape),
            _pinned(kp["wt"].shape), _pinned(kp["bt"].shape),
            _pinned(kp["wg1"].shape), _pinned(kp["bg1"].shape),
            _pinned(kp["wg2_row"].shape), _pinned(kp["bg2"].shape),
            _pinned(kp["wo_pad"].shape), _pinned(kp["bo_pad"].shape),
        ],
        out_specs=pl.BlockSpec((TB, lane_out), lambda b: (b, 0)),
        compiler_params=pltpu.CompilerParams(dimension_semantics=("parallel",)),
    )(xpad, z, kp["wcb"], kp["cbb"], kp["pool"],
      kp["wt"], kp["bt"], kp["wg1"], kp["bg1"], kp["wg2_row"], kp["bg2"],
      kp["wo_pad"], kp["bo_pad"])
    return out[:B, :n_out]


# ======================================================================
# Pure-JAX reference (exact f32 elementwise conv + mean pooling) for checking
# ======================================================================
def auxnet_reference(x, z, p):
    B, C, H, W = x.shape
    cout = p["conv_w"].shape[0]
    xp = jnp.pad(x, ((0, 0), (0, 0), (1, 1), (1, 1)))
    conv = jnp.zeros((B, cout, H, W), jnp.float32) + p["conv_b"][None, :, None, None]
    for ci in range(C):
        for dh in range(KH):
            for dw in range(KW):
                w_slice = p["conv_w"][:, ci, dh, dw]                      # (cout,)
                conv = conv + w_slice[None, :, None, None] * xp[:, ci:ci + 1, dh:dh + H, dw:dw + W]
    conv = jnp.maximum(conv, 0.0)
    pooled = conv.reshape(B, cout, H // POOL, POOL, W // POOL, POOL).mean(axis=(3, 5))
    xf = pooled.reshape(B, -1)                                            # torch x.view(B,-1)

    zt = _leaky_relu(z @ p["wt"] + p["bt"])

    def gate(v):
        hh = _leaky_relu(v @ p["wg1"] + p["bg1"])
        return jnp.sum(hh * p["wg2_row"], axis=-1, keepdims=True) + p["bg2"]

    g = jax.nn.softmax(jnp.concatenate([gate(xf), gate(zt)], axis=1), axis=1)
    xc = g[:, 0:1] * xf + g[:, 1:2] * zt
    return xc @ p["wo"] + p["bo"]


# ======================================================================
# Deterministic parameter init (xavier-uniform weights, PyTorch-style biases)
# ======================================================================
def init_params(key, c_in=4, c_feat=8, n_feat=128, n_aux=8, n_hidden=32, n_out=10):
    ks = jax.random.split(key, 12)

    def xavier(k, fan_in, fan_out, shape):
        bound = math.sqrt(6.0 / (fan_in + fan_out))
        return jax.random.uniform(k, shape, jnp.float32, -bound, bound)

    def bias(k, fan_in, n):
        bound = 1.0 / math.sqrt(fan_in)
        return jax.random.uniform(k, (1, n), jnp.float32, -bound, bound)

    fan_conv = c_in * KH * KW
    return {
        "conv_w": xavier(ks[0], fan_conv, c_feat * KH * KW, (c_feat, c_in, KH, KW)),
        "conv_b": jax.random.uniform(ks[1], (c_feat,), jnp.float32,
                                     -1.0 / math.sqrt(fan_conv), 1.0 / math.sqrt(fan_conv)),
        "wt":  xavier(ks[2], n_aux, n_feat, (n_aux, n_feat)),
        "bt":  bias(ks[3], n_aux, n_feat),
        "wg1": xavier(ks[4], n_feat, n_hidden, (n_feat, n_hidden)),
        "bg1": bias(ks[5], n_feat, n_hidden),
        "wg2_row": xavier(ks[6], n_hidden, 1, (1, n_hidden)),   # Linear(32,1) weight row
        "bg2": bias(ks[7], n_hidden, 1),
        "wo":  xavier(ks[8], n_feat, n_out, (n_feat, n_out)),
        "bo":  bias(ks[9], n_feat, n_out),
    }


if __name__ == "__main__":
    key = jax.random.PRNGKey(0)
    kx, kz, kparam = jax.random.split(key, 3)

    B, C, H, W = 2, 4, 16, 16
    n_aux = 8
    x = jax.random.normal(kx, (B, C, H, W), jnp.float32)      # NCHW, like PyTorch
    z = jax.random.normal(kz, (B, n_aux), jnp.float32)

    params = init_params(kparam, c_in=C, n_aux=n_aux)
    kernel_params = prepare_params(params, hw=H, pool=POOL)

    out = jax.block_until_ready(auxnet_forward(x, z, kernel_params))
    ref = jax.block_until_ready(auxnet_reference(x, z, params))

    assert out.shape == (B, 10), out.shape
    # Tolerance allows for MXU f32-matmul rounding differences vs. the exact-f32 reference.
    assert jnp.allclose(out, ref, atol=2e-3, rtol=2e-3), (out, ref)
    print("KERNEL_OK")
</pallas_src>

<mosaic_0001>
module attributes {stable_mosaic.version = 11 : i64} {
  func.func @auxnet_kernel(%arg0: i32, %arg1: memref<2x4x18x18xf32, #tpu.memory_space<vmem>>, %arg2: memref<2x8xf32, #tpu.memory_space<vmem>>, %arg3: memref<36x128xf32, #tpu.memory_space<vmem>>, %arg4: memref<1x128xf32, #tpu.memory_space<vmem>>, %arg5: memref<4x128x128xf32, #tpu.memory_space<vmem>>, %arg6: memref<8x128xf32, #tpu.memory_space<vmem>>, %arg7: memref<1x128xf32, #tpu.memory_space<vmem>>, %arg8: memref<128x32xf32, #tpu.memory_space<vmem>>, %arg9: memref<1x32xf32, #tpu.memory_space<vmem>>, %arg10: memref<1x32xf32, #tpu.memory_space<vmem>>, %arg11: memref<1x1xf32, #tpu.memory_space<vmem>>, %arg12: memref<128x128xf32, #tpu.memory_space<vmem>>, %arg13: memref<1x128xf32, #tpu.memory_space<vmem>>, %arg14: memref<2x128xf32, #tpu.memory_space<vmem>>) attributes {dimension_semantics = [#tpu.dimension_semantics<parallel>], iteration_bounds = array<i64: 1>, scalar_prefetch = 0 : i64, scratch_operands = 0 : i64, tpu.core_type = #tpu.core_type<tc>, window_params = [{transform_indices = @transform_0, window_bounds = array<i64: 2, 4, 18, 18>}, {transform_indices = @transform_1, window_bounds = array<i64: 2, 8>}, {pipeline_mode = #tpu.pipeline_mode<synchronous>, transform_indices = @transform_2, window_bounds = array<i64: 36, 128>}, {pipeline_mode = #tpu.pipeline_mode<synchronous>, transform_indices = @transform_3, window_bounds = array<i64: 1, 128>}, {pipeline_mode = #tpu.pipeline_mode<synchronous>, transform_indices = @transform_4, window_bounds = array<i64: 4, 128, 128>}, {pipeline_mode = #tpu.pipeline_mode<synchronous>, transform_indices = @transform_5, window_bounds = array<i64: 8, 128>}, {pipeline_mode = #tpu.pipeline_mode<synchronous>, transform_indices = @transform_6, window_bounds = array<i64: 1, 128>}, {pipeline_mode = #tpu.pipeline_mode<synchronous>, transform_indices = @transform_7, window_bounds = array<i64: 128, 32>}, {pipeline_mode = #tpu.pipeline_mode<synchronous>, transform_indices = @transform_8, window_bounds = array<i64: 1, 32>}, {pipeline_mode = #tpu.pipeline_mode<synchronous>, transform_indices = @transform_9, window_bounds = array<i64: 1, 32>}, {pipeline_mode = #tpu.pipeline_mode<synchronous>, transform_indices = @transform_10, window_bounds = array<i64: 1, 1>}, {pipeline_mode = #tpu.pipeline_mode<synchronous>, transform_indices = @transform_11, window_bounds = array<i64: 128, 128>}, {pipeline_mode = #tpu.pipeline_mode<synchronous>, transform_indices = @transform_12, window_bounds = array<i64: 1, 128>}, {transform_indices = @transform_13, window_bounds = array<i64: 2, 128>}]} {
    %cst = arith.constant 0.000000e+00 : f32
    %0 = vector.broadcast %cst : f32 to vector<2x16x128xf32>
    %c0 = arith.constant 0 : index
    %c0_0 = arith.constant 0 : index
    %c0_1 = arith.constant 0 : index
    %c0_2 = arith.constant 0 : index
    %1 = vector.load %arg1[%c0, %c0_0, %c0_1, %c0_2] : memref<2x4x18x18xf32, #tpu.memory_space<vmem>>, vector<2x1x18x18xf32>
    %2 = vector.shape_cast %1 : vector<2x1x18x18xf32> to vector<2x18x18xf32>
    %3 = vector.extract_strided_slice %2 {offsets = [0, 0, 0], sizes = [2, 16, 16], strides = [1, 1, 1]} : vector<2x18x18xf32> to vector<2x16x16xf32>
    %4 = tpu.concatenate %3, %3, %3, %3, %3, %3, %3, %3 in 2 : vector<2x16x16xf32>, vector<2x16x16xf32>, vector<2x16x16xf32>, vector<2x16x16xf32>, vector<2x16x16xf32>, vector<2x16x16xf32>, vector<2x16x16xf32>, vector<2x16x16xf32> -> vector<2x16x128xf32>
    %c0_3 = arith.constant 0 : index
    %c0_4 = arith.constant 0 : index
    %5 = vector.load %arg3[%c0_3, %c0_4] : memref<36x128xf32, #tpu.memory_space<vmem>>, vector<1x128xf32>
    %6 = vector.shape_cast %5 : vector<1x128xf32> to vector<128xf32>
    %7 = vector.shape_cast %6 : vector<128xf32> to vector<1x1x128xf32>
    %8 = vector.broadcast %7 : vector<1x1x128xf32> to vector<2x16x128xf32>
    %9 = arith.mulf %8, %4 : vector<2x16x128xf32>
    %10 = arith.addf %0, %9 : vector<2x16x128xf32>
    %11 = vector.extract_strided_slice %2 {offsets = [0, 0, 1], sizes = [2, 16, 16], strides = [1, 1, 1]} : vector<2x18x18xf32> to vector<2x16x16xf32>
    %12 = tpu.concatenate %11, %11, %11, %11, %11, %11, %11, %11 in 2 : vector<2x16x16xf32>, vector<2x16x16xf32>, vector<2x16x16xf32>, vector<2x16x16xf32>, vector<2x16x16xf32>, vector<2x16x16xf32>, vector<2x16x16xf32>, vector<2x16x16xf32> -> vector<2x16x128xf32>
    %c1 = arith.constant 1 : index
    %c0_5 = arith.constant 0 : index
    %13 = vector.load %arg3[%c1, %c0_5] : memref<36x128xf32, #tpu.memory_space<vmem>>, vector<1x128xf32>
    %14 = vector.shape_cast %13 : vector<1x128xf32> to vector<128xf32>
    %15 = vector.shape_cast %14 : vector<128xf32> to vector<1x1x128xf32>
    %16 = vector.broadcast %15 : vector<1x1x128xf32> to vector<2x16x128xf32>
    %17 = arith.mulf %16, %12 : vector<2x16x128xf32>
    %18 = arith.addf %10, %17 : vector<2x16x128xf32>
    %19 = vector.extract_strided_slice %2 {offsets = [0, 0, 2], sizes = [2, 16, 16], strides = [1, 1, 1]} : vector<2x18x18xf32> to vector<2x16x16xf32>
    %20 = tpu.concatenate %19, %19, %19, %19, %19, %19, %19, %19 in 2 : vector<2x16x16xf32>, vector<2x16x16xf32>, vector<2x16x16xf32>, vector<2x16x16xf32>, vector<2x16x16xf32>, vector<2x16x16xf32>, vector<2x16x16xf32>, vector<2x16x16xf32> -> vector<2x16x128xf32>
    %c2 = arith.constant 2 : index
    %c0_6 = arith.constant 0 : index
    %21 = vector.load %arg3[%c2, %c0_6] : memref<36x128xf32, #tpu.memory_space<vmem>>, vector<1x128xf32>
    %22 = vector.shape_cast %21 : vector<1x128xf32> to vector<128xf32>
    %23 = vector.shape_cast %22 : vector<128xf32> to vector<1x1x128xf32>
    %24 = vector.broadcast %23 : vector<1x1x128xf32> to vector<2x16x128xf32>
    %25 = arith.mulf %24, %20 : vector<2x16x128xf32>
    %26 = arith.addf %18, %25 : vector<2x16x128xf32>
    %27 = vector.extract_strided_slice %2 {offsets = [0, 1, 0], sizes = [2, 16, 16], strides = [1, 1, 1]} : vector<2x18x18xf32> to vector<2x16x16xf32>
    %28 = tpu.concatenate %27, %27, %27, %27, %27, %27, %27, %27 in 2 : vector<2x16x16xf32>, vector<2x16x16xf32>, vector<2x16x16xf32>, vector<2x16x16xf32>, vector<2x16x16xf32>, vector<2x16x16xf32>, vector<2x16x16xf32>, vector<2x16x16xf32> -> vector<2x16x128xf32>
    %c3 = arith.constant 3 : index
    %c0_7 = arith.constant 0 : index
    %29 = vector.load %arg3[%c3, %c0_7] : memref<36x128xf32, #tpu.memory_space<vmem>>, vector<1x128xf32>
    %30 = vector.shape_cast %29 : vector<1x128xf32> to vector<128xf32>
    %31 = vector.shape_cast %30 : vector<128xf32> to vector<1x1x128xf32>
    %32 = vector.broadcast %31 : vector<1x1x128xf32> to vector<2x16x128xf32>
    %33 = arith.mulf %32, %28 : vector<2x16x128xf32>
    %34 = arith.addf %26, %33 : vector<2x16x128xf32>
    %35 = vector.extract_strided_slice %2 {offsets = [0, 1, 1], sizes = [2, 16, 16], strides = [1, 1, 1]} : vector<2x18x18xf32> to vector<2x16x16xf32>
    %36 = tpu.concatenate %35, %35, %35, %35, %35, %35, %35, %35 in 2 : vector<2x16x16xf32>, vector<2x16x16xf32>, vector<2x16x16xf32>, vector<2x16x16xf32>, vector<2x16x16xf32>, vector<2x16x16xf32>, vector<2x16x16xf32>, vector<2x16x16xf32> -> vector<2x16x128xf32>
    %c4 = arith.constant 4 : index
    %c0_8 = arith.constant 0 : index
    %37 = vector.load %arg3[%c4, %c0_8] : memref<36x128xf32, #tpu.memory_space<vmem>>, vector<1x128xf32>
    %38 = vector.shape_cast %37 : vector<1x128xf32> to vector<128xf32>
    %39 = vector.shape_cast %38 : vector<128xf32> to vector<1x1x128xf32>
    %40 = vector.broadcast %39 : vector<1x1x128xf32> to vector<2x16x128xf32>
    %41 = arith.mulf %40, %36 : vector<2x16x128xf32>
    %42 = arith.addf %34, %41 : vector<2x16x128xf32>
    %43 = vector.extract_strided_slice %2 {offsets = [0, 1, 2], sizes = [2, 16, 16], strides = [1, 1, 1]} : vector<2x18x18xf32> to vector<2x16x16xf32>
    %44 = tpu.concatenate %43, %43, %43, %43, %43, %43, %43, %43 in 2 : vector<2x16x16xf32>, vector<2x16x16xf32>, vector<2x16x16xf32>, vector<2x16x16xf32>, vector<2x16x16xf32>, vector<2x16x16xf32>, vector<2x16x16xf32>, vector<2x16x16xf32> -> vector<2x16x128xf32>
    %c5 = arith.constant 5 : index
    %c0_9 = arith.constant 0 : index
    %45 = vector.load %arg3[%c5, %c0_9] : memref<36x128xf32, #tpu.memory_space<vmem>>, vector<1x128xf32>
    %46 = vector.shape_cast %45 : vector<1x128xf32> to vector<128xf32>
    %47 = vector.shape_cast %46 : vector<128xf32> to vector<1x1x128xf32>
    %48 = vector.broadcast %47 : vector<1x1x128xf32> to vector<2x16x128xf32>
    %49 = arith.mulf %48, %44 : vector<2x16x128xf32>
    %50 = arith.addf %42, %49 : vector<2x16x128xf32>
    %51 = vector.extract_strided_slice %2 {offsets = [0, 2, 0], sizes = [2, 16, 16], strides = [1, 1, 1]} : vector<2x18x18xf32> to vector<2x16x16xf32>
    %52 = tpu.concatenate %51, %51, %51, %51, %51, %51, %51, %51 in 2 : vector<2x16x16xf32>, vector<2x16x16xf32>, vector<2x16x16xf32>, vector<2x16x16xf32>, vector<2x16x16xf32>, vector<2x16x16xf32>, vector<2x16x16xf32>, vector<2x16x16xf32> -> vector<2x16x128xf32>
    %c6 = arith.constant 6 : index
    %c0_10 = arith.constant 0 : index
    %53 = vector.load %arg3[%c6, %c0_10] : memref<36x128xf32, #tpu.memory_space<vmem>>, vector<1x128xf32>
    %54 = vector.shape_cast %53 : vector<1x128xf32> to vector<128xf32>
    %55 = vector.shape_cast %54 : vector<128xf32> to vector<1x1x128xf32>
    %56 = vector.broadcast %55 : vector<1x1x128xf32> to vector<2x16x128xf32>
    %57 = arith.mulf %56, %52 : vector<2x16x128xf32>
    %58 = arith.addf %50, %57 : vector<2x16x128xf32>
    %59 = vector.extract_strided_slice %2 {offsets = [0, 2, 1], sizes = [2, 16, 16], strides = [1, 1, 1]} : vector<2x18x18xf32> to vector<2x16x16xf32>
    %60 = tpu.concatenate %59, %59, %59, %59, %59, %59, %59, %59 in 2 : vector<2x16x16xf32>, vector<2x16x16xf32>, vector<2x16x16xf32>, vector<2x16x16xf32>, vector<2x16x16xf32>, vector<2x16x16xf32>, vector<2x16x16xf32>, vector<2x16x16xf32> -> vector<2x16x128xf32>
    %c7 = arith.constant 7 : index
    %c0_11 = arith.constant 0 : index
    %61 = vector.load %arg3[%c7, %c0_11] : memref<36x128xf32, #tpu.memory_space<vmem>>, vector<1x128xf32>
    %62 = vector.shape_cast %61 : vector<1x128xf32> to vector<128xf32>
    %63 = vector.shape_cast %62 : vector<128xf32> to vector<1x1x128xf32>
    %64 = vector.broadcast %63 : vector<1x1x128xf32> to vector<2x16x128xf32>
    %65 = arith.mulf %64, %60 : vector<2x16x128xf32>
    %66 = arith.addf %58, %65 : vector<2x16x128xf32>
    %67 = vector.extract_strided_slice %2 {offsets = [0, 2, 2], sizes = [2, 16, 16], strides = [1, 1, 1]} : vector<2x18x18xf32> to vector<2x16x16xf32>
    %68 = tpu.concatenate %67, %67, %67, %67, %67, %67, %67, %67 in 2 : vector<2x16x16xf32>, vector<2x16x16xf32>, vector<2x16x16xf32>, vector<2x16x16xf32>, vector<2x16x16xf32>, vector<2x16x16xf32>, vector<2x16x16xf32>, vector<2x16x16xf32> -> vector<2x16x128xf32>
    %c8 = arith.constant 8 : index
    %c0_12 = arith.constant 0 : index
    %69 = vector.load %arg3[%c8, %c0_12] : memref<36x128xf32, #tpu.memory_space<vmem>>, vector<1x128xf32>
    %70 = vector.shape_cast %69 : vector<1x128xf32> to vector<128xf32>
    %71 = vector.shape_cast %70 : vector<128xf32> to vector<1x1x128xf32>
    %72 = vector.broadcast %71 : vector<1x1x128xf32> to vector<2x16x128xf32>
    %73 = arith.mulf %72, %68 : vector<2x16x128xf32>
    %74 = arith.addf %66, %73 : vector<2x16x128xf32>
    %c0_13 = arith.constant 0 : index
    %c1_14 = arith.constant 1 : index
    %c0_15 = arith.constant 0 : index
    %c0_16 = arith.constant 0 : index
    %75 = vector.load %arg1[%c0_13, %c1_14, %c0_15, %c0_16] : memref<2x4x18x18xf32, #tpu.memory_space<vmem>>, vector<2x1x18x18xf32>
    %76 = vector.shape_cast %75 : vector<2x1x18x18xf32> to vector<2x18x18xf32>
    %77 = vector.extract_strided_slice %76 {offsets = [0, 0, 0], sizes = [2, 16, 16], strides = [1, 1, 1]} : vector<2x18x18xf32> to vector<2x16x16xf32>
    %78 = tpu.concatenate %77, %77, %77, %77, %77, %77, %77, %77 in 2 : vector<2x16x16xf32>, vector<2x16x16xf32>, vector<2x16x16xf32>, vector<2x16x16xf32>, vector<2x16x16xf32>, vector<2x16x16xf32>, vector<2x16x16xf32>, vector<2x16x16xf32> -> vector<2x16x128xf32>
    %c9 = arith.constant 9 : index
    %c0_17 = arith.constant 0 : index
    %79 = vector.load %arg3[%c9, %c0_17] : memref<36x128xf32, #tpu.memory_space<vmem>>, vector<1x128xf32>
    %80 = vector.shape_cast %79 : vector<1x128xf32> to vector<128xf32>
    %81 = vector.shape_cast %80 : vector<128xf32> to vector<1x1x128xf32>
    %82 = vector.broadcast %81 : vector<1x1x128xf32> to vector<2x16x128xf32>
    %83 = arith.mulf %82, %78 : vector<2x16x128xf32>
    %84 = arith.addf %74, %83 : vector<2x16x128xf32>
    %85 = vector.extract_strided_slice %76 {offsets = [0, 0, 1], sizes = [2, 16, 16], strides = [1, 1, 1]} : vector<2x18x18xf32> to vector<2x16x16xf32>
    %86 = tpu.concatenate %85, %85, %85, %85, %85, %85, %85, %85 in 2 : vector<2x16x16xf32>, vector<2x16x16xf32>, vector<2x16x16xf32>, vector<2x16x16xf32>, vector<2x16x16xf32>, vector<2x16x16xf32>, vector<2x16x16xf32>, vector<2x16x16xf32> -> vector<2x16x128xf32>
    %c10 = arith.constant 10 : index
    %c0_18 = arith.constant 0 : index
    %87 = vector.load %arg3[%c10, %c0_18] : memref<36x128xf32, #tpu.memory_space<vmem>>, vector<1x128xf32>
    %88 = vector.shape_cast %87 : vector<1x128xf32> to vector<128xf32>
    %89 = vector.shape_cast %88 : vector<128xf32> to vector<1x1x128xf32>
    %90 = vector.broadcast %89 : vector<1x1x128xf32> to vector<2x16x128xf32>
    %91 = arith.mulf %90, %86 : vector<2x16x128xf32>
    %92 = arith.addf %84, %91 : vector<2x16x128xf32>
    %93 = vector.extract_strided_slice %76 {offsets = [0, 0, 2], sizes = [2, 16, 16], strides = [1, 1, 1]} : vector<2x18x18xf32> to vector<2x16x16xf32>
    %94 = tpu.concatenate %93, %93, %93, %93, %93, %93, %93, %93 in 2 : vector<2x16x16xf32>, vector<2x16x16xf32>, vector<2x16x16xf32>, vector<2x16x16xf32>, vector<2x16x16xf32>, vector<2x16x16xf32>, vector<2x16x16xf32>, vector<2x16x16xf32> -> vector<2x16x128xf32>
    %c11 = arith.constant 11 : index
    %c0_19 = arith.constant 0 : index
    %95 = vector.load %arg3[%c11, %c0_19] : memref<36x128xf32, #tpu.memory_space<vmem>>, vector<1x128xf32>
    %96 = vector.shape_cast %95 : vector<1x128xf32> to vector<128xf32>
    %97 = vector.shape_cast %96 : vector<128xf32> to vector<1x1x128xf32>
    %98 = vector.broadcast %97 : vector<1x1x128xf32> to vector<2x16x128xf32>
    %99 = arith.mulf %98, %94 : vector<2x16x128xf32>
    %100 = arith.addf %92, %99 : vector<2x16x128xf32>
    %101 = vector.extract_strided_slice %76 {offsets = [0, 1, 0], sizes = [2, 16, 16], strides = [1, 1, 1]} : vector<2x18x18xf32> to vector<2x16x16xf32>
    %102 = tpu.concatenate %101, %101, %101, %101, %101, %101, %101, %101 in 2 : vector<2x16x16xf32>, vector<2x16x16xf32>, vector<2x16x16xf32>, vector<2x16x16xf32>, vector<2x16x16xf32>, vector<2x16x16xf32>, vector<2x16x16xf32>, vector<2x16x16xf32> -> vector<2x16x128xf32>
    %c12 = arith.constant 12 : index
    %c0_20 = arith.constant 0 : index
    %103 = vector.load %arg3[%c12, %c0_20] : memref<36x128xf32, #tpu.memory_space<vmem>>, vector<1x128xf32>
    %104 = vector.shape_cast %103 : vector<1x128xf32> to vector<128xf32>
    %105 = vector.shape_cast %104 : vector<128xf32> to vector<1x1x128xf32>
    %106 = vector.broadcast %105 : vector<1x1x128xf32> to vector<2x16x128xf32>
    %107 = arith.mulf %106, %102 : vector<2x16x128xf32>
    %108 = arith.addf %100, %107 : vector<2x16x128xf32>
    %109 = vector.extract_strided_slice %76 {offsets = [0, 1, 1], sizes = [2, 16, 16], strides = [1, 1, 1]} : vector<2x18x18xf32> to vector<2x16x16xf32>
    %110 = tpu.concatenate %109, %109, %109, %109, %109, %109, %109, %109 in 2 : vector<2x16x16xf32>, vector<2x16x16xf32>, vector<2x16x16xf32>, vector<2x16x16xf32>, vector<2x16x16xf32>, vector<2x16x16xf32>, vector<2x16x16xf32>, vector<2x16x16xf32> -> vector<2x16x128xf32>
    %c13 = arith.constant 13 : index
    %c0_21 = arith.constant 0 : index
    %111 = vector.load %arg3[%c13, %c0_21] : memref<36x128xf32, #tpu.memory_space<vmem>>, vector<1x128xf32>
    %112 = vector.shape_cast %111 : vector<1x128xf32> to vector<128xf32>
    %113 = vector.shape_cast %112 : vector<128xf32> to vector<1x1x128xf32>
    %114 = vector.broadcast %113 : vector<1x1x128xf32> to vector<2x16x128xf32>
    %115 = arith.mulf %114, %110 : vector<2x16x128xf32>
    %116 = arith.addf %108, %115 : vector<2x16x128xf32>
    %117 = vector.extract_strided_slice %76 {offsets = [0, 1, 2], sizes = [2, 16, 16], strides = [1, 1, 1]} : vector<2x18x18xf32> to vector<2x16x16xf32>
    %118 = tpu.concatenate %117, %117, %117, %117, %117, %117, %117, %117 in 2 : vector<2x16x16xf32>, vector<2x16x16xf32>, vector<2x16x16xf32>, vector<2x16x16xf32>, vector<2x16x16xf32>, vector<2x16x16xf32>, vector<2x16x16xf32>, vector<2x16x16xf32> -> vector<2x16x128xf32>
    %c14 = arith.constant 14 : index
    %c0_22 = arith.constant 0 : index
    %119 = vector.load %arg3[%c14, %c0_22] : memref<36x128xf32, #tpu.memory_space<vmem>>, vector<1x128xf32>
    %120 = vector.shape_cast %119 : vector<1x128xf32> to vector<128xf32>
    %121 = vector.shape_cast %120 : vector<128xf32> to vector<1x1x128xf32>
    %122 = vector.broadcast %121 : vector<1x1x128xf32> to vector<2x16x128xf32>
    %123 = arith.mulf %122, %118 : vector<2x16x128xf32>
    %124 = arith.addf %116, %123 : vector<2x16x128xf32>
    %125 = vector.extract_strided_slice %76 {offsets = [0, 2, 0], sizes = [2, 16, 16], strides = [1, 1, 1]} : vector<2x18x18xf32> to vector<2x16x16xf32>
    %126 = tpu.concatenate %125, %125, %125, %125, %125, %125, %125, %125 in 2 : vector<2x16x16xf32>, vector<2x16x16xf32>, vector<2x16x16xf32>, vector<2x16x16xf32>, vector<2x16x16xf32>, vector<2x16x16xf32>, vector<2x16x16xf32>, vector<2x16x16xf32> -> vector<2x16x128xf32>
    %c15 = arith.constant 15 : index
    %c0_23 = arith.constant 0 : index
    %127 = vector.load %arg3[%c15, %c0_23] : memref<36x128xf32, #tpu.memory_space<vmem>>, vector<1x128xf32>
    %128 = vector.shape_cast %127 : vector<1x128xf32> to vector<128xf32>
    %129 = vector.shape_cast %128 : vector<128xf32> to vector<1x1x128xf32>
    %130 = vector.broadcast %129 : vector<1x1x128xf32> to vector<2x16x128xf32>
    %131 = arith.mulf %130, %126 : vector<2x16x128xf32>
    %132 = arith.addf %124, %131 : vector<2x16x128xf32>
    %133 = vector.extract_strided_slice %76 {offsets = [0, 2, 1], sizes = [2, 16, 16], strides = [1, 1, 1]} : vector<2x18x18xf32> to vector<2x16x16xf32>
    %134 = tpu.concatenate %133, %133, %133, %133, %133, %133, %133, %133 in 2 : vector<2x16x16xf32>, vector<2x16x16xf32>, vector<2x16x16xf32>, vector<2x16x16xf32>, vector<2x16x16xf32>, vector<2x16x16xf32>, vector<2x16x16xf32>, vector<2x16x16xf32> -> vector<2x16x128xf32>
    %c16 = arith.constant 16 : index
    %c0_24 = arith.constant 0 : index
    %135 = vector.load %arg3[%c16, %c0_24] : memref<36x128xf32, #tpu.memory_space<vmem>>, vector<1x128xf32>
    %136 = vector.shape_cast %135 : vector<1x128xf32> to vector<128xf32>
    %137 = vector.shape_cast %136 : vector<128xf32> to vector<1x1x128xf32>
    %138 = vector.broadcast %137 : vector<1x1x128xf32> to vector<2x16x128xf32>
    %139 = arith.mulf %138, %134 : vector<2x16x128xf32>
    %140 = arith.addf %132, %139 : vector<2x16x128xf32>
    %141 = vector.extract_strided_slice %76 {offsets = [0, 2, 2], sizes = [2, 16, 16], strides = [1, 1, 1]} : vector<2x18x18xf32> to vector<2x16x16xf32>
    %142 = tpu.concatenate %141, %141, %141, %141, %141, %141, %141, %141 in 2 : vector<2x16x16xf32>, vector<2x16x16xf32>, vector<2x16x16xf32>, vector<2x16x16xf32>, vector<2x16x16xf32>, vector<2x16x16xf32>, vector<2x16x16xf32>, vector<2x16x16xf32> -> vector<2x16x128xf32>
    %c17 = arith.constant 17 : index
    %c0_25 = arith.constant 0 : index
    %143 = vector.load %arg3[%c17, %c0_25] : memref<36x128xf32, #tpu.memory_space<vmem>>, vector<1x128xf32>
    %144 = vector.shape_cast %143 : vector<1x128xf32> to vector<128xf32>
    %145 = vector.shape_cast %144 : vector<128xf32> to vector<1x1x128xf32>
    %146 = vector.broadcast %145 : vector<1x1x128xf32> to vector<2x16x128xf32>
    %147 = arith.mulf %146, %142 : vector<2x16x128xf32>
    %148 = arith.addf %140, %147 : vector<2x16x128xf32>
    %c0_26 = arith.constant 0 : index
    %c2_27 = arith.constant 2 : index
    %c0_28 = arith.constant 0 : index
    %c0_29 = arith.constant 0 : index
    %149 = vector.load %arg1[%c0_26, %c2_27, %c0_28, %c0_29] : memref<2x4x18x18xf32, #tpu.memory_space<vmem>>, vector<2x1x18x18xf32>
    %150 = vector.shape_cast %149 : vector<2x1x18x18xf32> to vector<2x18x18xf32>
    %151 = vector.extract_strided_slice %150 {offsets = [0, 0, 0], sizes = [2, 16, 16], strides = [1, 1, 1]} : vector<2x18x18xf32> to vector<2x16x16xf32>
    %152 = tpu.concatenate %151, %151, %151, %151, %151, %151, %151, %151 in 2 : vector<2x16x16xf32>, vector<2x16x16xf32>, vector<2x16x16xf32>, vector<2x16x16xf32>, vector<2x16x16xf32>, vector<2x16x16xf32>, vector<2x16x16xf32>, vector<2x16x16xf32> -> vector<2x16x128xf32>
    %c18 = arith.constant 18 : index
    %c0_30 = arith.constant 0 : index
    %153 = vector.load %arg3[%c18, %c0_30] : memref<36x128xf32, #tpu.memory_space<vmem>>, vector<1x128xf32>
    %154 = vector.shape_cast %153 : vector<1x128xf32> to vector<128xf32>
    %155 = vector.shape_cast %154 : vector<128xf32> to vector<1x1x128xf32>
    %156 = vector.broadcast %155 : vector<1x1x128xf32> to vector<2x16x128xf32>
    %157 = arith.mulf %156, %152 : vector<2x16x128xf32>
    %158 = arith.addf %148, %157 : vector<2x16x128xf32>
    %159 = vector.extract_strided_slice %150 {offsets = [0, 0, 1], sizes = [2, 16, 16], strides = [1, 1, 1]} : vector<2x18x18xf32> to vector<2x16x16xf32>
    %160 = tpu.concatenate %159, %159, %159, %159, %159, %159, %159, %159 in 2 : vector<2x16x16xf32>, vector<2x16x16xf32>, vector<2x16x16xf32>, vector<2x16x16xf32>, vector<2x16x16xf32>, vector<2x16x16xf32>, vector<2x16x16xf32>, vector<2x16x16xf32> -> vector<2x16x128xf32>
    %c19 = arith.constant 19 : index
    %c0_31 = arith.constant 0 : index
    %161 = vector.load %arg3[%c19, %c0_31] : memref<36x128xf32, #tpu.memory_space<vmem>>, vector<1x128xf32>
    %162 = vector.shape_cast %161 : vector<1x128xf32> to vector<128xf32>
    %163 = vector.shape_cast %162 : vector<128xf32> to vector<1x1x128xf32>
    %164 = vector.broadcast %163 : vector<1x1x128xf32> to vector<2x16x128xf32>
    %165 = arith.mulf %164, %160 : vector<2x16x128xf32>
    %166 = arith.addf %158, %165 : vector<2x16x128xf32>
    %167 = vector.extract_strided_slice %150 {offsets = [0, 0, 2], sizes = [2, 16, 16], strides = [1, 1, 1]} : vector<2x18x18xf32> to vector<2x16x16xf32>
    %168 = tpu.concatenate %167, %167, %167, %167, %167, %167, %167, %167 in 2 : vector<2x16x16xf32>, vector<2x16x16xf32>, vector<2x16x16xf32>, vector<2x16x16xf32>, vector<2x16x16xf32>, vector<2x16x16xf32>, vector<2x16x16xf32>, vector<2x16x16xf32> -> vector<2x16x128xf32>
    %c20 = arith.constant 20 : index
    %c0_32 = arith.constant 0 : index
    %169 = vector.load %arg3[%c20, %c0_32] : memref<36x128xf32, #tpu.memory_space<vmem>>, vector<1x128xf32>
    %170 = vector.shape_cast %169 : vector<1x128xf32> to vector<128xf32>
    %171 = vector.shape_cast %170 : vector<128xf32> to vector<1x1x128xf32>
    %172 = vector.broadcast %171 : vector<1x1x128xf32> to vector<2x16x128xf32>
    %173 = arith.mulf %172, %168 : vector<2x16x128xf32>
    %174 = arith.addf %166, %173 : vector<2x16x128xf32>
    %175 = vector.extract_strided_slice %150 {offsets = [0, 1, 0], sizes = [2, 16, 16], strides = [1, 1, 1]} : vector<2x18x18xf32> to vector<2x16x16xf32>
    %176 = tpu.concatenate %175, %175, %175, %175, %175, %175, %175, %175 in 2 : vector<2x16x16xf32>, vector<2x16x16xf32>, vector<2x16x16xf32>, vector<2x16x16xf32>, vector<2x16x16xf32>, vector<2x16x16xf32>, vector<2x16x16xf32>, vector<2x16x16xf32> -> vector<2x16x128xf32>
    %c21 = arith.constant 21 : index
    %c0_33 = arith.constant 0 : index
    %177 = vector.load %arg3[%c21, %c0_33] : memref<36x128xf32, #tpu.memory_space<vmem>>, vector<1x128xf32>
    %178 = vector.shape_cast %177 : vector<1x128xf32> to vector<128xf32>
    %179 = vector.shape_cast %178 : vector<128xf32> to vector<1x1x128xf32>
    %180 = vector.broadcast %179 : vector<1x1x128xf32> to vector<2x16x128xf32>
    %181 = arith.mulf %180, %176 : vector<2x16x128xf32>
    %182 = arith.addf %174, %181 : vector<2x16x128xf32>
    %183 = vector.extract_strided_slice %150 {offsets = [0, 1, 1], sizes = [2, 16, 16], strides = [1, 1, 1]} : vector<2x18x18xf32> to vector<2x16x16xf32>
    %184 = tpu.concatenate %183, %183, %183, %183, %183, %183, %183, %183 in 2 : vector<2x16x16xf32>, vector<2x16x16xf32>, vector<2x16x16xf32>, vector<2x16x16xf32>, vector<2x16x16xf32>, vector<2x16x16xf32>, vector<2x16x16xf32>, vector<2x16x16xf32> -> vector<2x16x128xf32>
    %c22 = arith.constant 22 : index
    %c0_34 = arith.constant 0 : index
    %185 = vector.load %arg3[%c22, %c0_34] : memref<36x128xf32, #tpu.memory_space<vmem>>, vector<1x128xf32>
    %186 = vector.shape_cast %185 : vector<1x128xf32> to vector<128xf32>
    %187 = vector.shape_cast %186 : vector<128xf32> to vector<1x1x128xf32>
    %188 = vector.broadcast %187 : vector<1x1x128xf32> to vector<2x16x128xf32>
    %189 = arith.mulf %188, %184 : vector<2x16x128xf32>
    %190 = arith.addf %182, %189 : vector<2x16x128xf32>
    %191 = vector.extract_strided_slice %150 {offsets = [0, 1, 2], sizes = [2, 16, 16], strides = [1, 1, 1]} : vector<2x18x18xf32> to vector<2x16x16xf32>
    %192 = tpu.concatenate %191, %191, %191, %191, %191, %191, %191, %191 in 2 : vector<2x16x16xf32>, vector<2x16x16xf32>, vector<2x16x16xf32>, vector<2x16x16xf32>, vector<2x16x16xf32>, vector<2x16x16xf32>, vector<2x16x16xf32>, vector<2x16x16xf32> -> vector<2x16x128xf32>
    %c23 = arith.constant 23 : index
    %c0_35 = arith.constant 0 : index
    %193 = vector.load %arg3[%c23, %c0_35] : memref<36x128xf32, #tpu.memory_space<vmem>>, vector<1x128xf32>
    %194 = vector.shape_cast %193 : vector<1x128xf32> to vector<128xf32>
    %195 = vector.shape_cast %194 : vector<128xf32> to vector<1x1x128xf32>
    %196 = vector.broadcast %195 : vector<1x1x128xf32> to vector<2x16x128xf32>
    %197 = arith.mulf %196, %192 : vector<2x16x128xf32>
    %198 = arith.addf %190, %197 : vector<2x16x128xf32>
    %199 = vector.extract_strided_slice %150 {offsets = [0, 2, 0], sizes = [2, 16, 16], strides = [1, 1, 1]} : vector<2x18x18xf32> to vector<2x16x16xf32>
    %200 = tpu.concatenate %199, %199, %199, %199, %199, %199, %199, %199 in 2 : vector<2x16x16xf32>, vector<2x16x16xf32>, vector<2x16x16xf32>, vector<2x16x16xf32>, vector<2x16x16xf32>, vector<2x16x16xf32>, vector<2x16x16xf32>, vector<2x16x16xf32> -> vector<2x16x128xf32>
    %c24 = arith.constant 24 : index
    %c0_36 = arith.constant 0 : index
    %201 = vector.load %arg3[%c24, %c0_36] : memref<36x128xf32, #tpu.memory_space<vmem>>, vector<1x128xf32>
    %202 = vector.shape_cast %201 : vector<1x128xf32> to vector<128xf32>
    %203 = vector.shape_cast %202 : vector<128xf32> to vector<1x1x128xf32>
    %204 = vector.broadcast %203 : vector<1x1x128xf32> to vector<2x16x128xf32>
    %205 = arith.mulf %204, %200 : vector<2x16x128xf32>
    %206 = arith.addf %198, %205 : vector<2x16x128xf32>
    %207 = vector.extract_strided_slice %150 {offsets = [0, 2, 1], sizes = [2, 16, 16], strides = [1, 1, 1]} : vector<2x18x18xf32> to vector<2x16x16xf32>
    %208 = tpu.concatenate %207, %207, %207, %207, %207, %207, %207, %207 in 2 : vector<2x16x16xf32>, vector<2x16x16xf32>, vector<2x16x16xf32>, vector<2x16x16xf32>, vector<2x16x16xf32>, vector<2x16x16xf32>, vector<2x16x16xf32>, vector<2x16x16xf32> -> vector<2x16x128xf32>
    %c25 = arith.constant 25 : index
    %c0_37 = arith.constant 0 : index
    %209 = vector.load %arg3[%c25, %c0_37] : memref<36x128xf32, #tpu.memory_space<vmem>>, vector<1x128xf32>
    %210 = vector.shape_cast %209 : vector<1x128xf32> to vector<128xf32>
    %211 = vector.shape_cast %210 : vector<128xf32> to vector<1x1x128xf32>
    %212 = vector.broadcast %211 : vector<1x1x128xf32> to vector<2x16x128xf32>
    %213 = arith.mulf %212, %208 : vector<2x16x128xf32>
    %214 = arith.addf %206, %213 : vector<2x16x128xf32>
    %215 = vector.extract_strided_slice %150 {offsets = [0, 2, 2], sizes = [2, 16, 16], strides = [1, 1, 1]} : vector<2x18x18xf32> to vector<2x16x16xf32>
    %216 = tpu.concatenate %215, %215, %215, %215, %215, %215, %215, %215 in 2 : vector<2x16x16xf32>, vector<2x16x16xf32>, vector<2x16x16xf32>, vector<2x16x16xf32>, vector<2x16x16xf32>, vector<2x16x16xf32>, vector<2x16x16xf32>, vector<2x16x16xf32> -> vector<2x16x128xf32>
    %c26 = arith.constant 26 : index
    %c0_38 = arith.constant 0 : index
    %217 = vector.load %arg3[%c26, %c0_38] : memref<36x128xf32, #tpu.memory_space<vmem>>, vector<1x128xf32>
    %218 = vector.shape_cast %217 : vector<1x128xf32> to vector<128xf32>
    %219 = vector.shape_cast %218 : vector<128xf32> to vector<1x1x128xf32>
    %220 = vector.broadcast %219 : vector<1x1x128xf32> to vector<2x16x128xf32>
    %221 = arith.mulf %220, %216 : vector<2x16x128xf32>
    %222 = arith.addf %214, %221 : vector<2x16x128xf32>
    %c0_39 = arith.constant 0 : index
    %c3_40 = arith.constant 3 : index
    %c0_41 = arith.constant 0 : index
    %c0_42 = arith.constant 0 : index
    %223 = vector.load %arg1[%c0_39, %c3_40, %c0_41, %c0_42] : memref<2x4x18x18xf32, #tpu.memory_space<vmem>>, vector<2x1x18x18xf32>
    %224 = vector.shape_cast %223 : vector<2x1x18x18xf32> to vector<2x18x18xf32>
    %225 = vector.extract_strided_slice %224 {offsets = [0, 0, 0], sizes = [2, 16, 16], strides = [1, 1, 1]} : vector<2x18x18xf32> to vector<2x16x16xf32>
    %226 = tpu.concatenate %225, %225, %225, %225, %225, %225, %225, %225 in 2 : vector<2x16x16xf32>, vector<2x16x16xf32>, vector<2x16x16xf32>, vector<2x16x16xf32>, vector<2x16x16xf32>, vector<2x16x16xf32>, vector<2x16x16xf32>, vector<2x16x16xf32> -> vector<2x16x128xf32>
    %c27 = arith.constant 27 : index
    %c0_43 = arith.constant 0 : index
    %227 = vector.load %arg3[%c27, %c0_43] : memref<36x128xf32, #tpu.memory_space<vmem>>, vector<1x128xf32>
    %228 = vector.shape_cast %227 : vector<1x128xf32> to vector<128xf32>
    %229 = vector.shape_cast %228 : vector<128xf32> to vector<1x1x128xf32>
    %230 = vector.broadcast %229 : vector<1x1x128xf32> to vector<2x16x128xf32>
    %231 = arith.mulf %230, %226 : vector<2x16x128xf32>
    %232 = arith.addf %222, %231 : vector<2x16x128xf32>
    %233 = vector.extract_strided_slice %224 {offsets = [0, 0, 1], sizes = [2, 16, 16], strides = [1, 1, 1]} : vector<2x18x18xf32> to vector<2x16x16xf32>
    %234 = tpu.concatenate %233, %233, %233, %233, %233, %233, %233, %233 in 2 : vector<2x16x16xf32>, vector<2x16x16xf32>, vector<2x16x16xf32>, vector<2x16x16xf32>, vector<2x16x16xf32>, vector<2x16x16xf32>, vector<2x16x16xf32>, vector<2x16x16xf32> -> vector<2x16x128xf32>
    %c28 = arith.constant 28 : index
    %c0_44 = arith.constant 0 : index
    %235 = vector.load %arg3[%c28, %c0_44] : memref<36x128xf32, #tpu.memory_space<vmem>>, vector<1x128xf32>
    %236 = vector.shape_cast %235 : vector<1x128xf32> to vector<128xf32>
    %237 = vector.shape_cast %236 : vector<128xf32> to vector<1x1x128xf32>
    %238 = vector.broadcast %237 : vector<1x1x128xf32> to vector<2x16x128xf32>
    %239 = arith.mulf %238, %234 : vector<2x16x128xf32>
    %240 = arith.addf %232, %239 : vector<2x16x128xf32>
    %241 = vector.extract_strided_slice %224 {offsets = [0, 0, 2], sizes = [2, 16, 16], strides = [1, 1, 1]} : vector<2x18x18xf32> to vector<2x16x16xf32>
    %242 = tpu.concatenate %241, %241, %241, %241, %241, %241, %241, %241 in 2 : vector<2x16x16xf32>, vector<2x16x16xf32>, vector<2x16x16xf32>, vector<2x16x16xf32>, vector<2x16x16xf32>, vector<2x16x16xf32>, vector<2x16x16xf32>, vector<2x16x16xf32> -> vector<2x16x128xf32>
    %c29 = arith.constant 29 : index
    %c0_45 = arith.constant 0 : index
    %243 = vector.load %arg3[%c29, %c0_45] : memref<36x128xf32, #tpu.memory_space<vmem>>, vector<1x128xf32>
    %244 = vector.shape_cast %243 : vector<1x128xf32> to vector<128xf32>
    %245 = vector.shape_cast %244 : vector<128xf32> to vector<1x1x128xf32>
    %246 = vector.broadcast %245 : vector<1x1x128xf32> to vector<2x16x128xf32>
    %247 = arith.mulf %246, %242 : vector<2x16x128xf32>
    %248 = arith.addf %240, %247 : vector<2x16x128xf32>
    %249 = vector.extract_strided_slice %224 {offsets = [0, 1, 0], sizes = [2, 16, 16], strides = [1, 1, 1]} : vector<2x18x18xf32> to vector<2x16x16xf32>
    %250 = tpu.concatenate %249, %249, %249, %249, %249, %249, %249, %249 in 2 : vector<2x16x16xf32>, vector<2x16x16xf32>, vector<2x16x16xf32>, vector<2x16x16xf32>, vector<2x16x16xf32>, vector<2x16x16xf32>, vector<2x16x16xf32>, vector<2x16x16xf32> -> vector<2x16x128xf32>
    %c30 = arith.constant 30 : index
    %c0_46 = arith.constant 0 : index
    %251 = vector.load %arg3[%c30, %c0_46] : memref<36x128xf32, #tpu.memory_space<vmem>>, vector<1x128xf32>
    %252 = vector.shape_cast %251 : vector<1x128xf32> to vector<128xf32>
    %253 = vector.shape_cast %252 : vector<128xf32> to vector<1x1x128xf32>
    %254 = vector.broadcast %253 : vector<1x1x128xf32> to vector<2x16x128xf32>
    %255 = arith.mulf %254, %250 : vector<2x16x128xf32>
    %256 = arith.addf %248, %255 : vector<2x16x128xf32>
    %257 = vector.extract_strided_slice %224 {offsets = [0, 1, 1], sizes = [2, 16, 16], strides = [1, 1, 1]} : vector<2x18x18xf32> to vector<2x16x16xf32>
    %258 = tpu.concatenate %257, %257, %257, %257, %257, %257, %257, %257 in 2 : vector<2x16x16xf32>, vector<2x16x16xf32>, vector<2x16x16xf32>, vector<2x16x16xf32>, vector<2x16x16xf32>, vector<2x16x16xf32>, vector<2x16x16xf32>, vector<2x16x16xf32> -> vector<2x16x128xf32>
    %c31 = arith.constant 31 : index
    %c0_47 = arith.constant 0 : index
    %259 = vector.load %arg3[%c31, %c0_47] : memref<36x128xf32, #tpu.memory_space<vmem>>, vector<1x128xf32>
    %260 = vector.shape_cast %259 : vector<1x128xf32> to vector<128xf32>
    %261 = vector.shape_cast %260 : vector<128xf32> to vector<1x1x128xf32>
    %262 = vector.broadcast %261 : vector<1x1x128xf32> to vector<2x16x128xf32>
    %263 = arith.mulf %262, %258 : vector<2x16x128xf32>
    %264 = arith.addf %256, %263 : vector<2x16x128xf32>
    %265 = vector.extract_strided_slice %224 {offsets = [0, 1, 2], sizes = [2, 16, 16], strides = [1, 1, 1]} : vector<2x18x18xf32> to vector<2x16x16xf32>
    %266 = tpu.concatenate %265, %265, %265, %265, %265, %265, %265, %265 in 2 : vector<2x16x16xf32>, vector<2x16x16xf32>, vector<2x16x16xf32>, vector<2x16x16xf32>, vector<2x16x16xf32>, vector<2x16x16xf32>, vector<2x16x16xf32>, vector<2x16x16xf32> -> vector<2x16x128xf32>
    %c32 = arith.constant 32 : index
    %c0_48 = arith.constant 0 : index
    %267 = vector.load %arg3[%c32, %c0_48] : memref<36x128xf32, #tpu.memory_space<vmem>>, vector<1x128xf32>
    %268 = vector.shape_cast %267 : vector<1x128xf32> to vector<128xf32>
    %269 = vector.shape_cast %268 : vector<128xf32> to vector<1x1x128xf32>
    %270 = vector.broadcast %269 : vector<1x1x128xf32> to vector<2x16x128xf32>
    %271 = arith.mulf %270, %266 : vector<2x16x128xf32>
    %272 = arith.addf %264, %271 : vector<2x16x128xf32>
    %273 = vector.extract_strided_slice %224 {offsets = [0, 2, 0], sizes = [2, 16, 16], strides = [1, 1, 1]} : vector<2x18x18xf32> to vector<2x16x16xf32>
    %274 = tpu.concatenate %273, %273, %273, %273, %273, %273, %273, %273 in 2 : vector<2x16x16xf32>, vector<2x16x16xf32>, vector<2x16x16xf32>, vector<2x16x16xf32>, vector<2x16x16xf32>, vector<2x16x16xf32>, vector<2x16x16xf32>, vector<2x16x16xf32> -> vector<2x16x128xf32>
    %c33 = arith.constant 33 : index
    %c0_49 = arith.constant 0 : index
    %275 = vector.load %arg3[%c33, %c0_49] : memref<36x128xf32, #tpu.memory_space<vmem>>, vector<1x128xf32>
    %276 = vector.shape_cast %275 : vector<1x128xf32> to vector<128xf32>
    %277 = vector.shape_cast %276 : vector<128xf32> to vector<1x1x128xf32>
    %278 = vector.broadcast %277 : vector<1x1x128xf32> to vector<2x16x128xf32>
    %279 = arith.mulf %278, %274 : vector<2x16x128xf32>
    %280 = arith.addf %272, %279 : vector<2x16x128xf32>
    %281 = vector.extract_strided_slice %224 {offsets = [0, 2, 1], sizes = [2, 16, 16], strides = [1, 1, 1]} : vector<2x18x18xf32> to vector<2x16x16xf32>
    %282 = tpu.concatenate %281, %281, %281, %281, %281, %281, %281, %281 in 2 : vector<2x16x16xf32>, vector<2x16x16xf32>, vector<2x16x16xf32>, vector<2x16x16xf32>, vector<2x16x16xf32>, vector<2x16x16xf32>, vector<2x16x16xf32>, vector<2x16x16xf32> -> vector<2x16x128xf32>
    %c34 = arith.constant 34 : index
    %c0_50 = arith.constant 0 : index
    %283 = vector.load %arg3[%c34, %c0_50] : memref<36x128xf32, #tpu.memory_space<vmem>>, vector<1x128xf32>
    %284 = vector.shape_cast %283 : vector<1x128xf32> to vector<128xf32>
    %285 = vector.shape_cast %284 : vector<128xf32> to vector<1x1x128xf32>
    %286 = vector.broadcast %285 : vector<1x1x128xf32> to vector<2x16x128xf32>
    %287 = arith.mulf %286, %282 : vector<2x16x128xf32>
    %288 = arith.addf %280, %287 : vector<2x16x128xf32>
    %289 = vector.extract_strided_slice %224 {offsets = [0, 2, 2], sizes = [2, 16, 16], strides = [1, 1, 1]} : vector<2x18x18xf32> to vector<2x16x16xf32>
    %290 = tpu.concatenate %289, %289, %289, %289, %289, %289, %289, %289 in 2 : vector<2x16x16xf32>, vector<2x16x16xf32>, vector<2x16x16xf32>, vector<2x16x16xf32>, vector<2x16x16xf32>, vector<2x16x16xf32>, vector<2x16x16xf32>, vector<2x16x16xf32> -> vector<2x16x128xf32>
    %c35 = arith.constant 35 : index
    %c0_51 = arith.constant 0 : index
    %291 = vector.load %arg3[%c35, %c0_51] : memref<36x128xf32, #tpu.memory_space<vmem>>, vector<1x128xf32>
    %292 = vector.shape_cast %291 : vector<1x128xf32> to vector<128xf32>
    %293 = vector.shape_cast %292 : vector<128xf32> to vector<1x1x128xf32>
    %294 = vector.broadcast %293 : vector<1x1x128xf32> to vector<2x16x128xf32>
    %295 = arith.mulf %294, %290 : vector<2x16x128xf32>
    %296 = arith.addf %288, %295 : vector<2x16x128xf32>
    %c0_52 = arith.constant 0 : index
    %c0_53 = arith.constant 0 : index
    %297 = vector.load %arg4[%c0_52, %c0_53] : memref<1x128xf32, #tpu.memory_space<vmem>>, vector<1x128xf32>
    %298 = vector.shape_cast %297 : vector<1x128xf32> to vector<1x1x128xf32>
    %299 = vector.broadcast %298 : vector<1x1x128xf32> to vector<2x16x128xf32>
    %300 = arith.addf %296, %299 : vector<2x16x128xf32>
    %cst_54 = arith.constant 0.000000e+00 : f32
    %301 = vector.broadcast %cst_54 : f32 to vector<2x16x128xf32>
    %302 = arith.maximumf %300, %301 : vector<2x16x128xf32>
    %cst_55 = arith.constant 0.000000e+00 : f32
    %303 = vector.broadcast %cst_55 : f32 to vector<2x128xf32>
    %304 = vector.extract_strided_slice %302 {offsets = [0, 0, 0], sizes = [2, 4, 128], strides = [1, 1, 1]} : vector<2x16x128xf32> to vector<2x4x128xf32>
    %cst_56 = arith.constant dense<0.000000e+00> : vector<2x128xf32>
    %305 = vector.multi_reduction <add>, %304, %cst_56 [1] : vector<2x4x128xf32> to vector<2x128xf32>
    %c0_57 = arith.constant 0 : index
    %c0_58 = arith.constant 0 : index
    %c0_59 = arith.constant 0 : index
    %306 = vector.load %arg5[%c0_57, %c0_58, %c0_59] : memref<4x128x128xf32, #tpu.memory_space<vmem>>, vector<1x128x128xf32>
    %307 = vector.shape_cast %306 : vector<1x128x128xf32> to vector<128x128xf32>
    %cst_60 = arith.constant dense<0.000000e+00> : vector<2x128xf32>
    %308 = tpu.matmul %305, %307, %cst_60 {dimension_numbers = #tpu.dot_dimension_numbers<[1], [0], [0], [1], [0, 0, 1, 1], [], []>} : vector<2x128xf32>, vector<128x128xf32>, vector<2x128xf32> -> vector<2x128xf32>
    %309 = arith.addf %303, %308 : vector<2x128xf32>
    %310 = vector.extract_strided_slice %302 {offsets = [0, 4, 0], sizes = [2, 4, 128], strides = [1, 1, 1]} : vector<2x16x128xf32> to vector<2x4x128xf32>
    %cst_61 = arith.constant dense<0.000000e+00> : vector<2x128xf32>
    %311 = vector.multi_reduction <add>, %310, %cst_61 [1] : vector<2x4x128xf32> to vector<2x128xf32>
    %c1_62 = arith.constant 1 : index
    %c0_63 = arith.constant 0 : index
    %c0_64 = arith.constant 0 : index
    %312 = vector.load %arg5[%c1_62, %c0_63, %c0_64] : memref<4x128x128xf32, #tpu.memory_space<vmem>>, vector<1x128x128xf32>
    %313 = vector.shape_cast %312 : vector<1x128x128xf32> to vector<128x128xf32>
    %cst_65 = arith.constant dense<0.000000e+00> : vector<2x128xf32>
    %314 = tpu.matmul %311, %313, %cst_65 {dimension_numbers = #tpu.dot_dimension_numbers<[1], [0], [0], [1], [0, 0, 1, 1], [], []>} : vector<2x128xf32>, vector<128x128xf32>, vector<2x128xf32> -> vector<2x128xf32>
    %315 = arith.addf %309, %314 : vector<2x128xf32>
    %316 = vector.extract_strided_slice %302 {offsets = [0, 8, 0], sizes = [2, 4, 128], strides = [1, 1, 1]} : vector<2x16x128xf32> to vector<2x4x128xf32>
    %cst_66 = arith.constant dense<0.000000e+00> : vector<2x128xf32>
    %317 = vector.multi_reduction <add>, %316, %cst_66 [1] : vector<2x4x128xf32> to vector<2x128xf32>
    %c2_67 = arith.constant 2 : index
    %c0_68 = arith.constant 0 : index
    %c0_69 = arith.constant 0 : index
    %318 = vector.load %arg5[%c2_67, %c0_68, %c0_69] : memref<4x128x128xf32, #tpu.memory_space<vmem>>, vector<1x128x128xf32>
    %319 = vector.shape_cast %318 : vector<1x128x128xf32> to vector<128x128xf32>
    %cst_70 = arith.constant dense<0.000000e+00> : vector<2x128xf32>
    %320 = tpu.matmul %317, %319, %cst_70 {dimension_numbers = #tpu.dot_dimension_numbers<[1], [0], [0], [1], [0, 0, 1, 1], [], []>} : vector<2x128xf32>, vector<128x128xf32>, vector<2x128xf32> -> vector<2x128xf32>
    %321 = arith.addf %315, %320 : vector<2x128xf32>
    %322 = vector.extract_strided_slice %302 {offsets = [0, 12, 0], sizes = [2, 4, 128], strides = [1, 1, 1]} : vector<2x16x128xf32> to vector<2x4x128xf32>
    %cst_71 = arith.constant dense<0.000000e+00> : vector<2x128xf32>
    %323 = vector.multi_reduction <add>, %322, %cst_71 [1] : vector<2x4x128xf32> to vector<2x128xf32>
    %c3_72 = arith.constant 3 : index
    %c0_73 = arith.constant 0 : index
    %c0_74 = arith.constant 0 : index
    %324 = vector.load %arg5[%c3_72, %c0_73, %c0_74] : memref<4x128x128xf32, #tpu.memory_space<vmem>>, vector<1x128x128xf32>
    %325 = vector.shape_cast %324 : vector<1x128x128xf32> to vector<128x128xf32>
    %cst_75 = arith.constant dense<0.000000e+00> : vector<2x128xf32>
    %326 = tpu.matmul %323, %325, %cst_75 {dimension_numbers = #tpu.dot_dimension_numbers<[1], [0], [0], [1], [0, 0, 1, 1], [], []>} : vector<2x128xf32>, vector<128x128xf32>, vector<2x128xf32> -> vector<2x128xf32>
    %327 = arith.addf %321, %326 : vector<2x128xf32>
    %c0_76 = arith.constant 0 : index
    %c0_77 = arith.constant 0 : index
    %328 = vector.load %arg2[%c0_76, %c0_77] : memref<2x8xf32, #tpu.memory_space<vmem>>, vector<2x8xf32>
    %c0_78 = arith.constant 0 : index
    %c0_79 = arith.constant 0 : index
    %329 = vector.load %arg6[%c0_78, %c0_79] : memref<8x128xf32, #tpu.memory_space<vmem>>, vector<8x128xf32>
    %cst_80 = arith.constant dense<0.000000e+00> : vector<2x128xf32>
    %330 = tpu.matmul %328, %329, %cst_80 {dimension_numbers = #tpu.dot_dimension_numbers<[1], [0], [0], [1], [0, 0, 1, 1], [], []>} : vector<2x8xf32>, vector<8x128xf32>, vector<2x128xf32> -> vector<2x128xf32>
    %c0_81 = arith.constant 0 : index
    %c0_82 = arith.constant 0 : index
    %331 = vector.load %arg7[%c0_81, %c0_82] : memref<1x128xf32, #tpu.memory_space<vmem>>, vector<1x128xf32>
    %332 = vector.broadcast %331 : vector<1x128xf32> to vector<2x128xf32>
    %333 = arith.addf %330, %332 : vector<2x128xf32>
    %cst_83 = arith.constant 0.000000e+00 : f32
    %334 = vector.broadcast %cst_83 : f32 to vector<2x128xf32>
    %335 = arith.cmpf oge, %333, %334 : vector<2x128xf32>
    %cst_84 = arith.constant 0.00999999977 : f32
    %336 = vector.broadcast %cst_84 : f32 to vector<2x128xf32>
    %337 = arith.mulf %336, %333 : vector<2x128xf32>
    %338 = arith.select %335, %333, %337 : vector<2x128xi1>, vector<2x128xf32>
    %339 = tpu.concatenate %327, %338 in 0 : vector<2x128xf32>, vector<2x128xf32> -> vector<4x128xf32>
    %c0_85 = arith.constant 0 : index
    %c0_86 = arith.constant 0 : index
    %340 = vector.load %arg8[%c0_85, %c0_86] : memref<128x32xf32, #tpu.memory_space<vmem>>, vector<128x32xf32>
    %cst_87 = arith.constant dense<0.000000e+00> : vector<4x32xf32>
    %341 = tpu.matmul %339, %340, %cst_87 {dimension_numbers = #tpu.dot_dimension_numbers<[1], [0], [0], [1], [0, 0, 1, 1], [], []>} : vector<4x128xf32>, vector<128x32xf32>, vector<4x32xf32> -> vector<4x32xf32>
    %c0_88 = arith.constant 0 : index
    %c0_89 = arith.constant 0 : index
    %342 = vector.load %arg9[%c0_88, %c0_89] : memref<1x32xf32, #tpu.memory_space<vmem>>, vector<1x32xf32>
    %343 = vector.broadcast %342 : vector<1x32xf32> to vector<4x32xf32>
    %344 = arith.addf %341, %343 : vector<4x32xf32>
    %cst_90 = arith.constant 0.000000e+00 : f32
    %345 = vector.broadcast %cst_90 : f32 to vector<4x32xf32>
    %346 = arith.cmpf oge, %344, %345 : vector<4x32xf32>
    %cst_91 = arith.constant 0.00999999977 : f32
    %347 = vector.broadcast %cst_91 : f32 to vector<4x32xf32>
    %348 = arith.mulf %347, %344 : vector<4x32xf32>
    %349 = arith.select %346, %344, %348 : vector<4x32xi1>, vector<4x32xf32>
    %c0_92 = arith.constant 0 : index
    %c0_93 = arith.constant 0 : index
    %350 = vector.load %arg10[%c0_92, %c0_93] : memref<1x32xf32, #tpu.memory_space<vmem>>, vector<1x32xf32>
    %351 = vector.broadcast %350 : vector<1x32xf32> to vector<4x32xf32>
    %352 = arith.mulf %349, %351 : vector<4x32xf32>
    %cst_94 = arith.constant dense<0.000000e+00> : vector<4xf32>
    %353 = vector.multi_reduction <add>, %352, %cst_94 [1] : vector<4x32xf32> to vector<4xf32>
    %354 = vector.shape_cast %353 : vector<4xf32> to vector<4x1xf32>
    %c0_95 = arith.constant 0 : index
    %c0_96 = arith.constant 0 : index
    %355 = vector.load %arg11[%c0_95, %c0_96] : memref<1x1xf32, #tpu.memory_space<vmem>>, vector<1x1xf32>
    %356 = vector.broadcast %355 : vector<1x1xf32> to vector<4x1xf32>
    %357 = arith.addf %354, %356 : vector<4x1xf32>
    %358 = vector.extract_strided_slice %357 {offsets = [0, 0], sizes = [2, 1], strides = [1, 1]} : vector<4x1xf32> to vector<2x1xf32>
    %359 = vector.extract_strided_slice %357 {offsets = [2, 0], sizes = [2, 1], strides = [1, 1]} : vector<4x1xf32> to vector<2x1xf32>
    %360 = arith.maximumf %358, %359 : vector<2x1xf32>
    %361 = arith.subf %358, %360 : vector<2x1xf32>
    %362 = math.exp %361 : vector<2x1xf32>
    %363 = arith.subf %359, %360 : vector<2x1xf32>
    %364 = math.exp %363 : vector<2x1xf32>
    %365 = arith.addf %362, %364 : vector<2x1xf32>
    %cst_97 = arith.constant 1.000000e+00 : f32
    %366 = vector.broadcast %cst_97 : f32 to vector<2x1xf32>
    %367 = arith.divf %366, %365 : vector<2x1xf32>
    %368 = arith.mulf %362, %367 : vector<2x1xf32>
    %369 = vector.broadcast %368 : vector<2x1xf32> to vector<2x128xf32>
    %370 = arith.mulf %369, %327 : vector<2x128xf32>
    %371 = arith.mulf %364, %367 : vector<2x1xf32>
    %372 = vector.broadcast %371 : vector<2x1xf32> to vector<2x128xf32>
    %373 = arith.mulf %372, %338 : vector<2x128xf32>
    %374 = arith.addf %370, %373 : vector<2x128xf32>
    %c0_98 = arith.constant 0 : index
    %c0_99 = arith.constant 0 : index
    %375 = vector.load %arg12[%c0_98, %c0_99] : memref<128x128xf32, #tpu.memory_space<vmem>>, vector<128x128xf32>
    %cst_100 = arith.constant dense<0.000000e+00> : vector<2x128xf32>
    %376 = tpu.matmul %374, %375, %cst_100 {dimension_numbers = #tpu.dot_dimension_numbers<[1], [0], [0], [1], [0, 0, 1, 1], [], []>} : vector<2x128xf32>, vector<128x128xf32>, vector<2x128xf32> -> vector<2x128xf32>
    %c0_101 = arith.constant 0 : index
    %c0_102 = arith.constant 0 : index
    %377 = vector.load %arg13[%c0_101, %c0_102] : memref<1x128xf32, #tpu.memory_space<vmem>>, vector<1x128xf32>
    %378 = vector.broadcast %377 : vector<1x128xf32> to vector<2x128xf32>
    %379 = arith.addf %376, %378 : vector<2x128xf32>
    %c0_103 = arith.constant 0 : index
    %c0_104 = arith.constant 0 : index
    %380 = vector.load %arg14[%c0_103, %c0_104] : memref<2x128xf32, #tpu.memory_space<vmem>>, vector<2x128xf32>
    tpu.vector_store %arg14[%c0_103, %c0_104], %379 {strides = array<i32>} : memref<2x128xf32, #tpu.memory_space<vmem>>, vector<2x128xf32>,
    return
  }
  func.func @transform_0(%arg0: i32) -> (i32, i32, i32, i32) {
    %c0_i32 = arith.constant 0 : i32
    %c0_i32_0 = arith.constant 0 : i32
    %c0_i32_1 = arith.constant 0 : i32
    %c0_i32_2 = arith.constant 0 : i32
    return %arg0, %c0_i32, %c0_i32_0, %c0_i32_1 : i32, i32, i32, i32
  }
  func.func @transform_1(%arg0: i32) -> (i32, i32) {
    %c0_i32 = arith.constant 0 : i32
    %c0_i32_0 = arith.constant 0 : i32
    return %arg0, %c0_i32 : i32, i32
  }
  func.func @transform_2(%arg0: i32) -> (i32, i32) {
    %c0_i32 = arith.constant 0 : i32
    %c0_i32_0 = arith.constant 0 : i32
    %c0_i32_1 = arith.constant 0 : i32
    return %c0_i32, %c0_i32_0 : i32, i32
  }
  func.func @transform_3(%arg0: i32) -> (i32, i32) {
    %c0_i32 = arith.constant 0 : i32
    %c0_i32_0 = arith.constant 0 : i32
    %c0_i32_1 = arith.constant 0 : i32
    return %c0_i32, %c0_i32_0 : i32, i32
  }
  func.func @transform_4(%arg0: i32) -> (i32, i32, i32) {
    %c0_i32 = arith.constant 0 : i32
    %c0_i32_0 = arith.constant 0 : i32
    %c0_i32_1 = arith.constant 0 : i32
    %c0_i32_2 = arith.constant 0 : i32
    return %c0_i32, %c0_i32_0, %c0_i32_1 : i32, i32, i32
  }
  func.func @transform_5(%arg0: i32) -> (i32, i32) {
    %c0_i32 = arith.constant 0 : i32
    %c0_i32_0 = arith.constant 0 : i32
    %c0_i32_1 = arith.constant 0 : i32
    return %c0_i32, %c0_i32_0 : i32, i32
  }
  func.func @transform_6(%arg0: i32) -> (i32, i32) {
    %c0_i32 = arith.constant 0 : i32
    %c0_i32_0 = arith.constant 0 : i32
    %c0_i32_1 = arith.constant 0 : i32
    return %c0_i32, %c0_i32_0 : i32, i32
  }
  func.func @transform_7(%arg0: i32) -> (i32, i32) {
    %c0_i32 = arith.constant 0 : i32
    %c0_i32_0 = arith.constant 0 : i32
    %c0_i32_1 = arith.constant 0 : i32
    return %c0_i32, %c0_i32_0 : i32, i32
  }
  func.func @transform_8(%arg0: i32) -> (i32, i32) {
    %c0_i32 = arith.constant 0 : i32
    %c0_i32_0 = arith.constant 0 : i32
    %c0_i32_1 = arith.constant 0 : i32
    return %c0_i32, %c0_i32_0 : i32, i32
  }
  func.func @transform_9(%arg0: i32) -> (i32, i32) {
    %c0_i32 = arith.constant 0 : i32
    %c0_i32_0 = arith.constant 0 : i32
    %c0_i32_1 = arith.constant 0 : i32
    return %c0_i32, %c0_i32_0 : i32, i32
  }
  func.func @transform_10(%arg0: i32) -> (i32, i32) {
    %c0_i32 = arith.constant 0 : i32
    %c0_i32_0 = arith.constant 0 : i32
    %c0_i32_1 = arith.constant 0 : i32
    return %c0_i32, %c0_i32_0 : i32, i32
  }
  func.func @transform_11(%arg0: i32) -> (i32, i32) {
    %c0_i32 = arith.constant 0 : i32
    %c0_i32_0 = arith.constant 0 : i32
    %c0_i32_1 = arith.constant 0 : i32
    return %c0_i32, %c0_i32_0 : i32, i32
  }
  func.func @transform_12(%arg0: i32) -> (i32, i32) {
    %c0_i32 = arith.constant 0 : i32
    %c0_i32_0 = arith.constant 0 : i32
    %c0_i32_1 = arith.constant 0 : i32
    return %c0_i32, %c0_i32_0 : i32, i32
  }
  func.func @transform_13(%arg0: i32) -> (i32, i32) {
    %c0_i32 = arith.constant 0 : i32
    %c0_i32_0 = arith.constant 0 : i32
    return %arg0, %c0_i32 : i32, i32
  }
}

</mosaic_0001>

<bundles_post_ra>
// kernel: tpu_custom_call.1
= control target key start
LH: loop header
LB: loop body
LE: loop exit
PB: predicated region body
PF: predicated region fallthrough
CT: control target
= control target key end

     0   :  { %s8036_s0 = inlined_call_operand.vmem [shape: f32[2,4,18,18], index: 0, kind: input, shape index: {}]   ;;  %s8037_s1 = inlined_call_operand.vmem [shape: f32[2,8], index: 1, kind: input, shape index: {}]   ;;  %s8038_s2 = inlined_call_operand.vmem [shape: f32[36,128], index: 2, kind: input, shape index: {}]   ;;  %s8039_s3 = inlined_call_operand.vmem [shape: f32[1,128], index: 3, kind: input, shape index: {}]   ;;  %s8040_s4 = inlined_call_operand.hbm [shape: f32[4,128,128], index: 4, kind: input, shape index: {}]   ;;  %s8041_s5 = inlined_call_operand.vmem [shape: f32[8,128], index: 5, kind: input, shape index: {}]   ;;  %s8042_s6 = inlined_call_operand.vmem [shape: f32[1,128], index: 6, kind: input, shape index: {}]   ;;  %s8043_s7 = inlined_call_operand.vmem [shape: f32[128,32], index: 7, kind: input, shape index: {}]   ;;  %s8044_s8 = inlined_call_operand.vmem [shape: f32[1,32], index: 8, kind: input, shape index: {}]   ;;  %s8045_s9 = inlined_call_operand.vmem [shape: f32[1,32], index: 9, kind: input, shape index: {}]   ;;  %s8046_s10 = inlined_call_operand.<no memory space> [shape: f32[1,1], index: 10, kind: input, shape index: {}]   ;;  %s8047_s11 = inlined_call_operand.vmem [shape: f32[128,128], index: 11, kind: input, shape index: {}]   ;;  %s8048_s12 = inlined_call_operand.vmem [shape: f32[1,128], index: 12, kind: input, shape index: {}]   ;;  %s8049_s13 = inlined_call_operand.hbm [shape: f32[2,128], index: 13, kind: output, shape index: {}]  }
   0x1   :  { %8167 = sst [smem:[#allocation174_spill]] %s8037_s1  ;;  %v18_v0 = vstv %s8046_s10 }
   0x2   :  { %8168 = sst [smem:[#allocation175_spill]] %s8039_s3  ;;  %19 = vst [vmem:[#allocation2] sm:$0x1] %v18_v0 }
   0x3   :  { %8169 = sst [smem:[#allocation176_spill]] %s8041_s5 }
   0x4   :  { %8170 = sst [smem:[#allocation177_spill]] %s8042_s6 }
   0x5   :  { %8171 = sst [smem:[#allocation178_spill]] %s8043_s7 }
   0x6   :  { %8172 = sst [smem:[#allocation179_spill]] %s8044_s8 }
   0x7   :  { %8173 = sst [smem:[#allocation180_spill]] %s8045_s9 }
   0x8   :  { %8174 = sst [smem:[#allocation181_spill]] %s8047_s11 }
   0x9   :  { %8175 = sst [smem:[#allocation182_spill]] %s8048_s12 }
   0xa   :  { %8176 = sst [smem:[#allocation183_spill]] %s8049_s13 }
   0xb   :  { %20 = vsyncpa [#allocation4], 0 }
   0xc   :  { %21 = vsyncpa [#allocation5], 0  ;;  %s34_s29 = sshll.u32 %s8040_s4, 4  ;;  %s3809_s30 = smov [#allocation3]   ;;  %s35_s29 = int_to_ptr.hbm [resolvable:$true] %s34_s29 }
   0xd   :  { %s36_s14 = sshll.u32 %s3809_s30, 4  ;;  %s3810_s15 = smov 128   ;;  %s37_s14 = int_to_ptr.vmem [resolvable:$true] %s36_s14 }
   0xe   :  { %s3811_s16 = smov 8  }
   0xf   :  { %42 = dma.hbm_to_vmem [thread:$0]  %s35_s29, 8192, %s37_s14, [#allocation4], %s3810_s15, %s3810_s15, %s3811_s16  }
  0x10   :  { %3805 = dma.done.wait [#allocation4], 8192  }
  0x11   :  { %3806 = vsyncadd [#allocation4], 4294959104  ;;  %v3916_v1 = vld [vmem:[%s8036_s0 + $0x60] sm:$0xff]  ;;  %s8098_s4 = smov 16   ;;  %s8096_s20 = smov 32   ;;  %v3932_v3 = vld [vmem:[%s8036_s0 + $0x68] sm:$0xff] }
  0x12   :  { %v3921_v2 = vld [vmem:[%s8036_s0] sm:$0xff]  ;;  %77 = vrot.lane.b32.xlu1 %v3916_v1, %s8098_s4  ;;  %v3937_v4 = vld [vmem:[%s8036_s0 + $0x8] sm:$0xff]  ;;  %s8092_s25 = smov 48   ;;  %s8090_s26 = smov 64   ;;  %vm157_vm0 = vcmask 130048   ;;  %vm162_vm1 = vcmask 261120  }
  0x13   :  { %85 = vrot.lane.b32.xlu2 %v3921_v2, %s8096_s20  ;;  %73 = vrot.lane.b32.xlu0 %v3921_v2, %s8098_s4  ;;  %s8086_s27 = smov 80   ;;  %s8084_s28 = smov 96   ;;  %vm167_vm2 = vcmask 392192   ;;  %vm172_vm3 = vcmask 523264   ;;  %vm177_vm4 = vcmask 654336   ;;  %vm182_vm5 = vcmask 785408  }
  0x14   :  { %s8080_s29 = smov 112   ;;  %s8078_s30 = smov 127   ;;  %vm187_vm6 = vcmask 916480   ;;  %v3674_v38 = vld [vmem:[%s8038_s2] ss:$0 sm:$0xff]  ;;  %vm542_vm7 = vcmask 1046528  }
  0x15   :  { %s8076_s14 = smov 15   ;;  %s8074_s15 = smov 31   ;;  %vm763_vm8 = vcmask 1045504   ;;  %vm3183_vm9 = vcmask 1043456   ;;  %vm3253_vm10 = vcmask 1041409   ;;  %vm3424_vm11 = vcmask 64512  }
  0x16   :  { %s8072_s16 = smov 47   ;;  %s8070_s17 = smov 63   ;;  %vm3454_vm13 = vcmask 1041408   ;;  %vm3504_vm15 = vcmask 257024  }
  0x17   :  { %s8068_s18 = smov 79   ;;  %s8066_s10 = smov 95  }
  0x18   :  { %s8064_s19 = smov 111   ;;  %s8050_s21 = smov 126  }
  0x19   :  { %s8060_s22 = smov 14   ;;  %s8052_s23 = smov 30  }
  0x1a   :  { %79 = vrot.lane.b32.xlu1 %v3932_v3, %s8098_s4  ;;  %s8058_s24 = smov 62   ;;  %s8297_s12 = smov 16  }
  0x1b   :  { %87 = vrot.lane.b32.xlu2 %v3937_v4, %s8096_s20  ;;  %75 = vrot.lane.b32.xlu0 %v3937_v4, %s8098_s4  ;;  %s8299_s13 = smov 32   ;;  %s8302_s9 = smov 48  }
  0x1c   :  { %s8303_s11 = smov 64   ;;  %s8306_s8 = smov 80  }
  0x1d   :  { %s8603_s5 = sld [smem:[#allocation176_spill]] }
  0x1e   :  { %s8604_s6 = sld [smem:[#allocation174_spill]] }
  0x1f   :  { %s8605_s7 = sld [smem:[#allocation178_spill]] }
  0x20   :  { %s8607_s3 = sld [smem:[#allocation179_spill]] }
  0x22   :  { %91 = vrot.lane.b32.xlu1 %v3932_v3, %s8096_s20 }
  0x23   :  { %97 = vrot.lane.b32.xlu2 %v3921_v2, %s8092_s25  ;;  %89 = vrot.lane.b32.xlu0 %v3916_v1, %s8096_s20 }
  0x2a   :  { %101 = vrot.lane.b32.xlu1 %v3916_v1, %s8092_s25 }
  0x2b   :  { %103 = vrot.lane.b32.xlu2 %v3932_v3, %s8092_s25  ;;  %99 = vrot.lane.b32.xlu0 %v3937_v4, %s8092_s25 }
  0x32   :  { %111 = vrot.lane.b32.xlu1 %v3937_v4, %s8090_s26 }
  0x33   :  { %113 = vrot.lane.b32.xlu2 %v3916_v1, %s8090_s26  ;;  %109 = vrot.lane.b32.xlu0 %v3921_v2, %s8090_s26 }
  0x3a   :  { %121 = vrot.lane.b32.xlu1 %v3921_v2, %s8086_s27 }
  0x3b   :  { %123 = vrot.lane.b32.xlu2 %v3937_v4, %s8086_s27  ;;  %115 = vrot.lane.b32.xlu0 %v3932_v3, %s8090_s26 }
  0x42   :  { %127 = vrot.lane.b32.xlu1 %v3932_v3, %s8086_s27 }
  0x43   :  { %133 = vrot.lane.b32.xlu2 %v3921_v2, %s8084_s28  ;;  %125 = vrot.lane.b32.xlu0 %v3916_v1, %s8086_s27 }
  0x4a   :  { %137 = vrot.lane.b32.xlu1 %v3916_v1, %s8084_s28 }
  0x4b   :  { %139 = vrot.lane.b32.xlu2 %v3932_v3, %s8084_s28  ;;  %135 = vrot.lane.b32.xlu0 %v3937_v4, %s8084_s28 }
  0x52   :  { %147 = vrot.lane.b32.xlu1 %v3937_v4, %s8080_s29 }
  0x53   :  { %149 = vrot.lane.b32.xlu2 %v3916_v1, %s8080_s29  ;;  %145 = vrot.lane.b32.xlu0 %v3921_v2, %s8080_s29 }
  0x5a   :  { %202 = vrot.lane.b32.xlu1 %v3921_v2, %s8078_s30 }
  0x5b   :  { %204 = vrot.lane.b32.xlu2 %v3937_v4, %s8078_s30  ;;  %151 = vrot.lane.b32.xlu0 %v3932_v3, %s8080_s29 }
  0x62   :  { %208 = vrot.lane.b32.xlu1 %v3932_v3, %s8078_s30 }
  0x63   :  { %214 = vrot.lane.b32.xlu2 %v3921_v2, %s8076_s14  ;;  %206 = vrot.lane.b32.xlu0 %v3916_v1, %s8078_s30 }
  0x6a   :  { %218 = vrot.lane.b32.xlu1 %v3916_v1, %s8076_s14 }
  0x6b   :  { %220 = vrot.lane.b32.xlu2 %v3932_v3, %s8076_s14  ;;  %216 = vrot.lane.b32.xlu0 %v3937_v4, %s8076_s14 }
  0x6d   :  { %v4005_v5 = vpop.permute.xlu2 %85 }
  0x6e   :  { %8177 = vst [vmem:[#allocation9_spill] sm:$0xff] %v4005_v5 }
  0x72   :  { %228 = vrot.lane.b32.xlu1 %v3937_v4, %s8074_s15 }
  0x73   :  { %230 = vrot.lane.b32.xlu2 %v3916_v1, %s8074_s15  ;;  %226 = vrot.lane.b32.xlu0 %v3921_v2, %s8074_s15 }
  0x75   :  { %v4013_v6 = vpop.permute.xlu2 %87 }
  0x7a   :  { %238 = vrot.lane.b32.xlu1 %v3921_v2, %s8072_s16 }
  0x7b   :  { %240 = vrot.lane.b32.xlu2 %v3937_v4, %s8072_s16  ;;  %232 = vrot.lane.b32.xlu0 %v3932_v3, %s8074_s15 }
  0x7d   :  { %v4021_v7 = vpop.permute.xlu2 %97 }
  0x7e   :  { %8178 = vst [vmem:[#allocation10_spill] sm:$0xff] %v4021_v7 }
  0x82   :  { %244 = vrot.lane.b32.xlu1 %v3932_v3, %s8072_s16 }
  0x83   :  { %250 = vrot.lane.b32.xlu2 %v3921_v2, %s8070_s17  ;;  %242 = vrot.lane.b32.xlu0 %v3916_v1, %s8072_s16 }
  0x84   :  { %v4029_v8 = vpop.permute.xlu1 %77 }
  0x85   :  { %8179 = vst [vmem:[#allocation11_spill] sm:$0xff] %v4029_v8  ;;  %v4031_v9 = vpop.permute.xlu2 %103  ;;  %v4033_v10 = vpop.permute.xlu0 %73 }
  0x86   :  { %8180 = vst [vmem:[#allocation12_spill] sm:$0xff] %v4033_v10 }
  0x8a   :  { %254 = vrot.lane.b32.xlu1 %v3916_v1, %s8070_s17 }
  0x8b   :  { %256 = vrot.lane.b32.xlu2 %v3932_v3, %s8070_s17  ;;  %252 = vrot.lane.b32.xlu0 %v3937_v4, %s8070_s17 }
  0x8c   :  { %v80_v11 = vpop.permute.xlu1 %79 }
  0x8d   :  { %v4041_v12 = vpop.permute.xlu2 %113  ;;  %v76_v13 = vpop.permute.xlu0 %75  ;;  %v161_v37 = vsel %vm157_vm0, %v3932_v3, %v80_v11 }
  0x8e   :  { %8181 = vst [vmem:[#allocation13_spill] sm:$0xff] %v4041_v12  ;;  %v159_v29 = vsel %vm157_vm0, %v3937_v4, %v76_v13 }
  0x8f   :  { %v164_v33 = vsel %vm162_vm1, %v159_v29, %v4013_v6 }
  0x92   :  { %264 = vrot.lane.b32.xlu1 %v3937_v4, %s8068_s18 }
  0x93   :  { %266 = vrot.lane.b32.xlu2 %v3916_v1, %s8068_s18  ;;  %262 = vrot.lane.b32.xlu0 %v3921_v2, %s8068_s18 }
  0x94   :  { %v92_v14 = vpop.permute.xlu1 %91 }
  0x95   :  { %v124_v15 = vpop.permute.xlu2 %123  ;;  %v4049_v16 = vpop.permute.xlu0 %89  ;;  %v166_v42 = vsel %vm162_vm1, %v161_v37, %v92_v14 }
  0x96   :  { %8182 = vst [vmem:[#allocation14_spill] sm:$0xff] %v4049_v16  ;;  %v171_v46 = vsel %vm167_vm2, %v166_v42, %v4031_v9 }
  0x9a   :  { %274 = vrot.lane.b32.xlu1 %v3921_v2, %s8066_s10 }
  0x9b   :  { %276 = vrot.lane.b32.xlu2 %v3937_v4, %s8066_s10  ;;  %268 = vrot.lane.b32.xlu0 %v3932_v3, %s8068_s18 }
  0x9c   :  { %v4057_v17 = vpop.permute.xlu1 %101 }
  0x9d   :  { %8183 = vst [vmem:[#allocation15_spill] sm:$0xff] %v4057_v17  ;;  %v4059_v18 = vpop.permute.xlu2 %133  ;;  %v100_v19 = vpop.permute.xlu0 %99 }
  0x9e   :  { %8184 = vst [vmem:[#allocation16_spill] sm:$0xff] %v4059_v18  ;;  %v169_v34 = vsel %vm167_vm2, %v164_v33, %v100_v19 }
  0xa2   :  { %280 = vrot.lane.b32.xlu1 %v3932_v3, %s8066_s10 }
  0xa3   :  { %286 = vrot.lane.b32.xlu2 %v3921_v2, %s8064_s19  ;;  %278 = vrot.lane.b32.xlu0 %v3916_v1, %s8066_s10 }
  0xa4   :  { %v112_v20 = vpop.permute.xlu1 %111 }
  0xa5   :  { %v140_v21 = vpop.permute.xlu2 %139  ;;  %v4067_v22 = vpop.permute.xlu0 %109  ;;  %v174_v35 = vsel %vm172_vm3, %v169_v34, %v112_v20 }
  0xa6   :  { %8185 = vst [vmem:[#allocation17_spill] sm:$0xff] %v4067_v22  ;;  %v179_v36 = vsel %vm177_vm4, %v174_v35, %v124_v15 }
  0xaa   :  { %290 = vrot.lane.b32.xlu1 %v3916_v1, %s8064_s19 }
  0xab   :  { %292 = vrot.lane.b32.xlu2 %v3932_v3, %s8064_s19  ;;  %288 = vrot.lane.b32.xlu0 %v3937_v4, %s8064_s19  ;;  %s8222_s19 = smov 14  }
  0xac   :  { %v4075_v23 = vpop.permute.xlu1 %121 }
  0xad   :  { %8186 = vst [vmem:[#allocation18_spill] sm:$0xff] %v4075_v23  ;;  %v4077_v24 = vpop.permute.xlu2 %149  ;;  %v116_v25 = vpop.permute.xlu0 %115  ;;  %v3680_v23 = vld [vmem:[%s8038_s2 + $0x2] ss:$0 sm:$0xff] }
  0xae   :  { %8187 = vst [vmem:[#allocation19_spill] sm:$0xff] %v4077_v24  ;;  %v176_v47 = vsel %vm172_vm3, %v171_v46, %v116_v25 }
  0xb2   :  { %338 = vrot.lane.b32.xlu1 %v3937_v4, %s8050_s21 }
  0xb3   :  { %340 = vrot.lane.b32.xlu2 %v3916_v1, %s8050_s21  ;;  %336 = vrot.lane.b32.xlu0 %v3921_v2, %s8050_s21 }
  0xb4   :  { %v128_v26 = vpop.permute.xlu1 %127 }
  0xb5   :  { %v4085_v27 = vpop.permute.xlu2 %204  ;;  %v4087_v28 = vpop.permute.xlu0 %125  ;;  %v181_v48 = vsel %vm177_vm4, %v176_v47, %v128_v26  ;;  %v4222_v26 = vld [vmem:[%s8036_s0 + $0x70] sm:$0x3] }
  0xb6   :  { %8188 = vst [vmem:[#allocation20_spill] sm:$0xff] %v4087_v28  ;;  %v186_v51 = vsel %vm182_vm5, %v181_v48, %v140_v21  ;;  %v4209_v21 = vld [vmem:[%s8036_s0 + $0x10] sm:$0x3] }
  0xba   :  { %348 = vrot.lane.b32.xlu1 %v3921_v2, %s8060_s22 }
  0xbb   :  { %350 = vrot.lane.b32.xlu2 %v3937_v4, %s8060_s22  ;;  %342 = vrot.lane.b32.xlu0 %v3932_v3, %s8050_s21  ;;  %s8054_s21 = smov 46  }
  0xbc   :  { %v4097_v30 = vpop.permute.xlu1 %137 }
  0xbd   :  { %8189 = vst [vmem:[#allocation21_spill] sm:$0xff] %v4097_v30  ;;  %v4099_v31 = vpop.permute.xlu2 %214  ;;  %v136_v32 = vpop.permute.xlu0 %135 }
  0xbe   :  { %8190 = vst [vmem:[#allocation22_spill] sm:$0xff] %v4099_v31  ;;  %v184_v39 = vsel %vm182_vm5, %v179_v36, %v136_v32 }
  0xc2   :  { %354 = vrot.lane.b32.xlu1 %v3932_v3, %s8060_s22 }
  0xc3   :  { %360 = vrot.lane.b32.xlu2 %v3921_v2, %s8052_s23  ;;  %352 = vrot.lane.b32.xlu0 %v3916_v1, %s8060_s22  ;;  %s8224_s22 = smov 30  }
  0xc4   :  { %v148_v40 = vpop.permute.xlu1 %147 }
  0xc5   :  { %v4118_v41 = vpop.permute.xlu2 %220  ;;  %v4122_v43 = vsel %vm187_vm6, %v184_v39, %v148_v40  ;;  %v4124_v44 = vpop.permute.xlu0 %145 }
  0xc6   :  { %8191 = vst [vmem:[#allocation23_spill] sm:$0xff] %v4124_v44  ;;  %v4127_v45 = vmul.f32 %v3674_v38, %v4122_v43 }
  0xca   :  { %364 = vrot.lane.b32.xlu1 %v3916_v1, %s8052_s23 }
  0xcb   :  { %366 = vrot.lane.b32.xlu2 %v3932_v3, %s8052_s23  ;;  %362 = vrot.lane.b32.xlu0 %v3937_v4, %s8052_s23  ;;  %s8056_s23 = smov 78  }
  0xcc   :  { %v4139_v49 = vpop.permute.xlu1 %202 }
  0xcd   :  { %8192 = vst [vmem:[#allocation24_spill] sm:$0xff] %v4139_v49  ;;  %v4141_v50 = vpop.permute.xlu2 %230  ;;  %v152_v52 = vpop.permute.xlu0 %151 }
  0xce   :  { %8193 = vst [vmem:[#allocation25_spill] sm:$0xff] %v4141_v50  ;;  %v4145_v53 = vsel %vm187_vm6, %v186_v51, %v152_v52 }
  0xcf   :  { %v4148_v54 = vmul.f32 %v3674_v38, %v4145_v53 }
  0xd2   :  { %374 = vrot.lane.b32.xlu1 %v3937_v4, %s8054_s21 }
  0xd3   :  { %376 = vrot.lane.b32.xlu2 %v3916_v1, %s8054_s21  ;;  %372 = vrot.lane.b32.xlu0 %v3921_v2, %s8054_s21 }
  0xd4   :  { %v209_v55 = vpop.permute.xlu1 %208 }
  0xd5   :  { %v4156_v56 = vpop.permute.xlu2 %240  ;;  %v4158_v57 = vpop.permute.xlu0 %206  ;;  %v301_v32 = vsel %vm157_vm0, %v209_v55, %v4118_v41  ;;  %v3677_v41 = vld [vmem:[%s8038_s2 + $0x1] ss:$0 sm:$0xff] }
  0xd6   :  { %8194 = vst [vmem:[#allocation26_spill] sm:$0xff] %v4158_v57 }
  0xda   :  { %384 = vrot.lane.b32.xlu1 %v3921_v2, %s8058_s24 }
  0xdb   :  { %386 = vrot.lane.b32.xlu2 %v3937_v4, %s8058_s24  ;;  %378 = vrot.lane.b32.xlu0 %v3932_v3, %s8054_s21  ;;  %s8062_s21 = smov 94  }
  0xdc   :  { %v4166_v58 = vpop.permute.xlu1 %218 }
  0xdd   :  { %8195 = vst [vmem:[#allocation27_spill] sm:$0xff] %v4166_v58  ;;  %v4168_v59 = vpop.permute.xlu2 %250  ;;  %v217_v60 = vpop.permute.xlu0 %216 }
  0xde   :  { %8196 = vst [vmem:[#allocation28_spill] sm:$0xff] %v4168_v59  ;;  %v299_v36 = vsel %vm157_vm0, %v4085_v27, %v217_v60 }
  0xe2   :  { %390 = vrot.lane.b32.xlu1 %v3932_v3, %s8058_s24 }
  0xe3   :  { %396 = vrot.lane.b32.xlu2 %v3921_v2, %s8056_s23  ;;  %388 = vrot.lane.b32.xlu0 %v3916_v1, %s8058_s24  ;;  %s8220_s24 = smov 126  }
  0xe4   :  { %v229_v61 = vpop.permute.xlu1 %228 }
  0xe5   :  { %v257_v62 = vpop.permute.xlu2 %256  ;;  %v4176_v63 = vpop.permute.xlu0 %226  ;;  %v303_v40 = vsel %vm162_vm1, %v299_v36, %v229_v61 }
  0xe6   :  { %8197 = vst [vmem:[#allocation29_spill] sm:$0xff] %v4176_v63  ;;  %v307_v48 = vsel %vm167_vm2, %v303_v40, %v4156_v56 }
  0xea   :  { %400 = vrot.lane.b32.xlu1 %v3916_v1, %s8056_s23 }
  0xeb   :  { %402 = vrot.lane.b32.xlu2 %v3932_v3, %s8056_s23  ;;  %398 = vrot.lane.b32.xlu0 %v3937_v4, %s8056_s23  ;;  %s8082_s23 = smov 110  }
  0xec   :  { %v4184_v0 = vpop.permute.xlu1 %238 }
  0xed   :  { %8198 = vst [vmem:[#allocation30_spill] sm:$0xff] %v4184_v0  ;;  %v4186_v6 = vpop.permute.xlu2 %266  ;;  %v233_v9 = vpop.permute.xlu0 %232 }
  0xee   :  { %8199 = vst [vmem:[#allocation31_spill] sm:$0xff] %v4186_v6  ;;  %v305_v33 = vsel %vm162_vm1, %v301_v32, %v233_v9 }
  0xf2   :  { %410 = vrot.lane.b32.xlu1 %v3937_v4, %s8062_s21 }
  0xf3   :  { %412 = vrot.lane.b32.xlu2 %v3916_v1, %s8062_s21  ;;  %408 = vrot.lane.b32.xlu0 %v3921_v2, %s8062_s21 }
  0xf4   :  { %v245_v11 = vpop.permute.xlu1 %244 }
  0xf5   :  { %v277_v13 = vpop.permute.xlu2 %276  ;;  %v4194_v14 = vpop.permute.xlu0 %242  ;;  %v309_v34 = vsel %vm167_vm2, %v305_v33, %v245_v11 }
  0xf6   :  { %8200 = vst [vmem:[#allocation32_spill] sm:$0xff] %v4194_v14  ;;  %v313_v35 = vsel %vm172_vm3, %v309_v34, %v257_v62 }
  0xfa   :  { %420 = vrot.lane.b32.xlu1 %v3921_v2, %s8082_s23 }
  0xfb   :  { %422 = vrot.lane.b32.xlu2 %v3937_v4, %s8082_s23  ;;  %414 = vrot.lane.b32.xlu0 %v3932_v3, %s8062_s21  ;;  %s8219_s21 = smov 111  }
  0xfc   :  { %v4202_v15 = vpop.permute.xlu1 %254 }
  0xfd   :  { %8201 = vst [vmem:[#allocation33_spill] sm:$0xff] %v4202_v15  ;;  %v4204_v19 = vpop.permute.xlu2 %286  ;;  %v253_v20 = vpop.permute.xlu0 %252 }
  0xfe   :  { %8202 = vst [vmem:[#allocation34_spill] sm:$0xff] %v4204_v19  ;;  %v311_v51 = vsel %vm172_vm3, %v307_v48, %v253_v20 }
 0x102   :  { %426 = vrot.lane.b32.xlu1 %v3932_v3, %s8082_s23 }
 0x103   :  { %472 = vrot.lane.b32.xlu2 %v4209_v21, %s8098_s4  ;;  %424 = vrot.lane.b32.xlu0 %v3916_v1, %s8082_s23 }
 0x104   :  { %v265_v2 = vpop.permute.xlu1 %264 }
 0x105   :  { %v293_v4 = vpop.permute.xlu2 %292  ;;  %v4217_v25 = vpop.permute.xlu0 %262  ;;  %v315_v55 = vsel %vm177_vm4, %v311_v51, %v265_v2 }
 0x106   :  { %8203 = vst [vmem:[#allocation35_spill] sm:$0xff] %v4217_v25  ;;  %v319_v56 = vsel %vm182_vm5, %v315_v55, %v277_v13 }
 0x10a   :  { %478 = vrot.lane.b32.xlu1 %v4209_v21, %s8096_s20 }
 0x10b   :  { %480 = vrot.lane.b32.xlu2 %v4222_v26, %s8096_s20  ;;  %474 = vrot.lane.b32.xlu0 %v4222_v26, %s8098_s4 }
 0x10c   :  { %v4230_v3 = vpop.permute.xlu1 %274 }
 0x10d   :  { %8204 = vst [vmem:[#allocation36_spill] sm:$0xff] %v4230_v3  ;;  %v4232_v1 = vpop.permute.xlu2 %340  ;;  %v269_v29 = vpop.permute.xlu0 %268 }
 0x10e   :  { %8205 = vst [vmem:[#allocation37_spill] sm:$0xff] %v4232_v1  ;;  %v317_v37 = vsel %vm177_vm4, %v313_v35, %v269_v29 }
 0x112   :  { %486 = vrot.lane.b32.xlu1 %v4222_v26, %s8092_s25 }
 0x113   :  { %490 = vrot.lane.b32.xlu2 %v4209_v21, %s8090_s26  ;;  %484 = vrot.lane.b32.xlu0 %v4209_v21, %s8092_s25 }
 0x114   :  { %v281_v38 = vpop.permute.xlu1 %280 }
 0x115   :  { %v4248_v39 = vpop.permute.xlu2 %350  ;;  %v321_v42 = vsel %vm182_vm5, %v317_v37, %v281_v38  ;;  %v4255_v46 = vpop.permute.xlu0 %278 }
 0x116   :  { %8206 = vst [vmem:[#allocation38_spill] sm:$0xff] %v4255_v46  ;;  %v4258_v47 = vsel %vm187_vm6, %v321_v42, %v293_v4 }
 0x117   :  { %8207 = vst [vmem:[#allocation39_spill] sm:$0xff] %v4258_v47  ;;  %v331_v27 = vmul.f32 %v3677_v41, %v4258_v47 }
 0x119   :  { %v4265_v52 = vadd.f32 %v331_v27, %v4148_v54 }
 0x11a   :  { %496 = vrot.lane.b32.xlu1 %v4209_v21, %s8086_s27 }
 0x11b   :  { %498 = vrot.lane.b32.xlu2 %v4222_v26, %s8086_s27  ;;  %492 = vrot.lane.b32.xlu0 %v4222_v26, %s8090_s26 }
 0x11c   :  { %v4274_v60 = vpop.permute.xlu1 %290 }
 0x11d   :  { %8208 = vst [vmem:[#allocation40_spill] sm:$0xff] %v4274_v60  ;;  %v4276_v61 = vpop.permute.xlu2 %360  ;;  %v289_v62 = vpop.permute.xlu0 %288 }
 0x11e   :  { %8209 = vst [vmem:[#allocation41_spill] sm:$0xff] %v4276_v61  ;;  %v4280_v54 = vsel %vm187_vm6, %v319_v56, %v289_v62 }
 0x11f   :  { %v329_v9 = vmul.f32 %v3677_v41, %v4280_v54 }
 0x121   :  { %v4284_v11 = vadd.f32 %v329_v9, %v4127_v45 }
 0x122   :  { %504 = vrot.lane.b32.xlu1 %v4222_v26, %s8084_s28 }
 0x123   :  { %508 = vrot.lane.b32.xlu2 %v4209_v21, %s8080_s29  ;;  %502 = vrot.lane.b32.xlu0 %v4209_v21, %s8084_s28  ;;  %s8234_s28 = smov 96  }
 0x124   :  { %v339_v20 = vpop.permute.xlu1 %338 }
 0x125   :  { %v4292_v13 = vpop.permute.xlu2 %366  ;;  %v4294_v2 = vpop.permute.xlu0 %336 }
 0x126   :  { %8210 = vst [vmem:[#allocation42_spill] sm:$0xff] %v4294_v2 }
 0x12a   :  { %561 = vrot.lane.b32.xlu1 %v4209_v21, %s8078_s30 }
 0x12b   :  { %563 = vrot.lane.b32.xlu2 %v4222_v26, %s8078_s30  ;;  %510 = vrot.lane.b32.xlu0 %v4222_v26, %s8080_s29  ;;  %s8239_s29 = smov 31   ;;  %s8241_s30 = smov 47  }
 0x12c   :  { %v4302_v45 = vpop.permute.xlu1 %348 }
 0x12d   :  { %8211 = vst [vmem:[#allocation43_spill] sm:$0xff] %v4302_v45  ;;  %v4304_v4 = vpop.permute.xlu2 %376  ;;  %v343_v29 = vpop.permute.xlu0 %342 }
 0x12e   :  { %8212 = vst [vmem:[#allocation44_spill] sm:$0xff] %v4304_v4 }
 0x132   :  { %569 = vrot.lane.b32.xlu1 %v4222_v26, %s8076_s14 }
 0x133   :  { %573 = vrot.lane.b32.xlu2 %v4209_v21, %s8074_s15  ;;  %567 = vrot.lane.b32.xlu0 %v4209_v21, %s8076_s14  ;;  %s8235_s14 = smov 112  }
 0x134   :  { %v355_v32 = vpop.permute.xlu1 %354 }
 0x135   :  { %v387_v33 = vpop.permute.xlu2 %386  ;;  %v4312_v34 = vpop.permute.xlu0 %352 }
 0x136   :  { %8213 = vst [vmem:[#allocation45_spill] sm:$0xff] %v4312_v34 }
 0x13a   :  { %579 = vrot.lane.b32.xlu1 %v4209_v21, %s8072_s16 }
 0x13b   :  { %581 = vrot.lane.b32.xlu2 %v4222_v26, %s8072_s16  ;;  %575 = vrot.lane.b32.xlu0 %v4222_v26, %s8074_s15  ;;  %s8227_s16 = smov 62   ;;  %s8236_s15 = smov 127  }
 0x13c   :  { %v4320_v35 = vpop.permute.xlu1 %364 }
 0x13d   :  { %8214 = vst [vmem:[#allocation46_spill] sm:$0xff] %v4320_v35  ;;  %v4322_v36 = vpop.permute.xlu2 %396  ;;  %v363_v37 = vpop.permute.xlu0 %362 }
 0x13e   :  { %8215 = vst [vmem:[#allocation47_spill] sm:$0xff] %v4322_v36  ;;  %v433_v36 = vsel %vm157_vm0, %v339_v20, %v4248_v39 }
 0x13f   :  { %v437_v18 = vsel %vm162_vm1, %v433_v36, %v363_v37 }
 0x142   :  { %587 = vrot.lane.b32.xlu1 %v4222_v26, %s8070_s17 }
 0x143   :  { %591 = vrot.lane.b32.xlu2 %v4209_v21, %s8068_s18  ;;  %585 = vrot.lane.b32.xlu0 %v4209_v21, %s8070_s17  ;;  %s8229_s17 = smov 78  }
 0x144   :  { %v375_v38 = vpop.permute.xlu1 %374 }
 0x145   :  { %v403_v40 = vpop.permute.xlu2 %402  ;;  %v4330_v41 = vpop.permute.xlu0 %372  ;;  %v441_v19 = vsel %vm167_vm2, %v437_v18, %v375_v38 }
 0x146   :  { %8216 = vst [vmem:[#allocation48_spill] sm:$0xff] %v4330_v41 }
 0x14a   :  { %597 = vrot.lane.b32.xlu1 %v4209_v21, %s8066_s10 }
 0x14b   :  { %599 = vrot.lane.b32.xlu2 %v4222_v26, %s8066_s10  ;;  %593 = vrot.lane.b32.xlu0 %v4222_v26, %s8068_s18  ;;  %s8225_s10 = smov 46   ;;  %s8230_s18 = smov 94  }
 0x14c   :  { %v4338_v42 = vpop.permute.xlu1 %384 }
 0x14d   :  { %8217 = vst [vmem:[#allocation49_spill] sm:$0xff] %v4338_v42  ;;  %v4340_v27 = vpop.permute.xlu2 %412  ;;  %v379_v48 = vpop.permute.xlu0 %378  ;;  %v445_v42 = vsel %vm172_vm3, %v441_v19, %v387_v33 }
 0x14e   :  { %8218 = vst [vmem:[#allocation50_spill] sm:$0xff] %v4340_v27 }
 0x152   :  { %605 = vrot.lane.b32.xlu1 %v4222_v26, %s8219_s21 }
 0x153   :  { %655 = vrot.lane.b32.xlu2 %v4209_v21, %s8220_s24  ;;  %603 = vrot.lane.b32.xlu0 %v4209_v21, %s8219_s21 }
 0x154   :  { %v391_v51 = vpop.permute.xlu1 %390 }
 0x155   :  { %v423_v55 = vpop.permute.xlu2 %422  ;;  %v4348_v56 = vpop.permute.xlu0 %388 }
 0x156   :  { %8221 = vst [vmem:[#allocation51_spill] sm:$0xff] %v4348_v56 }
 0x15a   :  { %661 = vrot.lane.b32.xlu1 %v4209_v21, %s8222_s19 }
 0x15b   :  { %663 = vrot.lane.b32.xlu2 %v4222_v26, %s8222_s19  ;;  %657 = vrot.lane.b32.xlu0 %v4222_v26, %s8220_s24 }
 0x15c   :  { %v4356_v62 = vpop.permute.xlu1 %400 }
 0x15d   :  { %8223 = vst [vmem:[#allocation52_spill] sm:$0xff] %v4356_v62  ;;  %v4358_v9 = vpop.permute.xlu2 %472  ;;  %v399_v44 = vpop.permute.xlu0 %398 }
 0x15e   :  { %v449_v39 = vsel %vm177_vm4, %v445_v42, %v399_v44  ;;  %v435_v44 = vsel %vm157_vm0, %v343_v29, %v355_v32 }
 0x162   :  { %669 = vrot.lane.b32.xlu1 %v4222_v26, %s8224_s22 }
 0x163   :  { %673 = vrot.lane.b32.xlu2 %v4209_v21, %s8225_s10  ;;  %667 = vrot.lane.b32.xlu0 %v4209_v21, %s8224_s22 }
 0x164   :  { %v411_v20 = vpop.permute.xlu1 %410 }
 0x165   :  { %v4375_v36 = vpop.permute.xlu2 %480  ;;  %v453_v18 = vsel %vm182_vm5, %v449_v39, %v411_v20  ;;  %v4378_v37 = vpop.permute.xlu0 %408 }
 0x166   :  { %8226 = vst [vmem:[#allocation53_spill] sm:$0xff] %v4378_v37  ;;  %v4381_v38 = vsel %vm187_vm6, %v453_v18, %v423_v55 }
 0x167   :  { %v463_v19 = vmul.f32 %v3680_v23, %v4381_v38 }
 0x169   :  { %v4385_v33 = vadd.f32 %v463_v19, %v4284_v11  ;;  %v439_v11 = vsel %vm162_vm1, %v435_v44, %v4292_v13 }
 0x16a   :  { %679 = vrot.lane.b32.xlu1 %v4209_v21, %s8227_s16  ;;  %v443_v20 = vsel %vm167_vm2, %v439_v11, %v379_v48 }
 0x16b   :  { %681 = vrot.lane.b32.xlu2 %v4222_v26, %s8227_s16  ;;  %675 = vrot.lane.b32.xlu0 %v4222_v26, %s8225_s10  ;;  %v447_v18 = vsel %vm172_vm3, %v443_v20, %v391_v51  ;;  %v4446_v20 = vld [vmem:[%s8036_s0 + $0x18] sm:$0xff] }
 0x16c   :  { %v4394_v42 = vpop.permute.xlu1 %420  ;;  %v451_v29 = vsel %vm177_vm4, %v447_v18, %v403_v40 }
 0x16d   :  { %8228 = vst [vmem:[#allocation54_spill] sm:$0xff] %v4394_v42  ;;  %v4396_v55 = vpop.permute.xlu2 %490  ;;  %v415_v39 = vpop.permute.xlu0 %414 }
 0x16e   :  { %v455_v32 = vsel %vm182_vm5, %v451_v29, %v415_v39 }
 0x172   :  { %687 = vrot.lane.b32.xlu1 %v4222_v26, %s8229_s17 }
 0x173   :  { %691 = vrot.lane.b32.xlu2 %v4209_v21, %s8230_s18  ;;  %685 = vrot.lane.b32.xlu0 %v4209_v21, %s8229_s17 }
 0x174   :  { %v427_v19 = vpop.permute.xlu1 %426 }
 0x175   :  { %v4410_v42 = vpop.permute.xlu2 %498  ;;  %v4413_v13 = vsel %vm187_vm6, %v455_v32, %v427_v19  ;;  %v4415_v48 = vpop.permute.xlu0 %424  ;;  %v4463_v19 = vld [vmem:[%s8036_s0 + $0x80] sm:$0xff] }
 0x176   :  { %8231 = vst [vmem:[#allocation55_spill] sm:$0xff] %v4413_v13  ;;  %v465_v51 = vmul.f32 %v3680_v23, %v4413_v13  ;;  %v4436_v23 = vld [vmem:[%s8036_s0 + $0x20] sm:$0xff] }
 0x177   :  { %8232 = vst [vmem:[#allocation56_spill] sm:$0xff] %v4415_v48 }
 0x178   :  { %v4419_v44 = vadd.f32 %v465_v51, %v4265_v52  ;;  %v4441_v52 = vld [vmem:[%s8036_s0 + $0x78] sm:$0xff] }
 0x17a   :  { %8233 = vst [vmem:[#allocation57_spill] sm:$0xff] %v4419_v44  ;;  %697 = vrot.lane.b32.xlu1 %v4209_v21, %s8082_s23 }
 0x17b   :  { %699 = vrot.lane.b32.xlu2 %v4222_v26, %s8082_s23  ;;  %693 = vrot.lane.b32.xlu0 %v4222_v26, %s8230_s18  ;;  %s8237_s23 = smov 15  }
 0x17c   :  { %v4427_v40 = vpop.permute.xlu1 %478 }
 0x17d   :  { %v4429_v39 = vpop.permute.xlu2 %508  ;;  %v4431_v11 = vpop.permute.xlu0 %474 }
 0x182   :  { %859 = vrot.lane.b32.xlu1 %v4436_v23, %s8098_s4 }
 0x183   :  { %861 = vrot.lane.b32.xlu2 %v4441_v52, %s8098_s4  ;;  %857 = vrot.lane.b32.xlu0 %v4446_v20, %s8098_s4 }
 0x184   :  { %v4454_v18 = vpop.permute.xlu1 %486 }
 0x185   :  { %v4456_v29 = vpop.permute.xlu2 %563  ;;  %v4458_v32 = vpop.permute.xlu0 %484 }
 0x18a   :  { %869 = vrot.lane.b32.xlu1 %v4446_v20, %s8096_s20 }
 0x18b   :  { %871 = vrot.lane.b32.xlu2 %v4436_v23, %s8096_s20  ;;  %863 = vrot.lane.b32.xlu0 %v4463_v19, %s8098_s4  ;;  %s8294_s4 = smov 110  }
 0x18c   :  { %v4471_v51 = vpop.permute.xlu1 %496 }
 0x18d   :  { %v4473_v37 = vpop.permute.xlu2 %573  ;;  %v4475_v41 = vpop.permute.xlu0 %492 }
 0x192   :  { %875 = vrot.lane.b32.xlu1 %v4463_v19, %s8096_s20 }
 0x193   :  { %881 = vrot.lane.b32.xlu2 %v4446_v20, %s8092_s25  ;;  %873 = vrot.lane.b32.xlu0 %v4441_v52, %s8096_s20 }
 0x194   :  { %v4483_v3 = vpop.permute.xlu1 %504 }
 0x195   :  { %v4485_v61 = vpop.permute.xlu2 %581  ;;  %v4487_v25 = vpop.permute.xlu0 %502 }
 0x19a   :  { %885 = vrot.lane.b32.xlu1 %v4441_v52, %s8092_s25 }
 0x19b   :  { %887 = vrot.lane.b32.xlu2 %v4463_v19, %s8092_s25  ;;  %883 = vrot.lane.b32.xlu0 %v4436_v23, %s8092_s25  ;;  %s8254_s25 = smov 95  }
 0x19c   :  { %v4495_v22 = vpop.permute.xlu1 %561 }
 0x19d   :  { %v4497_v59 = vpop.permute.xlu2 %591  ;;  %v4499_v7 = vpop.permute.xlu0 %510 }
 0x1a2   :  { %895 = vrot.lane.b32.xlu1 %v4436_v23, %s8090_s26 }
 0x1a3   :  { %897 = vrot.lane.b32.xlu2 %v4441_v52, %s8090_s26  ;;  %893 = vrot.lane.b32.xlu0 %v4446_v20, %s8090_s26 }
 0x1a4   :  { %v4507_v2 = vpop.permute.xlu1 %569 }
 0x1a5   :  { %v4509_v45 = vpop.permute.xlu2 %599  ;;  %v4511_v0 = vpop.permute.xlu0 %567 }
 0x1a6   :  { %v609_v47 = vsel %vm157_vm0, %v4495_v22, %v4511_v0 }
 0x1aa   :  { %905 = vrot.lane.b32.xlu1 %v4446_v20, %s8086_s27 }
 0x1ab   :  { %907 = vrot.lane.b32.xlu2 %v4436_v23, %s8086_s27  ;;  %899 = vrot.lane.b32.xlu0 %v4463_v19, %s8090_s26  ;;  %s8250_s26 = smov 79  }
 0x1ac   :  { %v4519_v5 = vpop.permute.xlu1 %579 }
 0x1ad   :  { %v4521_v63 = vpop.permute.xlu2 %655  ;;  %v4523_v48 = vpop.permute.xlu0 %575 }
 0x1b2   :  { %911 = vrot.lane.b32.xlu1 %v4463_v19, %s8086_s27 }
 0x1b3   :  { %917 = vrot.lane.b32.xlu2 %v4446_v20, %s8234_s28  ;;  %909 = vrot.lane.b32.xlu0 %v4441_v52, %s8086_s27  ;;  %s8243_s27 = smov 63  }
 0x1b4   :  { %v4531_v49 = vpop.permute.xlu1 %587 }
 0x1b5   :  { %v4533_v31 = vpop.permute.xlu2 %663  ;;  %v4535_v27 = vpop.permute.xlu0 %585 }
 0x1ba   :  { %921 = vrot.lane.b32.xlu1 %v4441_v52, %s8234_s28 }
 0x1bb   :  { %923 = vrot.lane.b32.xlu2 %v4463_v19, %s8234_s28  ;;  %919 = vrot.lane.b32.xlu0 %v4436_v23, %s8234_s28 }
 0x1bc   :  { %v4543_v24 = vpop.permute.xlu1 %597 }
 0x1bd   :  { %v4545_v10 = vpop.permute.xlu2 %673  ;;  %v4547_v60 = vpop.permute.xlu0 %593 }
 0x1c2   :  { %931 = vrot.lane.b32.xlu1 %v4436_v23, %s8235_s14 }
 0x1c3   :  { %933 = vrot.lane.b32.xlu2 %v4441_v52, %s8235_s14  ;;  %929 = vrot.lane.b32.xlu0 %v4446_v20, %s8235_s14 }
 0x1c4   :  { %v4555_v46 = vpop.permute.xlu1 %605 }
 0x1c5   :  { %v4557_v62 = vpop.permute.xlu2 %681  ;;  %v4559_v6 = vpop.permute.xlu0 %603 }
 0x1ca   :  { %979 = vrot.lane.b32.xlu1 %v4446_v20, %s8236_s15 }
 0x1cb   :  { %981 = vrot.lane.b32.xlu2 %v4436_v23, %s8236_s15  ;;  %935 = vrot.lane.b32.xlu0 %v4463_v19, %s8235_s14 }
 0x1cc   :  { %v662_v30 = vpop.permute.xlu1 %661 }
 0x1cd   :  { %v4567_v56 = vpop.permute.xlu2 %691  ;;  %v4569_v28 = vpop.permute.xlu0 %657 }
 0x1d2   :  { %985 = vrot.lane.b32.xlu1 %v4463_v19, %s8236_s15 }
 0x1d3   :  { %991 = vrot.lane.b32.xlu2 %v4446_v20, %s8237_s23  ;;  %983 = vrot.lane.b32.xlu0 %v4441_v52, %s8236_s15 }
 0x1d4   :  { %v4577_v4 = vpop.permute.xlu1 %669 }
 0x1d5   :  { %v4579_v12 = vpop.permute.xlu2 %699  ;;  %v668_v15 = vpop.permute.xlu0 %667 }
 0x1da   :  { %995 = vrot.lane.b32.xlu1 %v4441_v52, %s8237_s23 }
 0x1db   :  { %997 = vrot.lane.b32.xlu2 %v4463_v19, %s8237_s23  ;;  %993 = vrot.lane.b32.xlu0 %v4436_v23, %s8237_s23 }
 0x1dc   :  { %v680_v14 = vpop.permute.xlu1 %679 }
 0x1dd   :  { %v4587_v35 = vpop.permute.xlu2 %861  ;;  %v4589_v50 = vpop.permute.xlu0 %675 }
 0x1de   :  { %8238 = vst [vmem:[#allocation58_spill] sm:$0xff] %v4587_v35 }
 0x1e2   :  { %1005 = vrot.lane.b32.xlu1 %v4436_v23, %s8239_s29 }
 0x1e3   :  { %1007 = vrot.lane.b32.xlu2 %v4441_v52, %s8239_s29  ;;  %1003 = vrot.lane.b32.xlu0 %v4446_v20, %s8239_s29 }
 0x1e4   :  { %v4597_v17 = vpop.permute.xlu1 %687 }
 0x1e5   :  { %v4599_v1 = vpop.permute.xlu2 %871  ;;  %v686_v34 = vpop.permute.xlu0 %685 }
 0x1e6   :  { %8240 = vst [vmem:[#allocation59_spill] sm:$0xff] %v4599_v1 }
 0x1ea   :  { %1015 = vrot.lane.b32.xlu1 %v4446_v20, %s8241_s30 }
 0x1eb   :  { %1017 = vrot.lane.b32.xlu2 %v4436_v23, %s8241_s30  ;;  %1009 = vrot.lane.b32.xlu0 %v4463_v19, %s8239_s29 }
 0x1ec   :  { %v4607_v35 = vpop.permute.xlu1 %697 }
 0x1ed   :  { %v4609_v16 = vpop.permute.xlu2 %881  ;;  %v4611_v8 = vpop.permute.xlu0 %693 }
 0x1ee   :  { %8242 = vst [vmem:[#allocation60_spill] sm:$0xff] %v4609_v16 }
 0x1f2   :  { %1021 = vrot.lane.b32.xlu1 %v4463_v19, %s8241_s30 }
 0x1f3   :  { %1027 = vrot.lane.b32.xlu2 %v4446_v20, %s8243_s27  ;;  %1019 = vrot.lane.b32.xlu0 %v4441_v52, %s8241_s30 }
 0x1f4   :  { %v4619_v57 = vpop.permute.xlu1 %859 }
 0x1f5   :  { %8244 = vst [vmem:[#allocation61_spill] sm:$0xff] %v4619_v57  ;;  %v4621_v58 = vpop.permute.xlu2 %887  ;;  %v4623_v44 = vpop.permute.xlu0 %857 }
 0x1f6   :  { %8245 = vst [vmem:[#allocation62_spill] sm:$0xff] %v4621_v58 }
 0x1f7   :  { %8246 = vst [vmem:[#allocation63_spill] sm:$0xff] %v4623_v44 }
 0x1fa   :  { %1031 = vrot.lane.b32.xlu1 %v4441_v52, %s8243_s27 }
 0x1fb   :  { %1033 = vrot.lane.b32.xlu2 %v4463_v19, %s8243_s27  ;;  %1029 = vrot.lane.b32.xlu0 %v4436_v23, %s8243_s27 }
 0x1fc   :  { %v4631_v16 = vpop.permute.xlu1 %869 }
 0x1fd   :  { %8247 = vst [vmem:[#allocation64_spill] sm:$0xff] %v4631_v16  ;;  %v4633_v1 = vpop.permute.xlu2 %897  ;;  %v4635_v13 = vpop.permute.xlu0 %863 }
 0x1fe   :  { %8248 = vst [vmem:[#allocation65_spill] sm:$0xff] %v4633_v1 }
 0x1ff   :  { %8249 = vst [vmem:[#allocation66_spill] sm:$0xff] %v4635_v13 }
 0x202   :  { %1041 = vrot.lane.b32.xlu1 %v4436_v23, %s8250_s26 }
 0x203   :  { %1043 = vrot.lane.b32.xlu2 %v4441_v52, %s8250_s26  ;;  %1039 = vrot.lane.b32.xlu0 %v4446_v20, %s8250_s26 }
 0x204   :  { %v4643_v44 = vpop.permute.xlu1 %875 }
 0x205   :  { %8251 = vst [vmem:[#allocation67_spill] sm:$0xff] %v4643_v44  ;;  %v4645_v58 = vpop.permute.xlu2 %907  ;;  %v4647_v57 = vpop.permute.xlu0 %873  ;;  %v514_v44 = vsel %vm157_vm0, %v4209_v21, %v4358_v9  ;;  %v611_v9 = vsel %vm162_vm1, %v609_v47, %v4473_v37  ;;  %v515_v37 = vsel %vm157_vm0, %v4222_v26, %v4431_v11 }
 0x206   :  { %8252 = vst [vmem:[#allocation68_spill] sm:$0xff] %v4645_v58 }
 0x207   :  { %8253 = vst [vmem:[#allocation69_spill] sm:$0xff] %v4647_v57  ;;  %v516_v57 = vsel %vm162_vm1, %v514_v44, %v4427_v40 }
 0x208   :  { %v518_v58 = vsel %vm167_vm2, %v516_v57, %v4458_v32 }
 0x209   :  { %v520_v21 = vsel %vm172_vm3, %v518_v58, %v4396_v55 }
 0x20a   :  { %1051 = vrot.lane.b32.xlu1 %v4446_v20, %s8254_s25  ;;  %v522_v22 = vsel %vm177_vm4, %v520_v21, %v4471_v51 }
 0x20b   :  { %1053 = vrot.lane.b32.xlu2 %v4436_v23, %s8254_s25  ;;  %1045 = vrot.lane.b32.xlu0 %v4463_v19, %s8250_s26  ;;  %v524_v58 = vsel %vm182_vm5, %v522_v22, %v4487_v25 }
 0x20c   :  { %v4655_v16 = vpop.permute.xlu1 %885  ;;  %v526_v55 = vsel %vm187_vm6, %v524_v58, %v4429_v39 }
 0x20d   :  { %8255 = vst [vmem:[#allocation70_spill] sm:$0xff] %v4655_v16  ;;  %v4657_v1 = vpop.permute.xlu2 %917  ;;  %v4659_v13 = vpop.permute.xlu0 %883  ;;  %v703_v16 = vsel %vm157_vm0, %v4521_v63, %v662_v30  ;;  %v613_v30 = vsel %vm167_vm2, %v611_v9, %v4519_v5 }
 0x20e   :  { %8256 = vst [vmem:[#allocation71_spill] sm:$0xff] %v4657_v1  ;;  %v705_v57 = vsel %vm162_vm1, %v703_v16, %v668_v15  ;;  %v615_v47 = vsel %vm172_vm3, %v613_v30, %v4535_v27  ;;  %v3675_v27 = vld [vmem:[%s8038_s2 + $0x3] ss:$0 sm:$0xff]  ;;  %v3689_v1 = vld [vmem:[%s8038_s2 + $0xb] ss:$0 sm:$0xff] }
 0x20f   :  { %v707_v15 = vsel %vm167_vm2, %v705_v57, %v4545_v10  ;;  %v617_v25 = vsel %vm177_vm4, %v615_v47, %v4497_v59  ;;  %v610_v10 = vsel %vm157_vm0, %v4456_v29, %v4507_v2 }
 0x210   :  { %v709_v5 = vsel %vm172_vm3, %v707_v15, %v680_v14  ;;  %v619_v26 = vsel %vm182_vm5, %v617_v25, %v4543_v24  ;;  %v517_v14 = vsel %vm162_vm1, %v515_v37, %v4375_v36  ;;  %v612_v40 = vsel %vm162_vm1, %v610_v10, %v4523_v48  ;;  %v3678_v24 = vld [vmem:[%s8038_s2 + $0x4] ss:$0 sm:$0xff] }
 0x211   :  { %v711_v44 = vsel %vm177_vm4, %v709_v5, %v686_v34  ;;  %v4723_v59 = vsel %vm187_vm6, %v619_v26, %v4559_v6  ;;  %v519_v2 = vsel %vm167_vm2, %v517_v14, %v4454_v18  ;;  %v532_v34 = vmul.f32 %v3675_v27, %v526_v55 }
 0x212   :  { %1057 = vrot.lane.b32.xlu1 %v4463_v19, %s8254_s25  ;;  %v704_v36 = vsel %vm157_vm0, %v4569_v28, %v4533_v31  ;;  %v713_v6 = vsel %vm182_vm5, %v711_v44, %v4567_v56  ;;  %v4742_v48 = vmul.f32 %v3675_v27, %v4122_v43  ;;  %v521_v39 = vsel %vm172_vm3, %v519_v2, %v4475_v41  ;;  %v3681_v56 = vld [vmem:[%s8038_s2 + $0x5] ss:$0 sm:$0xff] }
 0x213   :  { %1063 = vrot.lane.b32.xlu2 %v4446_v20, %s8219_s21  ;;  %1055 = vrot.lane.b32.xlu0 %v4441_v52, %s8254_s25  ;;  %v706_v11 = vsel %vm162_vm1, %v704_v36, %v4577_v4  ;;  %v4750_v18 = vsel %vm187_vm6, %v713_v6, %v4607_v35  ;;  %v614_v29 = vsel %vm167_vm2, %v612_v40, %v4485_v61  ;;  %v546_v9 = vrot.slane %v532_v34, 1  ;;  %v8266_v36 = vld [vmem:[#allocation39_spill] sm:$0xff] }
 0x214   :  { %v4688_v63 = vpop.permute.xlu1 %895  ;;  %8258 = vst [vmem:[#allocation73_spill] sm:$0xff] %v4742_v48  ;;  %v627_v41 = vmul.f32 %v3678_v24, %v4723_v59  ;;  %v708_v4 = vsel %vm167_vm2, %v706_v11, %v4589_v50  ;;  %v4767_v35 = vmul.f32 %v3678_v24, %v4280_v54  ;;  %v616_v51 = vsel %vm172_vm3, %v614_v29, %v4531_v49 }
 0x215   :  { %v4690_v0 = vpop.permute.xlu2 %923  ;;  %v4696_v16 = vpop.permute.xlu0 %893  ;;  %v523_v21 = vsel %vm177_vm4, %v521_v39, %v4410_v42  ;;  %v618_v61 = vsel %vm177_vm4, %v616_v51, %v4547_v60  ;;  %v721_v57 = vmul.f32 %v3681_v56, %v4750_v18  ;;  %v8107_v22 = vrot.slane %v4742_v48, 1 }
 0x216   :  { %8257 = vst [vmem:[#allocation72_spill] sm:$0xff] %v4696_v16  ;;  %v525_v50 = vsel %vm182_vm5, %v523_v21, %v4483_v3  ;;  %v710_v30 = vsel %vm172_vm3, %v708_v4, %v4557_v62  ;;  %v4782_v58 = vmul.f32 %v3681_v56, %v4381_v38  ;;  %v640_v42 = vrot.slane %v627_v41, 1  ;;  %v8268_v41 = vld [vmem:[#allocation55_spill] sm:$0xff] }
 0x217   :  { %8261 = vst [vmem:[#allocation76_spill] sm:$0xff] %v4767_v35  ;;  %v527_v49 = vsel %vm187_vm6, %v525_v50, %v4499_v7  ;;  %v712_v60 = vsel %vm177_vm4, %v710_v30, %v4597_v17  ;;  %v620_v47 = vsel %vm182_vm5, %v618_v61, %v4509_v45  ;;  %v3676_v7 = vld [vmem:[%s8038_s2 + $0x6] ss:$0 sm:$0xff]  ;;  %v8106_v62 = vrot.slane %v4767_v35, 1 }
 0x218   :  { %8262 = vst [vmem:[#allocation77_spill] sm:$0xff] %v4782_v58  ;;  %v714_v3 = vsel %vm182_vm5, %v712_v60, %v4611_v8  ;;  %v547_v17 = vsel %vm542_vm7, %v8107_v22, %v546_v9  ;;  %v622_v45 = vsel %vm187_vm6, %v620_v47, %v4555_v46  ;;  %v734_v8 = vrot.slane %v721_v57, 1 }
 0x219   :  { %v535_v15 = vmul.f32 %v3675_v27, %v527_v49  ;;  %v8104_v25 = vrot.slane %v4782_v58, 1  ;;  %v753_v44 = vmul.f32 %v3676_v7, %v526_v55  ;;  %v641_v10 = vsel %vm542_vm7, %v8106_v62, %v640_v42  ;;  %v3679_v55 = vld [vmem:[%s8038_s2 + $0x7] ss:$0 sm:$0xff] }
 0x21a   :  { %1067 = vrot.lane.b32.xlu1 %v4441_v52, %s8219_s21  ;;  %v4817_v26 = vsel %vm187_vm6, %v714_v3, %v4579_v12  ;;  %v4822_v14 = vmul.f32 %v3675_v27, %v4145_v53  ;;  %v630_v40 = vmul.f32 %v3678_v24, %v622_v45  ;;  %v558_v2 = vadd.f32 %v547_v17, %v4385_v33 }
 0x21b   :  { %1069 = vrot.lane.b32.xlu2 %v4463_v19, %s8219_s21  ;;  %1065 = vrot.lane.b32.xlu0 %v4436_v23, %s8219_s21  ;;  %v4826_v34 = vmul.f32 %v3676_v7, %v4122_v43  ;;  %v735_v12 = vsel %vm542_vm7, %v8104_v25, %v734_v8  ;;  %v4835_v6 = vmul.f32 %v3678_v24, %v8266_v36  ;;  %v551_v39 = vrot.slane %v535_v15, 1 }
 0x21c   :  { %v4752_v28 = vpop.permute.xlu1 %905  ;;  %8264 = vst [vmem:[#allocation79_spill] sm:$0xff] %v4822_v14  ;;  %v652_v27 = vadd.f32 %v641_v10, %v558_v2  ;;  %v724_v11 = vmul.f32 %v3681_v56, %v4817_v26  ;;  %v767_v29 = vrot.slane %v753_v44, 2  ;;  %v786_v33 = vmul.f32 %v3679_v55, %v4723_v59  ;;  %v3682_v59 = vld [vmem:[%s8038_s2 + $0x8] ss:$0 sm:$0xff] }
 0x21d   :  { %8259 = vst [vmem:[#allocation74_spill] sm:$0xff] %v4752_v28  ;;  %v4754_v31 = vpop.permute.xlu2 %933  ;;  %v4764_v32 = vpop.permute.xlu0 %899  ;;  %v8112_v43 = vrot.slane %v4822_v14, 1  ;;  %v4841_v4 = vmul.f32 %v3681_v56, %v8268_v41  ;;  %v645_v51 = vrot.slane %v630_v40, 1  ;;  %v8103_v24 = vrot.slane %v4826_v34, 2  ;;  %v8271_v56 = vld [vmem:[#allocation61_spill] sm:$0xff]  ;;  %v8275_v40 = vld [vmem:[#allocation59_spill] sm:$0xff] }
 0x21e   :  { %8260 = vst [vmem:[#allocation75_spill] sm:$0xff] %v4754_v31  ;;  %v746_v21 = vadd.f32 %v735_v12, %v652_v27  ;;  %v4849_v9 = vmul.f32 %v3679_v55, %v4280_v54  ;;  %v942_v61 = vsel %vm157_vm0, %v4436_v23, %v8271_v56  ;;  %v4860_v57 = vmul.f32 %v3676_v7, %v4145_v53 }
 0x21f   :  { %8265 = vst [vmem:[#allocation80_spill] sm:$0xff] %v4826_v34  ;;  %v8111_v50 = vrot.slane %v4835_v6, 1  ;;  %v552_v54 = vsel %vm542_vm7, %v8112_v43, %v551_v39  ;;  %v739_v30 = vrot.slane %v724_v11, 1  ;;  %v768_v47 = vsel %vm763_vm8, %v8103_v24, %v767_v29 }
 0x220   :  { %8267 = vst [vmem:[#allocation39_spill] sm:$0xff] %v4835_v6  ;;  %v756_v3 = vmul.f32 %v3676_v7, %v527_v49  ;;  %v799_v17 = vrot.slane %v786_v33, 2  ;;  %v818_v53 = vmul.f32 %v3682_v59, %v4750_v18  ;;  %v8110_v15 = vrot.slane %v4841_v4, 1  ;;  %v8277_v49 = vld [vmem:[#allocation57_spill] sm:$0xff] }
 0x221   :  { %8269 = vst [vmem:[#allocation55_spill] sm:$0xff] %v4841_v4  ;;  %v646_v44 = vsel %vm542_vm7, %v8111_v50, %v645_v51  ;;  %v779_v10 = vadd.f32 %v768_v47, %v746_v21  ;;  %v946_v2 = vsel %vm162_vm1, %v942_v61, %v8275_v40  ;;  %v8102_v12 = vrot.slane %v4849_v9, 2  ;;  %v8280_v47 = vld [vmem:[#allocation66_spill] sm:$0xff] }
 0x222   :  { %1115 = vrot.lane.b32.xlu1 %v4436_v23, %s8220_s24  ;;  %8270 = vst [vmem:[#allocation81_spill] sm:$0xff] %v4849_v9  ;;  %v4882_v39 = vmul.f32 %v3682_v59, %v4381_v38  ;;  %v560_v7 = vadd.f32 %v552_v54, %v8277_v49  ;;  %v950_v18 = vsel %vm167_vm2, %v946_v2, %v4659_v13  ;;  %v772_v29 = vrot.slane %v756_v3, 2  ;;  %v8278_v54 = vld [vmem:[#allocation68_spill] sm:$0xff] }
 0x223   :  { %1117 = vrot.lane.b32.xlu2 %v4441_v52, %s8220_s24  ;;  %1113 = vrot.lane.b32.xlu0 %v4446_v20, %s8220_s24  ;;  %8272 = vst [vmem:[#allocation61_spill] sm:$0xff] %v4860_v57  ;;  %v740_v27 = vsel %vm542_vm7, %v8110_v15, %v739_v30  ;;  %v954_v11 = vsel %vm172_vm3, %v950_v18, %v4688_v63  ;;  %v831_v38 = vrot.slane %v818_v53, 2  ;;  %v8109_v56 = vrot.slane %v4860_v57, 2 }
 0x224   :  { %v4807_v37 = vpop.permute.xlu1 %911  ;;  %8276 = vst [vmem:[#allocation59_spill] sm:$0xff] %v4882_v39  ;;  %v654_v33 = vadd.f32 %v646_v44, %v560_v7  ;;  %v800_v51 = vsel %vm763_vm8, %v8102_v12, %v799_v17  ;;  %v789_v21 = vmul.f32 %v3679_v55, %v622_v45  ;;  %v8101_v61 = vrot.slane %v4882_v39, 2  ;;  %v3683_v17 = vld [vmem:[%s8038_s2 + $0x9] ss:$0 sm:$0xff] }
 0x225   :  { %v4809_v5 = vpop.permute.xlu2 %981  ;;  %v4819_v46 = vpop.permute.xlu0 %909  ;;  %v811_v13 = vadd.f32 %v800_v51, %v779_v10  ;;  %v958_v30 = vsel %vm177_vm4, %v954_v11, %v8278_v54  ;;  %v4906_v45 = vmul.f32 %v3679_v55, %v8266_v36  ;;  %v944_v3 = vsel %vm157_vm0, %v4463_v19, %v8280_v47  ;;  %v8281_v36 = vld [vmem:[#allocation67_spill] sm:$0xff] }
 0x226   :  { %8263 = vst [vmem:[#allocation78_spill] sm:$0xff] %v4819_v46  ;;  %v748_v63 = vadd.f32 %v740_v27, %v654_v33  ;;  %v773_v40 = vsel %vm763_vm8, %v8109_v56, %v772_v29  ;;  %v832_v55 = vsel %vm763_vm8, %v8101_v61, %v831_v38  ;;  %v948_v2 = vsel %vm162_vm1, %v944_v3, %v8281_v36  ;;  %v8284_v38 = vld [vmem:[#allocation62_spill] sm:$0xff]  ;;  %v5041_v61 = vld [vmem:[%s8036_s0 + $0x88] sm:$0x3] }
 0x227   :  { %8279 = vst [vmem:[#allocation57_spill] sm:$0xff] %v4906_v45  ;;  %v821_v18 = vmul.f32 %v3682_v59, %v4817_v26  ;;  %v843_v27 = vadd.f32 %v832_v55, %v811_v13  ;;  %v8108_v29 = vrot.slane %v4906_v45, 2  ;;  %v4934_v51 = vmul.f32 %v3682_v59, %v8268_v41 }
 0x228   :  { %v781_v33 = vadd.f32 %v773_v40, %v748_v63  ;;  %v952_v54 = vsel %vm167_vm2, %v948_v2, %v8284_v38 }
 0x229   :  { %8283 = vst [vmem:[#allocation66_spill] sm:$0xff] %v4934_v51  ;;  %v956_v47 = vsel %vm172_vm3, %v952_v54, %v4764_v32  ;;  %v8105_v32 = vrot.slane %v4934_v51, 2 }
 0x22a   :  { %1125 = vrot.lane.b32.xlu1 %v4446_v20, %s8222_s19  ;;  %v960_v13 = vsel %vm177_vm4, %v956_v47, %v4807_v37 }
 0x22b   :  { %1127 = vrot.lane.b32.xlu2 %v4436_v23, %s8222_s19  ;;  %1119 = vrot.lane.b32.xlu0 %v4463_v19, %s8220_s24  ;;  %v964_v3 = vsel %vm182_vm5, %v960_v13, %v4690_v0 }
 0x22c   :  { %v4866_v42 = vpop.permute.xlu1 %921 }
 0x22d   :  { %8273 = vst [vmem:[#allocation82_spill] sm:$0xff] %v4866_v42  ;;  %v4868_v60 = vpop.permute.xlu2 %991  ;;  %v920_v8 = vpop.permute.xlu0 %919 }
 0x22e   :  { %8274 = vst [vmem:[#allocation83_spill] sm:$0xff] %v4868_v60  ;;  %v962_v53 = vsel %vm182_vm5, %v958_v30, %v920_v8  ;;  %v804_v8 = vrot.slane %v789_v21, 2  ;;  %v836_v21 = vrot.slane %v821_v18, 2 }
 0x230   :  { %v805_v26 = vsel %vm763_vm8, %v8108_v29, %v804_v8 }
 0x231   :  { %v813_v41 = vadd.f32 %v805_v26, %v781_v33 }
 0x232   :  { %1131 = vrot.lane.b32.xlu1 %v4463_v19, %s8222_s19 }
 0x233   :  { %1137 = vrot.lane.b32.xlu2 %v4446_v20, %s8224_s22  ;;  %1129 = vrot.lane.b32.xlu0 %v4441_v52, %s8222_s19 }
 0x234   :  { %v932_v44 = vpop.permute.xlu1 %931 }
 0x235   :  { %v4915_v10 = vpop.permute.xlu2 %997  ;;  %v4926_v49 = vsel %vm187_vm6, %v962_v53, %v932_v44  ;;  %v4928_v7 = vpop.permute.xlu0 %929  ;;  %v837_v53 = vsel %vm763_vm8, %v8105_v32, %v836_v21 }
 0x236   :  { %8282 = vst [vmem:[#allocation68_spill] sm:$0xff] %v4928_v7  ;;  %v972_v11 = vmul.f32 %v3683_v17, %v4926_v49  ;;  %v845_v40 = vadd.f32 %v837_v53, %v813_v41 }
 0x238   :  { %v4938_v30 = vadd.f32 %v972_v11, %v843_v27 }
 0x23a   :  { %1141 = vrot.lane.b32.xlu1 %v4441_v52, %s8224_s22 }
 0x23b   :  { %1143 = vrot.lane.b32.xlu2 %v4463_v19, %s8224_s22  ;;  %1139 = vrot.lane.b32.xlu0 %v4436_v23, %s8224_s22 }
 0x23c   :  { %v4954_v59 = vpop.permute.xlu1 %979 }
 0x23d   :  { %8285 = vst [vmem:[#allocation67_spill] sm:$0xff] %v4954_v59  ;;  %v4956_v63 = vpop.permute.xlu2 %1007  ;;  %v936_v37 = vpop.permute.xlu0 %935 }
 0x23e   :  { %8286 = vst [vmem:[#allocation62_spill] sm:$0xff] %v4956_v63  ;;  %v4964_v44 = vsel %vm187_vm6, %v964_v3, %v936_v37 }
 0x23f   :  { %v974_v55 = vmul.f32 %v3683_v17, %v4964_v44 }
 0x241   :  { %v4967_v36 = vadd.f32 %v974_v55, %v845_v40  ;;  %v5028_v40 = vld [vmem:[%s8036_s0 + $0x28] sm:$0x3] }
 0x242   :  { %1151 = vrot.lane.b32.xlu1 %v4436_v23, %s8225_s10 }
 0x243   :  { %1153 = vrot.lane.b32.xlu2 %v4441_v52, %s8225_s10  ;;  %1149 = vrot.lane.b32.xlu0 %v4446_v20, %s8225_s10 }
 0x244   :  { %v986_v0 = vpop.permute.xlu1 %985 }
 0x245   :  { %v4975_v2 = vpop.permute.xlu2 %1017  ;;  %v4977_v8 = vpop.permute.xlu0 %983  ;;  %v1078_v24 = vsel %vm157_vm0, %v986_v0, %v4915_v10 }
 0x246   :  { %8287 = vst [vmem:[#allocation84_spill] sm:$0xff] %v4977_v8 }
 0x24a   :  { %1161 = vrot.lane.b32.xlu1 %v4446_v20, %s8227_s16 }
 0x24b   :  { %1163 = vrot.lane.b32.xlu2 %v4436_v23, %s8227_s16  ;;  %1155 = vrot.lane.b32.xlu0 %v4463_v19, %s8225_s10 }
 0x24c   :  { %v4985_v17 = vpop.permute.xlu1 %995 }
 0x24d   :  { %8288 = vst [vmem:[#allocation85_spill] sm:$0xff] %v4985_v17  ;;  %v4987_v18 = vpop.permute.xlu2 %1027  ;;  %v994_v27 = vpop.permute.xlu0 %993 }
 0x24e   :  { %8289 = vst [vmem:[#allocation86_spill] sm:$0xff] %v4987_v18  ;;  %v1076_v22 = vsel %vm157_vm0, %v4809_v5, %v994_v27 }
 0x252   :  { %1167 = vrot.lane.b32.xlu1 %v4463_v19, %s8227_s16 }
 0x253   :  { %1173 = vrot.lane.b32.xlu2 %v4446_v20, %s8229_s17  ;;  %1165 = vrot.lane.b32.xlu0 %v4441_v52, %s8227_s16 }
 0x254   :  { %v1006_v11 = vpop.permute.xlu1 %1005 }
 0x255   :  { %v1034_v33 = vpop.permute.xlu2 %1033  ;;  %v4995_v38 = vpop.permute.xlu0 %1003 }
 0x256   :  { %8290 = vst [vmem:[#allocation87_spill] sm:$0xff] %v4995_v38 }
 0x25a   :  { %1177 = vrot.lane.b32.xlu1 %v4441_v52, %s8229_s17 }
 0x25b   :  { %1179 = vrot.lane.b32.xlu2 %v4463_v19, %s8229_s17  ;;  %1175 = vrot.lane.b32.xlu0 %v4436_v23, %s8229_s17 }
 0x25c   :  { %v5003_v54 = vpop.permute.xlu1 %1015 }
 0x25d   :  { %8291 = vst [vmem:[#allocation88_spill] sm:$0xff] %v5003_v54  ;;  %v5005_v47 = vpop.permute.xlu2 %1043  ;;  %v1010_v26 = vpop.permute.xlu0 %1009 }
 0x25e   :  { %8292 = vst [vmem:[#allocation89_spill] sm:$0xff] %v5005_v47  ;;  %v1082_v25 = vsel %vm162_vm1, %v1078_v24, %v1010_v26  ;;  %v3686_v26 = vld [vmem:[%s8038_s2 + $0xa] ss:$0 sm:$0xff] }
 0x262   :  { %1187 = vrot.lane.b32.xlu1 %v4436_v23, %s8230_s18 }
 0x263   :  { %1189 = vrot.lane.b32.xlu2 %v4441_v52, %s8230_s18  ;;  %1185 = vrot.lane.b32.xlu0 %v4446_v20, %s8230_s18 }
 0x264   :  { %v1022_v21 = vpop.permute.xlu1 %1021 }
 0x265   :  { %v1054_v13 = vpop.permute.xlu2 %1053  ;;  %v5013_v41 = vpop.permute.xlu0 %1019  ;;  %v1086_v32 = vsel %vm167_vm2, %v1082_v25, %v1022_v21  ;;  %v1080_v25 = vsel %vm162_vm1, %v1076_v22, %v1006_v11 }
 0x266   :  { %8293 = vst [vmem:[#allocation90_spill] sm:$0xff] %v5013_v41  ;;  %v1090_v62 = vsel %vm172_vm3, %v1086_v32, %v1034_v33 }
 0x26a   :  { %1197 = vrot.lane.b32.xlu1 %v4446_v20, %s8294_s4 }
 0x26b   :  { %1199 = vrot.lane.b32.xlu2 %v4436_v23, %s8294_s4  ;;  %1191 = vrot.lane.b32.xlu0 %v4463_v19, %s8230_s18 }
 0x26c   :  { %v5021_v3 = vpop.permute.xlu1 %1031 }
 0x26d   :  { %8295 = vst [vmem:[#allocation91_spill] sm:$0xff] %v5021_v3  ;;  %v5023_v37 = vpop.permute.xlu2 %1063  ;;  %v1030_v53 = vpop.permute.xlu0 %1029 }
 0x26e   :  { %8296 = vst [vmem:[#allocation92_spill] sm:$0xff] %v5023_v37 }
 0x272   :  { %1203 = vrot.lane.b32.xlu1 %v4463_v19, %s8294_s4 }
 0x273   :  { %1249 = vrot.lane.b32.xlu2 %v5028_v40, %s8297_s12  ;;  %1201 = vrot.lane.b32.xlu0 %v4441_v52, %s8294_s4 }
 0x274   :  { %v1042_v23 = vpop.permute.xlu1 %1041 }
 0x275   :  { %v1070_v20 = vpop.permute.xlu2 %1069  ;;  %v5036_v55 = vpop.permute.xlu0 %1039 }
 0x276   :  { %8298 = vst [vmem:[#allocation93_spill] sm:$0xff] %v5036_v55 }
 0x27a   :  { %1255 = vrot.lane.b32.xlu1 %v5028_v40, %s8299_s13 }
 0x27b   :  { %1257 = vrot.lane.b32.xlu2 %v5041_v61, %s8299_s13  ;;  %1251 = vrot.lane.b32.xlu0 %v5041_v61, %s8297_s12 }
 0x27c   :  { %v5049_v19 = vpop.permute.xlu1 %1051 }
 0x27d   :  { %8300 = vst [vmem:[#allocation94_spill] sm:$0xff] %v5049_v19  ;;  %v5051_v52 = vpop.permute.xlu2 %1117  ;;  %v1046_v12 = vpop.permute.xlu0 %1045 }
 0x27e   :  { %8301 = vst [vmem:[#allocation95_spill] sm:$0xff] %v5051_v52  ;;  %v1094_v10 = vsel %vm177_vm4, %v1090_v62, %v1046_v12  ;;  %v1084_v62 = vsel %vm167_vm2, %v1080_v25, %v4975_v2 }
 0x27f   :  { %v1088_v12 = vsel %vm172_vm3, %v1084_v62, %v1030_v53 }
 0x280   :  { %v1092_v27 = vsel %vm177_vm4, %v1088_v12, %v1042_v23 }
 0x281   :  { %v1096_v2 = vsel %vm182_vm5, %v1092_v27, %v1054_v13 }
 0x282   :  { %1263 = vrot.lane.b32.xlu1 %v5041_v61, %s8302_s9 }
 0x283   :  { %1267 = vrot.lane.b32.xlu2 %v5028_v40, %s8303_s11  ;;  %1261 = vrot.lane.b32.xlu0 %v5028_v40, %s8302_s9 }
 0x284   :  { %v1058_v0 = vpop.permute.xlu1 %1057 }
 0x285   :  { %v5067_v24 = vpop.permute.xlu2 %1127  ;;  %v1098_v21 = vsel %vm182_vm5, %v1094_v10, %v1058_v0  ;;  %v5074_v32 = vpop.permute.xlu0 %1055 }
 0x286   :  { %8304 = vst [vmem:[#allocation96_spill] sm:$0xff] %v5074_v32  ;;  %v5077_v33 = vsel %vm187_vm6, %v1098_v21, %v1070_v20 }
 0x287   :  { %8305 = vst [vmem:[#allocation97_spill] sm:$0xff] %v5077_v33  ;;  %v1108_v5 = vmul.f32 %v3686_v26, %v5077_v33 }
 0x289   :  { %v5084_v22 = vadd.f32 %v1108_v5, %v4967_v36 }
 0x28a   :  { %1273 = vrot.lane.b32.xlu1 %v5028_v40, %s8306_s8 }
 0x28b   :  { %1275 = vrot.lane.b32.xlu2 %v5041_v61, %s8306_s8  ;;  %1269 = vrot.lane.b32.xlu0 %v5041_v61, %s8303_s11 }
 0x28c   :  { %v5093_v11 = vpop.permute.xlu1 %1067 }
 0x28d   :  { %8307 = vst [vmem:[#allocation98_spill] sm:$0xff] %v5093_v11  ;;  %v5095_v20 = vpop.permute.xlu2 %1137  ;;  %v1066_v53 = vpop.permute.xlu0 %1065 }
 0x28e   :  { %8308 = vst [vmem:[#allocation99_spill] sm:$0xff] %v5095_v20  ;;  %v5099_v36 = vsel %vm187_vm6, %v1096_v2, %v1066_v53 }
 0x28f   :  { %v1106_v23 = vmul.f32 %v3686_v26, %v5099_v36 }
 0x291   :  { %v5103_v10 = vadd.f32 %v1106_v23, %v4938_v30 }
 0x292   :  { %1281 = vrot.lane.b32.xlu1 %v5041_v61, %s8234_s28 }
 0x293   :  { %1285 = vrot.lane.b32.xlu2 %v5028_v40, %s8235_s14  ;;  %1279 = vrot.lane.b32.xlu0 %v5028_v40, %s8234_s28 }
 0x294   :  { %v1116_v0 = vpop.permute.xlu1 %1115 }
 0x295   :  { %v5111_v13 = vpop.permute.xlu2 %1143  ;;  %v5113_v25 = vpop.permute.xlu0 %1113  ;;  %v1210_v55 = vsel %vm157_vm0, %v1116_v0, %v5067_v24 }
 0x296   :  { %8309 = vst [vmem:[#allocation100_spill] sm:$0xff] %v5113_v25 }
 0x29a   :  { %1337 = vrot.lane.b32.xlu1 %v5028_v40, %s8236_s15 }
 0x29b   :  { %1339 = vrot.lane.b32.xlu2 %v5041_v61, %s8236_s15  ;;  %1287 = vrot.lane.b32.xlu0 %v5041_v61, %s8235_s14 }
 0x29c   :  { %v5121_v30 = vpop.permute.xlu1 %1125 }
 0x29d   :  { %8310 = vst [vmem:[#allocation101_spill] sm:$0xff] %v5121_v30  ;;  %v5123_v26 = vpop.permute.xlu2 %1153  ;;  %v1120_v21 = vpop.permute.xlu0 %1119 }
 0x29e   :  { %8311 = vst [vmem:[#allocation102_spill] sm:$0xff] %v5123_v26 }
 0x2a2   :  { %1345 = vrot.lane.b32.xlu1 %v5041_v61, %s8237_s23 }
 0x2a3   :  { %1349 = vrot.lane.b32.xlu2 %v5028_v40, %s8239_s29  ;;  %1343 = vrot.lane.b32.xlu0 %v5028_v40, %s8237_s23 }
 0x2a4   :  { %v1132_v5 = vpop.permute.xlu1 %1131 }
 0x2a5   :  { %v1164_v62 = vpop.permute.xlu2 %1163  ;;  %v5131_v12 = vpop.permute.xlu0 %1129 }
 0x2a6   :  { %8312 = vst [vmem:[#allocation103_spill] sm:$0xff] %v5131_v12 }
 0x2aa   :  { %1355 = vrot.lane.b32.xlu1 %v5028_v40, %s8241_s30 }
 0x2ab   :  { %1357 = vrot.lane.b32.xlu2 %v5041_v61, %s8241_s30  ;;  %1351 = vrot.lane.b32.xlu0 %v5041_v61, %s8239_s29 }
 0x2ac   :  { %v5139_v27 = vpop.permute.xlu1 %1141 }
 0x2ad   :  { %8313 = vst [vmem:[#allocation104_spill] sm:$0xff] %v5139_v27  ;;  %v5141_v2 = vpop.permute.xlu2 %1173  ;;  %v1140_v53 = vpop.permute.xlu0 %1139 }
 0x2ae   :  { %8314 = vst [vmem:[#allocation105_spill] sm:$0xff] %v5141_v2  ;;  %v1214_v20 = vsel %vm162_vm1, %v1210_v55, %v1140_v53 }
 0x2b2   :  { %1363 = vrot.lane.b32.xlu1 %v5041_v61, %s8243_s27 }
 0x2b3   :  { %1367 = vrot.lane.b32.xlu2 %v5028_v40, %s8250_s26  ;;  %1361 = vrot.lane.b32.xlu0 %v5028_v40, %s8243_s27 }
 0x2b4   :  { %v1152_v23 = vpop.permute.xlu1 %1151 }
 0x2b5   :  { %v1180_v29 = vpop.permute.xlu2 %1179  ;;  %v5149_v56 = vpop.permute.xlu0 %1149  ;;  %v1218_v18 = vsel %vm167_vm2, %v1214_v20, %v1152_v23 }
 0x2b6   :  { %8315 = vst [vmem:[#allocation106_spill] sm:$0xff] %v5149_v56  ;;  %v1222_v7 = vsel %vm172_vm3, %v1218_v18, %v1164_v62 }
 0x2ba   :  { %1373 = vrot.lane.b32.xlu1 %v5028_v40, %s8254_s25 }
 0x2bb   :  { %1375 = vrot.lane.b32.xlu2 %v5041_v61, %s8254_s25  ;;  %1369 = vrot.lane.b32.xlu0 %v5041_v61, %s8250_s26 }
 0x2bc   :  { %v5157_v15 = vpop.permute.xlu1 %1161 }
 0x2bd   :  { %8316 = vst [vmem:[#allocation107_spill] sm:$0xff] %v5157_v15  ;;  %v5159_v50 = vpop.permute.xlu2 %1189  ;;  %v1156_v43 = vpop.permute.xlu0 %1155 }
 0x2be   :  { %8317 = vst [vmem:[#allocation108_spill] sm:$0xff] %v5159_v50 }
 0x2c2   :  { %1381 = vrot.lane.b32.xlu1 %v5041_v61, %s8219_s21 }
 0x2c3   :  { %1431 = vrot.lane.b32.xlu2 %v5028_v40, %s8220_s24  ;;  %1379 = vrot.lane.b32.xlu0 %v5028_v40, %s8219_s21 }
 0x2c4   :  { %v1168_v2 = vpop.permute.xlu1 %1167 }
 0x2c5   :  { %v1200_v37 = vpop.permute.xlu2 %1199  ;;  %v5167_v39 = vpop.permute.xlu0 %1165 }
 0x2c6   :  { %8318 = vst [vmem:[#allocation109_spill] sm:$0xff] %v5167_v39 }
 0x2ca   :  { %1437 = vrot.lane.b32.xlu1 %v5028_v40, %s8222_s19 }
 0x2cb   :  { %1439 = vrot.lane.b32.xlu2 %v5041_v61, %s8222_s19  ;;  %1433 = vrot.lane.b32.xlu0 %v5041_v61, %s8220_s24 }
 0x2cc   :  { %v5175_v15 = vpop.permute.xlu1 %1177 }
 0x2cd   :  { %8319 = vst [vmem:[#allocation110_spill] sm:$0xff] %v5175_v15  ;;  %v5177_v19 = vpop.permute.xlu2 %1249  ;;  %v1176_v56 = vpop.permute.xlu0 %1175 }
 0x2ce   :  { %v1226_v24 = vsel %vm177_vm4, %v1222_v7, %v1176_v56  ;;  %v1212_v56 = vsel %vm157_vm0, %v1120_v21, %v1132_v5 }
 0x2d2   :  { %1445 = vrot.lane.b32.xlu1 %v5041_v61, %s8224_s22 }
 0x2d3   :  { %1449 = vrot.lane.b32.xlu2 %v5028_v40, %s8225_s10  ;;  %1443 = vrot.lane.b32.xlu0 %v5028_v40, %s8224_s22 }
 0x2d4   :  { %v1188_v55 = vpop.permute.xlu1 %1187 }
 0x2d5   :  { %v5194_v0 = vpop.permute.xlu2 %1257  ;;  %v1230_v20 = vsel %vm182_vm5, %v1226_v24, %v1188_v55  ;;  %v5197_v53 = vpop.permute.xlu0 %1185 }
 0x2d6   :  { %8320 = vst [vmem:[#allocation111_spill] sm:$0xff] %v5197_v53  ;;  %v5200_v23 = vsel %vm187_vm6, %v1230_v20, %v1200_v37 }
 0x2d7   :  { %v1240_v18 = vmul.f32 %v3689_v1, %v5200_v23 }
 0x2d9   :  { %v5204_v62 = vadd.f32 %v1240_v18, %v5103_v10  ;;  %v1216_v10 = vsel %vm162_vm1, %v1212_v56, %v5111_v13 }
 0x2da   :  { %1455 = vrot.lane.b32.xlu1 %v5028_v40, %s8227_s16  ;;  %v1220_v55 = vsel %vm167_vm2, %v1216_v10, %v1156_v43 }
 0x2db   :  { %1457 = vrot.lane.b32.xlu2 %v5041_v61, %s8227_s16  ;;  %1451 = vrot.lane.b32.xlu0 %v5041_v61, %s8225_s10  ;;  %v1224_v20 = vsel %vm172_vm3, %v1220_v55, %v1168_v2  ;;  %v5265_v55 = vld [vmem:[%s8036_s0 + $0x30] sm:$0xff] }
 0x2dc   :  { %v5213_v7 = vpop.permute.xlu1 %1197  ;;  %v1228_v21 = vsel %vm177_vm4, %v1224_v20, %v1180_v29 }
 0x2dd   :  { %8321 = vst [vmem:[#allocation112_spill] sm:$0xff] %v5213_v7  ;;  %v5215_v37 = vpop.permute.xlu2 %1267  ;;  %v1192_v24 = vpop.permute.xlu0 %1191 }
 0x2de   :  { %v1232_v5 = vsel %vm182_vm5, %v1228_v21, %v1192_v24 }
 0x2e2   :  { %1463 = vrot.lane.b32.xlu1 %v5041_v61, %s8229_s17 }
 0x2e3   :  { %1467 = vrot.lane.b32.xlu2 %v5028_v40, %s8230_s18  ;;  %1461 = vrot.lane.b32.xlu0 %v5028_v40, %s8229_s17 }
 0x2e4   :  { %v1204_v18 = vpop.permute.xlu1 %1203 }
 0x2e5   :  { %v5229_v7 = vpop.permute.xlu2 %1275  ;;  %v5232_v43 = vsel %vm187_vm6, %v1232_v5, %v1204_v18  ;;  %v5234_v13 = vpop.permute.xlu0 %1201  ;;  %v5282_v18 = vld [vmem:[%s8036_s0 + $0x98] sm:$0xff] }
 0x2e6   :  { %8322 = vst [vmem:[#allocation113_spill] sm:$0xff] %v5232_v43  ;;  %v1242_v2 = vmul.f32 %v3689_v1, %v5232_v43  ;;  %v5255_v1 = vld [vmem:[%s8036_s0 + $0x38] sm:$0xff] }
 0x2e7   :  { %8323 = vst [vmem:[#allocation114_spill] sm:$0xff] %v5234_v13 }
 0x2e8   :  { %v5238_v56 = vadd.f32 %v1242_v2, %v5084_v22  ;;  %v5260_v22 = vld [vmem:[%s8036_s0 + $0x90] sm:$0xff] }
 0x2ea   :  { %8324 = vst [vmem:[#allocation115_spill] sm:$0xff] %v5238_v56  ;;  %1473 = vrot.lane.b32.xlu1 %v5028_v40, %s8294_s4 }
 0x2eb   :  { %1475 = vrot.lane.b32.xlu2 %v5041_v61, %s8294_s4  ;;  %1469 = vrot.lane.b32.xlu0 %v5041_v61, %s8230_s18 }
 0x2ec   :  { %v5246_v29 = vpop.permute.xlu1 %1255 }
 0x2ed   :  { %v5248_v24 = vpop.permute.xlu2 %1285  ;;  %v5250_v10 = vpop.permute.xlu0 %1251 }
 0x2f2   :  { %1634 = vrot.lane.b32.xlu1 %v5255_v1, %s8297_s12 }
 0x2f3   :  { %1636 = vrot.lane.b32.xlu2 %v5260_v22, %s8297_s12  ;;  %1632 = vrot.lane.b32.xlu0 %v5265_v55, %s8297_s12 }
 0x2f4   :  { %v5273_v20 = vpop.permute.xlu1 %1263 }
 0x2f5   :  { %v5275_v21 = vpop.permute.xlu2 %1339  ;;  %v5277_v5 = vpop.permute.xlu0 %1261 }
 0x2fa   :  { %1644 = vrot.lane.b32.xlu1 %v5265_v55, %s8299_s13 }
 0x2fb   :  { %1646 = vrot.lane.b32.xlu2 %v5255_v1, %s8299_s13  ;;  %1638 = vrot.lane.b32.xlu0 %v5282_v18, %s8297_s12 }
 0x2fc   :  { %v5290_v2 = vpop.permute.xlu1 %1273 }
 0x2fd   :  { %v5292_v53 = vpop.permute.xlu2 %1349  ;;  %v5294_v25 = vpop.permute.xlu0 %1269 }
 0x302   :  { %1650 = vrot.lane.b32.xlu1 %v5282_v18, %s8299_s13 }
 0x303   :  { %1656 = vrot.lane.b32.xlu2 %v5265_v55, %s8302_s9  ;;  %1648 = vrot.lane.b32.xlu0 %v5260_v22, %s8299_s13 }
 0x304   :  { %v5302_v30 = vpop.permute.xlu1 %1281 }
 0x305   :  { %v5304_v54 = vpop.permute.xlu2 %1357  ;;  %v5306_v9 = vpop.permute.xlu0 %1279 }
 0x30a   :  { %1660 = vrot.lane.b32.xlu1 %v5260_v22, %s8302_s9 }
 0x30b   :  { %1662 = vrot.lane.b32.xlu2 %v5282_v18, %s8302_s9  ;;  %1658 = vrot.lane.b32.xlu0 %v5255_v1, %s8302_s9 }
 0x30c   :  { %v5314_v38 = vpop.permute.xlu1 %1337 }
 0x30d   :  { %v5316_v28 = vpop.permute.xlu2 %1367  ;;  %v5318_v59 = vpop.permute.xlu0 %1287 }
 0x312   :  { %1670 = vrot.lane.b32.xlu1 %v5255_v1, %s8303_s11 }
 0x313   :  { %1672 = vrot.lane.b32.xlu2 %v5260_v22, %s8303_s11  ;;  %1668 = vrot.lane.b32.xlu0 %v5265_v55, %s8303_s11 }
 0x314   :  { %v5326_v60 = vpop.permute.xlu1 %1345 }
 0x315   :  { %v5328_v16 = vpop.permute.xlu2 %1375  ;;  %v5330_v34 = vpop.permute.xlu0 %1343 }
 0x316   :  { %v1385_v33 = vsel %vm157_vm0, %v5314_v38, %v5330_v34 }
 0x31a   :  { %1680 = vrot.lane.b32.xlu1 %v5265_v55, %s8306_s8 }
 0x31b   :  { %1682 = vrot.lane.b32.xlu2 %v5255_v1, %s8306_s8  ;;  %1674 = vrot.lane.b32.xlu0 %v5282_v18, %s8303_s11 }
 0x31c   :  { %v5338_v58 = vpop.permute.xlu1 %1355 }
 0x31d   :  { %v5340_v13 = vpop.permute.xlu2 %1431  ;;  %v5342_v51 = vpop.permute.xlu0 %1351 }
 0x322   :  { %1686 = vrot.lane.b32.xlu1 %v5282_v18, %s8306_s8 }
 0x323   :  { %1692 = vrot.lane.b32.xlu2 %v5265_v55, %s8234_s28  ;;  %1684 = vrot.lane.b32.xlu0 %v5260_v22, %s8306_s8 }
 0x324   :  { %v5350_v50 = vpop.permute.xlu1 %1363 }
 0x325   :  { %v5352_v35 = vpop.permute.xlu2 %1439  ;;  %v5354_v11 = vpop.permute.xlu0 %1361 }
 0x32a   :  { %1696 = vrot.lane.b32.xlu1 %v5260_v22, %s8234_s28 }
 0x32b   :  { %1698 = vrot.lane.b32.xlu2 %v5282_v18, %s8234_s28  ;;  %1694 = vrot.lane.b32.xlu0 %v5255_v1, %s8234_s28 }
 0x32c   :  { %v5362_v32 = vpop.permute.xlu1 %1373 }
 0x32d   :  { %v5364_v15 = vpop.permute.xlu2 %1449  ;;  %v5366_v47 = vpop.permute.xlu0 %1369 }
 0x332   :  { %1706 = vrot.lane.b32.xlu1 %v5255_v1, %s8235_s14 }
 0x333   :  { %1708 = vrot.lane.b32.xlu2 %v5260_v22, %s8235_s14  ;;  %1704 = vrot.lane.b32.xlu0 %v5265_v55, %s8235_s14 }
 0x334   :  { %v5374_v31 = vpop.permute.xlu1 %1381 }
 0x335   :  { %v5376_v39 = vpop.permute.xlu2 %1457  ;;  %v5378_v26 = vpop.permute.xlu0 %1379 }
 0x33a   :  { %1754 = vrot.lane.b32.xlu1 %v5265_v55, %s8236_s15 }
 0x33b   :  { %1756 = vrot.lane.b32.xlu2 %v5255_v1, %s8236_s15  ;;  %1710 = vrot.lane.b32.xlu0 %v5282_v18, %s8235_s14 }
 0x33c   :  { %v1438_v48 = vpop.permute.xlu1 %1437 }
 0x33d   :  { %v5386_v45 = vpop.permute.xlu2 %1467  ;;  %v5388_v3 = vpop.permute.xlu0 %1433 }
 0x342   :  { %1760 = vrot.lane.b32.xlu1 %v5282_v18, %s8236_s15 }
 0x343   :  { %1766 = vrot.lane.b32.xlu2 %v5265_v55, %s8237_s23  ;;  %1758 = vrot.lane.b32.xlu0 %v5260_v22, %s8236_s15 }
 0x344   :  { %v5396_v42 = vpop.permute.xlu1 %1445 }
 0x345   :  { %v5398_v41 = vpop.permute.xlu2 %1475  ;;  %v1444_v46 = vpop.permute.xlu0 %1443 }
 0x34a   :  { %1770 = vrot.lane.b32.xlu1 %v5260_v22, %s8237_s23 }
 0x34b   :  { %1772 = vrot.lane.b32.xlu2 %v5282_v18, %s8237_s23  ;;  %1768 = vrot.lane.b32.xlu0 %v5255_v1, %s8237_s23 }
 0x34c   :  { %v1456_v57 = vpop.permute.xlu1 %1455 }
 0x34d   :  { %v5406_v27 = vpop.permute.xlu2 %1636  ;;  %v5408_v63 = vpop.permute.xlu0 %1451 }
 0x34e   :  { %8325 = vst [vmem:[#allocation116_spill] sm:$0xff] %v5406_v27 }
 0x352   :  { %1780 = vrot.lane.b32.xlu1 %v5255_v1, %s8239_s29 }
 0x353   :  { %1782 = vrot.lane.b32.xlu2 %v5260_v22, %s8239_s29  ;;  %1778 = vrot.lane.b32.xlu0 %v5265_v55, %s8239_s29 }
 0x354   :  { %v5416_v52 = vpop.permute.xlu1 %1463 }
 0x355   :  { %v5418_v12 = vpop.permute.xlu2 %1646  ;;  %v1462_v8 = vpop.permute.xlu0 %1461 }
 0x356   :  { %8326 = vst [vmem:[#allocation117_spill] sm:$0xff] %v5418_v12 }
 0x35a   :  { %1790 = vrot.lane.b32.xlu1 %v5265_v55, %s8241_s30 }
 0x35b   :  { %1792 = vrot.lane.b32.xlu2 %v5255_v1, %s8241_s30  ;;  %1784 = vrot.lane.b32.xlu0 %v5282_v18, %s8239_s29 }
 0x35c   :  { %v5426_v27 = vpop.permute.xlu1 %1473 }
 0x35d   :  { %v5428_v17 = vpop.permute.xlu2 %1656  ;;  %v5430_v4 = vpop.permute.xlu0 %1469 }
 0x35e   :  { %8327 = vst [vmem:[#allocation118_spill] sm:$0xff] %v5428_v17 }
 0x362   :  { %1796 = vrot.lane.b32.xlu1 %v5282_v18, %s8241_s30 }
 0x363   :  { %1802 = vrot.lane.b32.xlu2 %v5265_v55, %s8243_s27  ;;  %1794 = vrot.lane.b32.xlu0 %v5260_v22, %s8241_s30 }
 0x364   :  { %v5438_v6 = vpop.permute.xlu1 %1634 }
 0x365   :  { %8328 = vst [vmem:[#allocation119_spill] sm:$0xff] %v5438_v6  ;;  %v5440_v14 = vpop.permute.xlu2 %1662  ;;  %v5442_v56 = vpop.permute.xlu0 %1632 }
 0x366   :  { %8329 = vst [vmem:[#allocation120_spill] sm:$0xff] %v5440_v14 }
 0x367   :  { %8330 = vst [vmem:[#allocation121_spill] sm:$0xff] %v5442_v56 }
 0x36a   :  { %1806 = vrot.lane.b32.xlu1 %v5260_v22, %s8243_s27 }
 0x36b   :  { %1808 = vrot.lane.b32.xlu2 %v5282_v18, %s8243_s27  ;;  %1804 = vrot.lane.b32.xlu0 %v5255_v1, %s8243_s27 }
 0x36c   :  { %v5450_v17 = vpop.permute.xlu1 %1644 }
 0x36d   :  { %8331 = vst [vmem:[#allocation122_spill] sm:$0xff] %v5450_v17  ;;  %v5452_v12 = vpop.permute.xlu2 %1672  ;;  %v5454_v43 = vpop.permute.xlu0 %1638 }
 0x36e   :  { %8332 = vst [vmem:[#allocation123_spill] sm:$0xff] %v5452_v12 }
 0x36f   :  { %8333 = vst [vmem:[#allocation124_spill] sm:$0xff] %v5454_v43 }
 0x372   :  { %1816 = vrot.lane.b32.xlu1 %v5255_v1, %s8250_s26 }
 0x373   :  { %1818 = vrot.lane.b32.xlu2 %v5260_v22, %s8250_s26  ;;  %1814 = vrot.lane.b32.xlu0 %v5265_v55, %s8250_s26 }
 0x374   :  { %v5462_v56 = vpop.permute.xlu1 %1650 }
 0x375   :  { %8334 = vst [vmem:[#allocation125_spill] sm:$0xff] %v5462_v56  ;;  %v5464_v14 = vpop.permute.xlu2 %1682  ;;  %v5466_v6 = vpop.permute.xlu0 %1648  ;;  %v1291_v56 = vsel %vm157_vm0, %v5028_v40, %v5177_v19  ;;  %v1387_v19 = vsel %vm162_vm1, %v1385_v33, %v5292_v53  ;;  %v1292_v53 = vsel %vm157_vm0, %v5041_v61, %v5250_v10 }
 0x376   :  { %8335 = vst [vmem:[#allocation126_spill] sm:$0xff] %v5464_v14  ;;  %v1389_v34 = vsel %vm167_vm2, %v1387_v19, %v5338_v58 }
 0x377   :  { %8336 = vst [vmem:[#allocation127_spill] sm:$0xff] %v5466_v6  ;;  %v1293_v6 = vsel %vm162_vm1, %v1291_v56, %v5246_v29  ;;  %v1391_v33 = vsel %vm172_vm3, %v1389_v34, %v5354_v11  ;;  %v3684_v11 = vld [vmem:[%s8038_s2 + $0xc] ss:$0 sm:$0xff] }
 0x378   :  { %v1295_v14 = vsel %vm167_vm2, %v1293_v6, %v5277_v5 }
 0x379   :  { %v1297_v40 = vsel %vm172_vm3, %v1295_v14, %v5215_v37 }
 0x37a   :  { %1826 = vrot.lane.b32.xlu1 %v5265_v55, %s8254_s25 }
 0x37b   :  { %1828 = vrot.lane.b32.xlu2 %v5255_v1, %s8254_s25  ;;  %1820 = vrot.lane.b32.xlu0 %v5282_v18, %s8250_s26 }
 0x37c   :  { %v5474_v17 = vpop.permute.xlu1 %1660 }
 0x37d   :  { %8337 = vst [vmem:[#allocation128_spill] sm:$0xff] %v5474_v17  ;;  %v5476_v12 = vpop.permute.xlu2 %1692  ;;  %v5478_v43 = vpop.permute.xlu0 %1658  ;;  %v1479_v17 = vsel %vm157_vm0, %v5340_v13, %v1438_v48  ;;  %v1299_v48 = vsel %vm177_vm4, %v1297_v40, %v5290_v2 }
 0x37e   :  { %8338 = vst [vmem:[#allocation129_spill] sm:$0xff] %v5476_v12  ;;  %v1481_v6 = vsel %vm162_vm1, %v1479_v17, %v1444_v46  ;;  %v1301_v14 = vsel %vm182_vm5, %v1299_v48, %v5306_v9  ;;  %v1393_v9 = vsel %vm177_vm4, %v1391_v33, %v5316_v28 }
 0x37f   :  { %v1483_v17 = vsel %vm167_vm2, %v1481_v6, %v5364_v15  ;;  %v1303_v37 = vsel %vm187_vm6, %v1301_v14, %v5248_v24  ;;  %v1386_v15 = vsel %vm157_vm0, %v5275_v21, %v5326_v60  ;;  %v1395_v61 = vsel %vm182_vm5, %v1393_v9, %v5362_v32  ;;  %v3687_v60 = vld [vmem:[%s8038_s2 + $0xd] ss:$0 sm:$0xff] }
 0x380   :  { %v1485_v58 = vsel %vm172_vm3, %v1483_v17, %v1456_v57  ;;  %v1294_v57 = vsel %vm162_vm1, %v1292_v53, %v5194_v0  ;;  %v1388_v29 = vsel %vm162_vm1, %v1386_v15, %v5342_v51  ;;  %v1397_v28 = vsel %vm187_vm6, %v1395_v61, %v5378_v26 }
 0x381   :  { %v1487_v56 = vsel %vm177_vm4, %v1485_v58, %v1462_v8  ;;  %v1296_v8 = vsel %vm167_vm2, %v1294_v57, %v5273_v20  ;;  %v1309_v32 = vmul.f32 %v3684_v11, %v1303_v37  ;;  %v1480_v51 = vsel %vm157_vm0, %v5388_v3, %v5352_v35 }
 0x382   :  { %1832 = vrot.lane.b32.xlu1 %v5282_v18, %s8254_s25  ;;  %v1489_v26 = vsel %vm182_vm5, %v1487_v56, %v5386_v45  ;;  %v5559_v0 = vmul.f32 %v3684_v11, %v4926_v49  ;;  %v1298_v24 = vsel %vm172_vm3, %v1296_v8, %v5294_v25  ;;  %v1482_v10 = vsel %vm162_vm1, %v1480_v51, %v5396_v42  ;;  %v3690_v45 = vld [vmem:[%s8038_s2 + $0xe] ss:$0 sm:$0xff]  ;;  %v8347_v51 = vld [vmem:[#allocation97_spill] sm:$0xff] }
 0x383   :  { %1838 = vrot.lane.b32.xlu2 %v5265_v55, %s8219_s21  ;;  %1830 = vrot.lane.b32.xlu0 %v5260_v22, %s8254_s25  ;;  %v5567_v20 = vsel %vm187_vm6, %v1489_v26, %v5426_v27  ;;  %v1390_v21 = vsel %vm167_vm2, %v1388_v29, %v5304_v54  ;;  %v1403_v5 = vmul.f32 %v3687_v60, %v1397_v28  ;;  %v1322_v19 = vrot.slane %v1309_v32, 1 }
 0x384   :  { %v5507_v38 = vpop.permute.xlu1 %1670  ;;  %8340 = vst [vmem:[#allocation131_spill] sm:$0xff] %v5559_v0  ;;  %v1484_v25 = vsel %vm167_vm2, %v1482_v10, %v5408_v63  ;;  %v5583_v27 = vmul.f32 %v3687_v60, %v5099_v36  ;;  %v1392_v2 = vsel %vm172_vm3, %v1390_v21, %v5350_v50  ;;  %v1300_v40 = vsel %vm177_vm4, %v1298_v24, %v5229_v7 }
 0x385   :  { %v5509_v13 = vpop.permute.xlu2 %1698  ;;  %v5515_v46 = vpop.permute.xlu0 %1668  ;;  %v1394_v6 = vsel %vm177_vm4, %v1392_v2, %v5366_v47  ;;  %v1497_v54 = vmul.f32 %v3690_v45, %v5567_v20  ;;  %v8135_v48 = vrot.slane %v5559_v0, 1  ;;  %v1302_v63 = vsel %vm182_vm5, %v1300_v40, %v5302_v30 }
 0x386   :  { %8339 = vst [vmem:[#allocation130_spill] sm:$0xff] %v5515_v46  ;;  %v1486_v34 = vsel %vm172_vm3, %v1484_v25, %v5376_v39  ;;  %v5598_v14 = vmul.f32 %v3690_v45, %v5200_v23  ;;  %v1304_v50 = vsel %vm187_vm6, %v1302_v63, %v5318_v59  ;;  %v1416_v7 = vrot.slane %v1403_v5, 1  ;;  %v3685_v39 = vld [vmem:[%s8038_s2 + $0xf] ss:$0 sm:$0xff]  ;;  %v8349_v5 = vld [vmem:[#allocation113_spill] sm:$0xff] }
 0x387   :  { %8343 = vst [vmem:[#allocation134_spill] sm:$0xff] %v5583_v27  ;;  %v1488_v47 = vsel %vm177_vm4, %v1486_v34, %v5416_v52  ;;  %v1396_v33 = vsel %vm182_vm5, %v1394_v6, %v5328_v16  ;;  %v8134_v59 = vrot.slane %v5583_v27, 1  ;;  %v1323_v52 = vsel %vm542_vm7, %v8135_v48, %v1322_v19  ;;  %v8352_v6 = vld [vmem:[#allocation119_spill] sm:$0xff] }
 0x388   :  { %8344 = vst [vmem:[#allocation135_spill] sm:$0xff] %v5598_v14  ;;  %v1490_v17 = vsel %vm182_vm5, %v1488_v47, %v5430_v4  ;;  %v1398_v16 = vsel %vm187_vm6, %v1396_v33, %v5374_v31  ;;  %v1510_v4 = vrot.slane %v1497_v54, 1  ;;  %v1312_v30 = vmul.f32 %v3684_v11, %v1304_v50 }
 0x389   :  { %v8132_v9 = vrot.slane %v5598_v14, 1  ;;  %v1529_v56 = vmul.f32 %v3685_v39, %v1303_v37  ;;  %v1417_v15 = vsel %vm542_vm7, %v8134_v59, %v1416_v7  ;;  %v5633_v61 = vsel %vm187_vm6, %v1490_v17, %v5398_v41  ;;  %v3688_v37 = vld [vmem:[%s8038_s2 + $0x10] ss:$0 sm:$0xff] }
 0x38a   :  { %1842 = vrot.lane.b32.xlu1 %v5260_v22, %s8219_s21  ;;  %v5638_v57 = vmul.f32 %v3684_v11, %v4964_v44  ;;  %v1406_v29 = vmul.f32 %v3687_v60, %v1398_v16  ;;  %v1334_v8 = vadd.f32 %v1323_v52, %v5204_v62  ;;  %v5642_v32 = vmul.f32 %v3685_v39, %v4926_v49 }
 0x38b   :  { %1844 = vrot.lane.b32.xlu2 %v5282_v18, %s8219_s21  ;;  %1840 = vrot.lane.b32.xlu0 %v5255_v1, %s8219_s21  ;;  %v1511_v41 = vsel %vm542_vm7, %v8132_v9, %v1510_v4  ;;  %v5651_v26 = vmul.f32 %v3687_v60, %v8347_v51  ;;  %v1327_v24 = vrot.slane %v1312_v30, 1  ;;  %v1500_v10 = vmul.f32 %v3690_v45, %v5633_v61 }
 0x38c   :  { %v5569_v35 = vpop.permute.xlu1 %1680  ;;  %8346 = vst [vmem:[#allocation137_spill] sm:$0xff] %v5642_v32  ;;  %v1428_v11 = vadd.f32 %v1417_v15, %v1334_v8  ;;  %v1542_v21 = vrot.slane %v1529_v56, 2  ;;  %v1561_v62 = vmul.f32 %v3688_v37, %v1397_v28  ;;  %v8141_v49 = vrot.slane %v5638_v57, 1  ;;  %v3691_v28 = vld [vmem:[%s8038_s2 + $0x11] ss:$0 sm:$0xff] }
 0x38d   :  { %8341 = vst [vmem:[#allocation132_spill] sm:$0xff] %v5569_v35  ;;  %v5571_v3 = vpop.permute.xlu2 %1708  ;;  %v5580_v42 = vpop.permute.xlu0 %1674  ;;  %v5656_v25 = vmul.f32 %v3690_v45, %v8349_v5  ;;  %v1421_v2 = vrot.slane %v1406_v29, 1  ;;  %v8133_v60 = vrot.slane %v5642_v32, 2  ;;  %v5664_v19 = vmul.f32 %v3688_v37, %v5099_v36  ;;  %v8356_v29 = vld [vmem:[#allocation117_spill] sm:$0xff] }
 0x38e   :  { %8342 = vst [vmem:[#allocation133_spill] sm:$0xff] %v5571_v3  ;;  %v1522_v40 = vadd.f32 %v1511_v41, %v1428_v11  ;;  %v1717_v45 = vsel %vm157_vm0, %v5255_v1, %v8352_v6  ;;  %v5675_v54 = vmul.f32 %v3685_v39, %v4964_v44  ;;  %v8140_v63 = vrot.slane %v5651_v26, 1  ;;  %v6027_v35 = vld [vmem:[%s8036_s0 + $0x48] sm:$0xff] }
 0x38f   :  { %8348 = vst [vmem:[#allocation97_spill] sm:$0xff] %v5651_v26  ;;  %v1328_v36 = vsel %vm542_vm7, %v8141_v49, %v1327_v24  ;;  %v1515_v34 = vrot.slane %v1500_v10, 1  ;;  %v1543_v33 = vsel %vm763_vm8, %v8133_v60, %v1542_v21  ;;  %v1532_v17 = vmul.f32 %v3685_v39, %v1304_v50  ;;  %v8358_v50 = vld [vmem:[#allocation115_spill] sm:$0xff] }
 0x390   :  { %8350 = vst [vmem:[#allocation113_spill] sm:$0xff] %v5656_v25  ;;  %v1574_v52 = vrot.slane %v1561_v62, 2  ;;  %v1593_v44 = vmul.f32 %v3691_v28, %v5567_v20  ;;  %v8139_v30 = vrot.slane %v5656_v25, 1  ;;  %v1422_v56 = vsel %vm542_vm7, %v8140_v63, %v1421_v2 }
 0x391   :  { %8351 = vst [vmem:[#allocation138_spill] sm:$0xff] %v5664_v19  ;;  %v1554_v15 = vadd.f32 %v1543_v33, %v1522_v40  ;;  %v1721_v8 = vsel %vm162_vm1, %v1717_v45, %v8356_v29  ;;  %v8131_v41 = vrot.slane %v5664_v19, 2  ;;  %v5697_v24 = vmul.f32 %v3691_v28, %v5200_v23  ;;  %v8361_v33 = vld [vmem:[#allocation124_spill] sm:$0xff] }
 0x392   :  { %1890 = vrot.lane.b32.xlu1 %v5255_v1, %s8220_s24  ;;  %8353 = vst [vmem:[#allocation119_spill] sm:$0xff] %v5675_v54  ;;  %v1336_v39 = vadd.f32 %v1328_v36, %v8358_v50  ;;  %v1725_v20 = vsel %vm167_vm2, %v1721_v8, %v5478_v43  ;;  %v1516_v11 = vsel %vm542_vm7, %v8139_v30, %v1515_v34  ;;  %v1547_v21 = vrot.slane %v1532_v17, 2  ;;  %v8359_v36 = vld [vmem:[#allocation126_spill] sm:$0xff] }
 0x393   :  { %1892 = vrot.lane.b32.xlu2 %v5260_v22, %s8220_s24  ;;  %1888 = vrot.lane.b32.xlu0 %v5265_v55, %s8220_s24  ;;  %8357 = vst [vmem:[#allocation117_spill] sm:$0xff] %v5697_v24  ;;  %v1729_v10 = vsel %vm172_vm3, %v1725_v20, %v5507_v38  ;;  %v1575_v2 = vsel %vm763_vm8, %v8131_v41, %v1574_v52  ;;  %v1606_v23 = vrot.slane %v1593_v44, 2  ;;  %v8138_v6 = vrot.slane %v5675_v54, 2  ;;  %v3692_v52 = vld [vmem:[%s8038_s2 + $0x12] ss:$0 sm:$0xff] }
 0x394   :  { %v5623_v53 = vpop.permute.xlu1 %1686  ;;  %v1430_v62 = vadd.f32 %v1422_v56, %v1336_v39  ;;  %v1564_v40 = vmul.f32 %v3688_v37, %v1398_v16  ;;  %v1586_v43 = vadd.f32 %v1575_v2, %v1554_v15  ;;  %v8130_v45 = vrot.slane %v5697_v24, 2 }
 0x395   :  { %v5625_v58 = vpop.permute.xlu2 %1756  ;;  %v5635_v31 = vpop.permute.xlu0 %1684  ;;  %v1733_v34 = vsel %vm177_vm4, %v1729_v10, %v8359_v36  ;;  %v5721_v16 = vmul.f32 %v3688_v37, %v8347_v51  ;;  %v1719_v17 = vsel %vm157_vm0, %v5282_v18, %v8361_v33  ;;  %v1548_v29 = vsel %vm763_vm8, %v8138_v6, %v1547_v21  ;;  %v8362_v51 = vld [vmem:[#allocation125_spill] sm:$0xff] }
 0x396   :  { %8345 = vst [vmem:[#allocation136_spill] sm:$0xff] %v5635_v31  ;;  %v1524_v38 = vadd.f32 %v1516_v11, %v1430_v62  ;;  %v1607_v37 = vsel %vm763_vm8, %v8130_v45, %v1606_v23  ;;  %v1723_v8 = vsel %vm162_vm1, %v1719_v17, %v8362_v51  ;;  %v1596_v20 = vmul.f32 %v3691_v28, %v5633_v61  ;;  %v8365_v23 = vld [vmem:[#allocation120_spill] sm:$0xff] }
 0x397   :  { %8360 = vst [vmem:[#allocation115_spill] sm:$0xff] %v5721_v16  ;;  %v1618_v11 = vadd.f32 %v1607_v37, %v1586_v43  ;;  %v8137_v21 = vrot.slane %v5721_v16, 2  ;;  %v5749_v2 = vmul.f32 %v3691_v28, %v8349_v5  ;;  %v1727_v36 = vsel %vm167_vm2, %v1723_v8, %v8365_v23 }
 0x398   :  { %v1556_v62 = vadd.f32 %v1548_v29, %v1524_v38  ;;  %v1731_v33 = vsel %vm172_vm3, %v1727_v36, %v5580_v42 }
 0x399   :  { %8364 = vst [vmem:[#allocation124_spill] sm:$0xff] %v5749_v2  ;;  %v1735_v43 = vsel %vm177_vm4, %v1731_v33, %v5623_v53  ;;  %v8136_v42 = vrot.slane %v5749_v2, 2 }
 0x39a   :  { %1900 = vrot.lane.b32.xlu1 %v5265_v55, %s8222_s19  ;;  %v1739_v17 = vsel %vm182_vm5, %v1735_v43, %v5509_v13 }
 0x39b   :  { %1902 = vrot.lane.b32.xlu2 %v5255_v1, %s8222_s19  ;;  %1894 = vrot.lane.b32.xlu0 %v5282_v18, %s8220_s24 }
 0x39c   :  { %v5681_v7 = vpop.permute.xlu1 %1696 }
 0x39d   :  { %8354 = vst [vmem:[#allocation139_spill] sm:$0xff] %v5681_v7  ;;  %v5683_v47 = vpop.permute.xlu2 %1766  ;;  %v1695_v4 = vpop.permute.xlu0 %1694 }
 0x39e   :  { %8355 = vst [vmem:[#allocation140_spill] sm:$0xff] %v5683_v47  ;;  %v1737_v44 = vsel %vm182_vm5, %v1733_v34, %v1695_v4  ;;  %v1579_v4 = vrot.slane %v1564_v40, 2  ;;  %v1611_v40 = vrot.slane %v1596_v20, 2 }
 0x3a0   :  { %v1580_v61 = vsel %vm763_vm8, %v8137_v21, %v1579_v4 }
 0x3a1   :  { %v1588_v5 = vadd.f32 %v1580_v61, %v1556_v62 }
 0x3a2   :  { %1906 = vrot.lane.b32.xlu1 %v5282_v18, %s8222_s19 }
 0x3a3   :  { %1912 = vrot.lane.b32.xlu2 %v5265_v55, %s8224_s22  ;;  %1904 = vrot.lane.b32.xlu0 %v5260_v22, %s8222_s19 }
 0x3a4   :  { %v1707_v56 = vpop.permute.xlu1 %1706 }
 0x3a5   :  { %v5730_v15 = vpop.permute.xlu2 %1772  ;;  %v5741_v50 = vsel %vm187_vm6, %v1737_v44, %v1707_v56  ;;  %v5743_v39 = vpop.permute.xlu0 %1704  ;;  %v1612_v44 = vsel %vm763_vm8, %v8136_v42, %v1611_v40  ;;  %v5825_v40 = vld [vmem:[%s8036_s0 + $0x40] sm:$0x3] }
 0x3a6   :  { %8363 = vst [vmem:[#allocation126_spill] sm:$0xff] %v5743_v39  ;;  %v1747_v10 = vmul.f32 %v3692_v52, %v5741_v50  ;;  %v1620_v29 = vadd.f32 %v1612_v44, %v1588_v5 }
 0x3a8   :  { %v5753_v34 = vadd.f32 %v1747_v10, %v1618_v11 }
 0x3aa   :  { %1916 = vrot.lane.b32.xlu1 %v5260_v22, %s8224_s22 }
 0x3ab   :  { %1918 = vrot.lane.b32.xlu2 %v5282_v18, %s8224_s22  ;;  %1914 = vrot.lane.b32.xlu0 %v5255_v1, %s8224_s22 }
 0x3ac   :  { %v5769_v28 = vpop.permute.xlu1 %1754 }
 0x3ad   :  { %8366 = vst [vmem:[#allocation125_spill] sm:$0xff] %v5769_v28  ;;  %v5771_v38 = vpop.permute.xlu2 %1782  ;;  %v1711_v53 = vpop.permute.xlu0 %1710 }
 0x3ae   :  { %8367 = vst [vmem:[#allocation120_spill] sm:$0xff] %v5771_v38  ;;  %v5779_v56 = vsel %vm187_vm6, %v1739_v17, %v1711_v53  ;;  %v5838_v53 = vld [vmem:[%s8036_s0 + $0xa0] sm:$0x3] }
 0x3af   :  { %v1749_v37 = vmul.f32 %v3692_v52, %v5779_v56 }
 0x3b1   :  { %v5782_v51 = vadd.f32 %v1749_v37, %v1620_v29 }
 0x3b2   :  { %1926 = vrot.lane.b32.xlu1 %v5255_v1, %s8225_s10 }
 0x3b3   :  { %1928 = vrot.lane.b32.xlu2 %v5260_v22, %s8225_s10  ;;  %1924 = vrot.lane.b32.xlu0 %v5265_v55, %s8225_s10 }
 0x3b4   :  { %v1761_v13 = vpop.permute.xlu1 %1760 }
 0x3b5   :  { %v5790_v8 = vpop.permute.xlu2 %1792  ;;  %v5792_v4 = vpop.permute.xlu0 %1758  ;;  %v1853_v59 = vsel %vm157_vm0, %v1761_v13, %v5730_v15 }
 0x3b6   :  { %8368 = vst [vmem:[#allocation141_spill] sm:$0xff] %v5792_v4 }
 0x3ba   :  { %1940 = vrot.lane.b32.xlu1 %v5260_v22, %s8227_s16 }
 0x3bb   :  { %1948 = vrot.lane.b32.xlu2 %v5265_v55, %s8229_s17  ;;  %1936 = vrot.lane.b32.xlu0 %v5265_v55, %s8227_s16 }
 0x3bc   :  { %v5800_v52 = vpop.permute.xlu1 %1770 }
 0x3bd   :  { %8369 = vst [vmem:[#allocation142_spill] sm:$0xff] %v5800_v52  ;;  %v5802_v20 = vpop.permute.xlu2 %1802  ;;  %v1769_v11 = vpop.permute.xlu0 %1768 }
 0x3be   :  { %8370 = vst [vmem:[#allocation143_spill] sm:$0xff] %v5802_v20  ;;  %v1851_v6 = vsel %vm157_vm0, %v5625_v58, %v1769_v11 }
 0x3c2   :  { %1930 = vrot.lane.b32.xlu1 %v5282_v18, %s8225_s10 }
 0x3c3   :  { %1960 = vrot.lane.b32.xlu2 %v5265_v55, %s8230_s18  ;;  %1952 = vrot.lane.b32.xlu0 %v5260_v22, %s8229_s17 }
 0x3c4   :  { %v1781_v10 = vpop.permute.xlu1 %1780 }
 0x3c5   :  { %v1809_v62 = vpop.permute.xlu2 %1808  ;;  %v5810_v23 = vpop.permute.xlu0 %1778 }
 0x3c6   :  { %8371 = vst [vmem:[#allocation144_spill] sm:$0xff] %v5810_v23  ;;  %v6046_v23 = vld [vmem:[%s8036_s0 + $0xa8] sm:$0xff] }
 0x3ca   :  { %1938 = vrot.lane.b32.xlu1 %v5255_v1, %s8227_s16 }
 0x3cb   :  { %1942 = vrot.lane.b32.xlu2 %v5282_v18, %s8227_s16  ;;  %1964 = vrot.lane.b32.xlu0 %v5260_v22, %s8230_s18 }
 0x3cc   :  { %v5818_v36 = vpop.permute.xlu1 %1790 }
 0x3cd   :  { %8372 = vst [vmem:[#allocation145_spill] sm:$0xff] %v5818_v36  ;;  %v5820_v33 = vpop.permute.xlu2 %1818  ;;  %v1785_v61 = vpop.permute.xlu0 %1784 }
 0x3ce   :  { %8373 = vst [vmem:[#allocation146_spill] sm:$0xff] %v5820_v33  ;;  %v1857_v48 = vsel %vm162_vm1, %v1853_v59, %v1785_v61  ;;  %v3695_v61 = vld [vmem:[%s8038_s2 + $0x13] ss:$0 sm:$0xff] }
 0x3d2   :  { %1976 = vrot.lane.b32.xlu1 %v5260_v22, %s8294_s4 }
 0x3d3   :  { %2024 = vrot.lane.b32.xlu2 %v5825_v40, %s8297_s12  ;;  %1972 = vrot.lane.b32.xlu0 %v5265_v55, %s8294_s4 }
 0x3d4   :  { %v1797_v43 = vpop.permute.xlu1 %1796 }
 0x3d5   :  { %v1829_v5 = vpop.permute.xlu2 %1828  ;;  %v5833_v17 = vpop.permute.xlu0 %1794  ;;  %v1861_v42 = vsel %vm167_vm2, %v1857_v48, %v1797_v43  ;;  %v1855_v48 = vsel %vm162_vm1, %v1851_v6, %v1781_v10 }
 0x3d6   :  { %8374 = vst [vmem:[#allocation147_spill] sm:$0xff] %v5833_v17  ;;  %v1865_v21 = vsel %vm172_vm3, %v1861_v42, %v1809_v62 }
 0x3da   :  { %1950 = vrot.lane.b32.xlu1 %v5255_v1, %s8229_s17 }
 0x3db   :  { %1954 = vrot.lane.b32.xlu2 %v5282_v18, %s8229_s17  ;;  %2026 = vrot.lane.b32.xlu0 %v5838_v53, %s8297_s12 }
 0x3dc   :  { %v5846_v22 = vpop.permute.xlu1 %1806 }
 0x3dd   :  { %8375 = vst [vmem:[#allocation148_spill] sm:$0xff] %v5846_v22  ;;  %v5848_v55 = vpop.permute.xlu2 %1838  ;;  %v1805_v44 = vpop.permute.xlu0 %1804 }
 0x3de   :  { %8376 = vst [vmem:[#allocation149_spill] sm:$0xff] %v5848_v55 }
 0x3e2   :  { %2032 = vrot.lane.b32.xlu1 %v5838_v53, %s8299_s13 }
 0x3e3   :  { %1962 = vrot.lane.b32.xlu2 %v5255_v1, %s8230_s18  ;;  %2030 = vrot.lane.b32.xlu0 %v5825_v40, %s8299_s13 }
 0x3e4   :  { %v1817_v29 = vpop.permute.xlu1 %1816 }
 0x3e5   :  { %v1845_v37 = vpop.permute.xlu2 %1844  ;;  %v5856_v45 = vpop.permute.xlu0 %1814 }
 0x3e6   :  { %8377 = vst [vmem:[#allocation150_spill] sm:$0xff] %v5856_v45 }
 0x3ea   :  { %2036 = vrot.lane.b32.xlu1 %v5825_v40, %s8302_s9 }
 0x3eb   :  { %2038 = vrot.lane.b32.xlu2 %v5838_v53, %s8302_s9  ;;  %1966 = vrot.lane.b32.xlu0 %v5282_v18, %s8230_s18 }
 0x3ec   :  { %v5864_v41 = vpop.permute.xlu1 %1826 }
 0x3ed   :  { %8378 = vst [vmem:[#allocation151_spill] sm:$0xff] %v5864_v41  ;;  %v5866_v9 = vpop.permute.xlu2 %1892  ;;  %v1821_v60 = vpop.permute.xlu0 %1820 }
 0x3ee   :  { %8379 = vst [vmem:[#allocation152_spill] sm:$0xff] %v5866_v9  ;;  %v1869_v15 = vsel %vm177_vm4, %v1865_v21, %v1821_v60  ;;  %v1859_v60 = vsel %vm167_vm2, %v1855_v48, %v5790_v8 }
 0x3ef   :  { %v1863_v21 = vsel %vm172_vm3, %v1859_v60, %v1805_v44 }
 0x3f0   :  { %v1867_v11 = vsel %vm177_vm4, %v1863_v21, %v1817_v29 }
 0x3f1   :  { %v1871_v8 = vsel %vm182_vm5, %v1867_v11, %v1829_v5 }
 0x3f2   :  { %2114 = vrot.lane.b32.xlu1 %v5838_v53, %s8236_s15 }
 0x3f3   :  { %2118 = vrot.lane.b32.xlu2 %v5825_v40, %s8237_s23  ;;  %2112 = vrot.lane.b32.xlu0 %v5825_v40, %s8236_s15 }
 0x3f4   :  { %v1833_v13 = vpop.permute.xlu1 %1832 }
 0x3f5   :  { %v5882_v59 = vpop.permute.xlu2 %1902  ;;  %v1873_v43 = vsel %vm182_vm5, %v1869_v15, %v1833_v13  ;;  %v5889_v42 = vpop.permute.xlu0 %1830 }
 0x3f6   :  { %8380 = vst [vmem:[#allocation153_spill] sm:$0xff] %v5889_v42  ;;  %v5892_v62 = vsel %vm187_vm6, %v1873_v43, %v1845_v37 }
 0x3f7   :  { %v1883_v58 = vmul.f32 %v3695_v61, %v5892_v62 }
 0x3f9   :  { %v5899_v6 = vadd.f32 %v1883_v58, %v5782_v51 }
 0x3fa   :  { %1974 = vrot.lane.b32.xlu1 %v5255_v1, %s8294_s4 }
 0x3fb   :  { %1978 = vrot.lane.b32.xlu2 %v5282_v18, %s8294_s4  ;;  %2120 = vrot.lane.b32.xlu0 %v5838_v53, %s8237_s23 }
 0x3fc   :  { %v5908_v10 = vpop.permute.xlu1 %1842 }
 0x3fd   :  { %8381 = vst [vmem:[#allocation154_spill] sm:$0xff] %v5908_v10  ;;  %v5910_v37 = vpop.permute.xlu2 %1912  ;;  %v1841_v44 = vpop.permute.xlu0 %1840 }
 0x3fe   :  { %8382 = vst [vmem:[#allocation155_spill] sm:$0xff] %v5910_v37  ;;  %v5914_v51 = vsel %vm187_vm6, %v1871_v8, %v1841_v44 }
 0x3ff   :  { %v1881_v29 = vmul.f32 %v3695_v61, %v5914_v51 }
 0x401   :  { %v5918_v1 = vadd.f32 %v1881_v29, %v5753_v34 }
 0x402   :  { %2044 = vrot.lane.b32.xlu1 %v5838_v53, %s8303_s11 }
 0x403   :  { %2124 = vrot.lane.b32.xlu2 %v5825_v40, %s8239_s29  ;;  %2042 = vrot.lane.b32.xlu0 %v5825_v40, %s8303_s11 }
 0x404   :  { %v5926_v18 = vpop.permute.xlu1 %1890 }
 0x405   :  { %v5928_v5 = vpop.permute.xlu2 %1918  ;;  %v5930_v15 = vpop.permute.xlu0 %1888 }
 0x406   :  { %8383 = vst [vmem:[#allocation156_spill] sm:$0xff] %v5930_v15 }
 0x40a   :  { %2048 = vrot.lane.b32.xlu1 %v5825_v40, %s8306_s8 }
 0x40b   :  { %2050 = vrot.lane.b32.xlu2 %v5838_v53, %s8306_s8  ;;  %2126 = vrot.lane.b32.xlu0 %v5838_v53, %s8239_s29 }
 0x40c   :  { %v5938_v34 = vpop.permute.xlu1 %1900 }
 0x40d   :  { %8384 = vst [vmem:[#allocation157_spill] sm:$0xff] %v5938_v34  ;;  %v5940_v13 = vpop.permute.xlu2 %1928  ;;  %v1895_v48 = vpop.permute.xlu0 %1894 }
 0x40e   :  { %8385 = vst [vmem:[#allocation158_spill] sm:$0xff] %v5940_v13 }
 0x412   :  { %2132 = vrot.lane.b32.xlu1 %v5838_v53, %s8241_s30 }
 0x413   :  { %2206 = vrot.lane.b32.xlu2 %v5825_v40, %s8220_s24  ;;  %2130 = vrot.lane.b32.xlu0 %v5825_v40, %s8241_s30 }
 0x414   :  { %v1907_v61 = vpop.permute.xlu1 %1906 }
 0x415   :  { %v5948_v43 = vpop.permute.xlu2 %1948  ;;  %v5950_v58 = vpop.permute.xlu0 %1904 }
 0x416   :  { %8386 = vst [vmem:[#allocation159_spill] sm:$0xff] %v5948_v43 }
 0x417   :  { %8387 = vst [vmem:[#allocation160_spill] sm:$0xff] %v5950_v58 }
 0x41a   :  { %2212 = vrot.lane.b32.xlu1 %v5825_v40, %s8222_s19 }
 0x41b   :  { %2214 = vrot.lane.b32.xlu2 %v5838_v53, %s8222_s19  ;;  %2208 = vrot.lane.b32.xlu0 %v5838_v53, %s8220_s24 }
 0x41c   :  { %v5958_v60 = vpop.permute.xlu1 %1916 }
 0x41d   :  { %8388 = vst [vmem:[#allocation161_spill] sm:$0xff] %v5958_v60  ;;  %v5960_v21 = vpop.permute.xlu2 %1960  ;;  %v5962_v11 = vpop.permute.xlu0 %1914 }
 0x41e   :  { %8389 = vst [vmem:[#allocation162_spill] sm:$0xff] %v5960_v21 }
 0x422   :  { %2056 = vrot.lane.b32.xlu1 %v5838_v53, %s8234_s28 }
 0x423   :  { %2136 = vrot.lane.b32.xlu2 %v5825_v40, %s8243_s27  ;;  %2054 = vrot.lane.b32.xlu0 %v5825_v40, %s8234_s28 }
 0x424   :  { %v5970_v8 = vpop.permute.xlu1 %1926 }
 0x425   :  { %v1943_v44 = vpop.permute.xlu2 %1942  ;;  %v5972_v29 = vpop.permute.xlu0 %1924 }
 0x426   :  { %8390 = vst [vmem:[#allocation163_spill] sm:$0xff] %v5972_v29 }
 0x42a   :  { %2218 = vrot.lane.b32.xlu1 %v5825_v40, %s8224_s22 }
 0x42b   :  { %2220 = vrot.lane.b32.xlu2 %v5838_v53, %s8224_s22  ;;  %2138 = vrot.lane.b32.xlu0 %v5838_v53, %s8243_s27 }
 0x42c   :  { %v5980_v30 = vpop.permute.xlu1 %1940 }
 0x42d   :  { %8391 = vst [vmem:[#allocation164_spill] sm:$0xff] %v5980_v30  ;;  %v5982_v63 = vpop.permute.xlu2 %2024  ;;  %v5984_v49 = vpop.permute.xlu0 %1936 }
 0x42e   :  { %8392 = vst [vmem:[#allocation165_spill] sm:$0xff] %v5984_v49  ;;  %v2066_v17 = vsel %vm157_vm0, %v5825_v40, %v5982_v63 }
 0x432   :  { %2062 = vrot.lane.b32.xlu1 %v5838_v53, %s8235_s14 }
 0x433   :  { %2142 = vrot.lane.b32.xlu2 %v5825_v40, %s8250_s26  ;;  %2060 = vrot.lane.b32.xlu0 %v5825_v40, %s8235_s14 }
 0x434   :  { %v1931_v24 = vpop.permute.xlu1 %1930 }
 0x435   :  { %v1955_v21 = vpop.permute.xlu2 %1954  ;;  %v5992_v55 = vpop.permute.xlu0 %1952 }
 0x436   :  { %8393 = vst [vmem:[#allocation166_spill] sm:$0xff] %v5992_v55 }
 0x43a   :  { %2224 = vrot.lane.b32.xlu1 %v5825_v40, %s8225_s10 }
 0x43b   :  { %2226 = vrot.lane.b32.xlu2 %v5838_v53, %s8225_s10  ;;  %2144 = vrot.lane.b32.xlu0 %v5838_v53, %s8250_s26 }
 0x43c   :  { %v1939_v43 = vpop.permute.xlu1 %1938 }
 0x43d   :  { %v1963_v39 = vpop.permute.xlu2 %1962  ;;  %v6000_v41 = vpop.permute.xlu0 %1964 }
 0x43e   :  { %8394 = vst [vmem:[#allocation167_spill] sm:$0xff] %v6000_v41 }
 0x442   :  { %2150 = vrot.lane.b32.xlu1 %v5838_v53, %s8254_s25 }
 0x443   :  { %2230 = vrot.lane.b32.xlu2 %v5825_v40, %s8227_s16  ;;  %2148 = vrot.lane.b32.xlu0 %v5825_v40, %s8254_s25 }
 0x444   :  { %v6008_v12 = vpop.permute.xlu1 %1976 }
 0x445   :  { %8395 = vst [vmem:[#allocation168_spill] sm:$0xff] %v6008_v12  ;;  %v6010_v19 = vpop.permute.xlu2 %2038  ;;  %v6012_v45 = vpop.permute.xlu0 %1972 }
 0x446   :  { %8396 = vst [vmem:[#allocation169_spill] sm:$0xff] %v6012_v45  ;;  %v1987_v45 = vsel %vm157_vm0, %v1895_v48, %v1907_v61 }
 0x447   :  { %v1991_v15 = vsel %vm162_vm1, %v1987_v45, %v5928_v5 }
 0x448   :  { %v1995_v34 = vsel %vm167_vm2, %v1991_v15, %v1931_v24  ;;  %v3698_v15 = vld [vmem:[%s8038_s2 + $0x14] ss:$0 sm:$0xff] }
 0x449   :  { %v1999_v48 = vsel %vm172_vm3, %v1995_v34, %v1943_v44 }
 0x44a   :  { %2154 = vrot.lane.b32.xlu1 %v5825_v40, %s8219_s21  ;;  %v2003_v24 = vsel %vm177_vm4, %v1999_v48, %v1955_v21 }
 0x44b   :  { %2156 = vrot.lane.b32.xlu2 %v5838_v53, %s8219_s21  ;;  %2232 = vrot.lane.b32.xlu0 %v5838_v53, %s8227_s16 }
 0x44c   :  { %v1951_v49 = vpop.permute.xlu1 %1950 }
 0x44d   :  { %v6020_v20 = vpop.permute.xlu2 %2118  ;;  %v6022_v29 = vpop.permute.xlu0 %2026 }
 0x452   :  { %2238 = vrot.lane.b32.xlu1 %v5838_v53, %s8229_s17 }
 0x453   :  { %2407 = vrot.lane.b32.xlu2 %v6027_v35, %s8297_s12  ;;  %2236 = vrot.lane.b32.xlu0 %v5825_v40, %s8229_s17 }
 0x454   :  { %v6036_v37 = vpop.permute.xlu1 %2032 }
 0x455   :  { %v1979_v46 = vpop.permute.xlu2 %1978  ;;  %v6038_v36 = vpop.permute.xlu0 %2030 }
 0x456   :  { %v2068_v54 = vsel %vm162_vm1, %v2066_v17, %v6038_v36 }
 0x45a   :  { %2242 = vrot.lane.b32.xlu1 %v5825_v40, %s8230_s18 }
 0x45b   :  { %2244 = vrot.lane.b32.xlu2 %v5838_v53, %s8230_s18  ;;  %2411 = vrot.lane.b32.xlu0 %v6046_v23, %s8297_s12 }
 0x45c   :  { %v6055_v61 = vpop.permute.xlu1 %2036 }
 0x45d   :  { %v6057_v45 = vpop.permute.xlu2 %2124  ;;  %v1967_v5 = vpop.permute.xlu0 %1966  ;;  %v2070_v4 = vsel %vm167_vm2, %v2068_v54, %v6055_v61 }
 0x45e   :  { %v2007_v34 = vsel %vm182_vm5, %v2003_v24, %v1967_v5 }
 0x45f   :  { %v6065_v44 = vsel %vm187_vm6, %v2007_v34, %v1979_v46  ;;  %v1985_v46 = vsel %vm157_vm0, %v5926_v18, %v5882_v59 }
 0x460   :  { %v2017_v14 = vmul.f32 %v3698_v15, %v6065_v44 }
 0x462   :  { %v6069_v28 = vadd.f32 %v2017_v14, %v5899_v6  ;;  %2423 = vrot.lane.b32.xlu1 %v6046_v23, %s8299_s13  ;;  %v1989_v14 = vsel %vm162_vm1, %v1985_v46, %v5962_v11 }
 0x463   :  { %2248 = vrot.lane.b32.xlu2 %v5825_v40, %s8294_s4  ;;  %2419 = vrot.lane.b32.xlu0 %v6027_v35, %s8299_s13  ;;  %v1993_v6 = vsel %vm167_vm2, %v1989_v14, %v5970_v8 }
 0x464   :  { %v6077_v21 = vpop.permute.xlu1 %2114  ;;  %v1997_v5 = vsel %vm172_vm3, %v1993_v6, %v1939_v43 }
 0x465   :  { %v6079_v48 = vpop.permute.xlu2 %2050  ;;  %v6084_v24 = vpop.permute.xlu0 %2112  ;;  %v2001_v34 = vsel %vm177_vm4, %v1997_v5, %v1951_v49 }
 0x466   :  { %v2005_v18 = vsel %vm182_vm5, %v2001_v34, %v1963_v39  ;;  %v2160_v58 = vsel %vm157_vm0, %v6084_v24, %v6020_v20 }
 0x467   :  { %v2162_v20 = vsel %vm162_vm1, %v2160_v58, %v6057_v45 }
 0x46a   :  { %2431 = vrot.lane.b32.xlu1 %v6027_v35, %s8302_s9 }
 0x46b   :  { %2435 = vrot.lane.b32.xlu2 %v6046_v23, %s8302_s9  ;;  %2250 = vrot.lane.b32.xlu0 %v5838_v53, %s8294_s4 }
 0x46c   :  { %v1975_v59 = vpop.permute.xlu1 %1974 }
 0x46d   :  { %v6099_v11 = vpop.permute.xlu2 %2206  ;;  %v6102_v8 = vsel %vm187_vm6, %v2005_v18, %v1975_v59  ;;  %v6104_v43 = vpop.permute.xlu0 %2120 }
 0x46e   :  { %v2015_v49 = vmul.f32 %v3698_v15, %v6102_v8  ;;  %v6130_v15 = vld [vmem:[%s8036_s0 + $0xb0] sm:$0xff] }
 0x470   :  { %v6108_v46 = vadd.f32 %v2015_v49, %v5918_v1  ;;  %v6125_v1 = vld [vmem:[%s8036_s0 + $0x50] sm:$0xff] }
 0x472   :  { %2533 = vrot.lane.b32.xlu1 %v6046_v23, %s8236_s15 }
 0x473   :  { %2541 = vrot.lane.b32.xlu2 %v6027_v35, %s8237_s23  ;;  %2529 = vrot.lane.b32.xlu0 %v6027_v35, %s8236_s15 }
 0x474   :  { %v6116_v39 = vpop.permute.xlu1 %2044 }
 0x475   :  { %v6118_v14 = vpop.permute.xlu2 %2214  ;;  %v6120_v6 = vpop.permute.xlu0 %2042 }
 0x476   :  { %v2072_v25 = vsel %vm172_vm3, %v2070_v4, %v6120_v6 }
 0x47a   :  { %2409 = vrot.lane.b32.xlu1 %v6125_v1, %s8297_s12 }
 0x47b   :  { %2413 = vrot.lane.b32.xlu2 %v6130_v15, %s8297_s12  ;;  %2545 = vrot.lane.b32.xlu0 %v6046_v23, %s8237_s23 }
 0x47c   :  { %v2049_v5 = vpop.permute.xlu1 %2048 }
 0x47d   :  { %v2137_v34 = vpop.permute.xlu2 %2136  ;;  %v6138_v59 = vpop.permute.xlu0 %2126  ;;  %v2074_v40 = vsel %vm177_vm4, %v2072_v25, %v2049_v5  ;;  %v6281_v5 = vld [vmem:[%s8038_s2 + $0x18] ss:$0 sm:$0xff] }
 0x482   :  { %2447 = vrot.lane.b32.xlu1 %v6046_v23, %s8303_s11 }
 0x483   :  { %2553 = vrot.lane.b32.xlu2 %v6027_v35, %s8239_s29  ;;  %2443 = vrot.lane.b32.xlu0 %v6027_v35, %s8303_s11 }
 0x484   :  { %v6146_v18 = vpop.permute.xlu1 %2132 }
 0x485   :  { %v2221_v49 = vpop.permute.xlu2 %2220  ;;  %v2131_v47 = vpop.permute.xlu0 %2130 }
 0x486   :  { %v2164_v52 = vsel %vm167_vm2, %v2162_v20, %v2131_v47  ;;  %v6310_v20 = vld [vmem:[%s8038_s2 + $0x19] ss:$0 sm:$0xff] }
 0x487   :  { %v2166_v26 = vsel %vm172_vm3, %v2164_v52, %v2137_v34 }
 0x48a   :  { %2421 = vrot.lane.b32.xlu1 %v6125_v1, %s8299_s13 }
 0x48b   :  { %2425 = vrot.lane.b32.xlu2 %v6130_v15, %s8299_s13  ;;  %2557 = vrot.lane.b32.xlu0 %v6046_v23, %s8239_s29 }
 0x48c   :  { %v6154_v32 = vpop.permute.xlu1 %2212 }
 0x48d   :  { %v2143_v27 = vpop.permute.xlu2 %2142  ;;  %v2209_v0 = vpop.permute.xlu0 %2208 }
 0x48e   :  { %v2255_v63 = vsel %vm157_vm0, %v2209_v0, %v6118_v14  ;;  %v2168_v17 = vsel %vm177_vm4, %v2166_v26, %v2143_v27  ;;  %v6240_v0 = vld [vmem:[%s8038_s2 + $0x15] ss:$0 sm:$0xff]  ;;  %v2067_v27 = vsel %vm157_vm0, %v5838_v53, %v6022_v29 }
 0x48f   :  { %v2257_v58 = vsel %vm162_vm1, %v2255_v63, %v2221_v49  ;;  %v6270_v45 = vmul.f32 %v6240_v0, %v5741_v50  ;;  %v6290_v49 = vmul.f32 %v6281_v5, %v5741_v50  ;;  %v2161_v63 = vsel %vm157_vm0, %v6077_v21, %v6104_v43 }
 0x492   :  { %2459 = vrot.lane.b32.xlu1 %v6046_v23, %s8306_s8 }
 0x493   :  { %2565 = vrot.lane.b32.xlu2 %v6027_v35, %s8241_s30  ;;  %2455 = vrot.lane.b32.xlu0 %v6027_v35, %s8306_s8 }
 0x494   :  { %v6162_v12 = vpop.permute.xlu1 %2056 }
 0x495   :  { %v2227_v2 = vpop.permute.xlu2 %2226  ;;  %v2055_v41 = vpop.permute.xlu0 %2054 }
 0x496   :  { %v2076_v36 = vsel %vm182_vm5, %v2074_v40, %v2055_v41  ;;  %v2259_v25 = vsel %vm167_vm2, %v2257_v58, %v2227_v2  ;;  %v6256_v2 = vld [vmem:[%s8038_s2 + $0x16] ss:$0 sm:$0xff]  ;;  %v2163_v58 = vsel %vm162_vm1, %v2161_v63, %v6138_v59 }
 0x497   :  { %v6274_v14 = vmul.f32 %v6256_v2, %v5914_v51  ;;  %v2165_v43 = vsel %vm167_vm2, %v2163_v58, %v6146_v18 }
 0x49a   :  { %2663 = vrot.lane.b32.xlu1 %v6027_v35, %s8220_s24 }
 0x49b   :  { %2667 = vrot.lane.b32.xlu2 %v6046_v23, %s8220_s24  ;;  %2569 = vrot.lane.b32.xlu0 %v6046_v23, %s8241_s30 }
 0x49c   :  { %v2219_v55 = vpop.permute.xlu1 %2218 }
 0x49d   :  { %v6170_v10 = vpop.permute.xlu2 %2230  ;;  %v6172_v30 = vpop.permute.xlu0 %2138 }
 0x4a2   :  { %2679 = vrot.lane.b32.xlu1 %v6046_v23, %s8222_s19 }
 0x4a3   :  { %2433 = vrot.lane.b32.xlu2 %v6125_v1, %s8302_s9  ;;  %2675 = vrot.lane.b32.xlu0 %v6027_v35, %s8222_s19 }
 0x4a4   :  { %v6180_v42 = vpop.permute.xlu1 %2062 }
 0x4a5   :  { %v6182_v13 = vpop.permute.xlu2 %2156  ;;  %v2061_v33 = vpop.permute.xlu0 %2060 }
 0x4a6   :  { %v2078_v54 = vsel %vm187_vm6, %v2076_v36, %v2061_v33 }
 0x4a7   :  { %v2084_v33 = vmul.f32 %v6240_v0, %v2078_v54 }
 0x4a9   :  { %v2097_v34 = vrot.slane %v2084_v33, 1 }
 0x4aa   :  { %2467 = vrot.lane.b32.xlu1 %v6027_v35, %s8234_s28 }
 0x4ab   :  { %2471 = vrot.lane.b32.xlu2 %v6046_v23, %s8234_s28  ;;  %2437 = vrot.lane.b32.xlu0 %v6130_v15, %s8302_s9 }
 0x4ac   :  { %v2225_v3 = vpop.permute.xlu1 %2224 }
 0x4ad   :  { %v6190_v16 = vpop.permute.xlu2 %2407  ;;  %v6192_v60 = vpop.permute.xlu0 %2144 }
 0x4ae   :  { %v2491_v63 = vsel %vm157_vm0, %v6027_v35, %v6190_v16 }
 0x4b2   :  { %2535 = vrot.lane.b32.xlu1 %v6130_v15, %s8236_s15 }
 0x4b3   :  { %2543 = vrot.lane.b32.xlu2 %v6125_v1, %s8237_s23  ;;  %2531 = vrot.lane.b32.xlu0 %v6125_v1, %s8236_s15 }
 0x4b4   :  { %v6200_v22 = vpop.permute.xlu1 %2150 }
 0x4b5   :  { %v2245_v7 = vpop.permute.xlu2 %2244  ;;  %v2149_v9 = vpop.permute.xlu0 %2148 }
 0x4b6   :  { %v2170_v47 = vsel %vm182_vm5, %v2168_v17, %v2149_v9  ;;  %v2069_v9 = vsel %vm162_vm1, %v2067_v27, %v6036_v37 }
 0x4ba   :  { %2577 = vrot.lane.b32.xlu1 %v6027_v35, %s8243_s27 }
 0x4bb   :  { %2581 = vrot.lane.b32.xlu2 %v6046_v23, %s8243_s27  ;;  %2547 = vrot.lane.b32.xlu0 %v6130_v15, %s8237_s23 }
 0x4bc   :  { %v2155_v31 = vpop.permute.xlu1 %2154 }
 0x4bd   :  { %v6214_v38 = vpop.permute.xlu2 %2248  ;;  %v2233_v24 = vpop.permute.xlu0 %2232  ;;  %v2172_v26 = vsel %vm187_vm6, %v2170_v47, %v2155_v31  ;;  %v2254_v31 = vsel %vm157_vm0, %v6099_v11, %v6154_v32  ;;  %v2071_v32 = vsel %vm167_vm2, %v2069_v9, %v6010_v19  ;;  %v8157_v19 = vrot.slane %v6274_v14, 1 }
 0x4be   :  { %v2261_v41 = vsel %vm172_vm3, %v2259_v25, %v2233_v24  ;;  %v2256_v37 = vsel %vm162_vm1, %v2254_v31, %v2219_v55  ;;  %v2178_v6 = vmul.f32 %v6256_v2, %v2172_v26  ;;  %v2073_v11 = vsel %vm172_vm3, %v2071_v32, %v6116_v39  ;;  %v6295_v55 = vld [vmem:[%s8038_s2 + $0x17] ss:$0 sm:$0xff] }
 0x4bf   :  { %v6314_v24 = vmul.f32 %v6295_v55, %v6102_v8  ;;  %v2075_v40 = vsel %vm177_vm4, %v2073_v11, %v6079_v48  ;;  %v2304_v47 = vmul.f32 %v6281_v5, %v2078_v54  ;;  %v6333_v48 = vmul.f32 %v6310_v20, %v5914_v51  ;;  %v6344_v54 = vld [vmem:[%s8038_s2 + $0x1a] ss:$0 sm:$0xff] }
 0x4c0   :  { %v2191_v39 = vrot.slane %v2178_v6, 1  ;;  %v2336_v18 = vmul.f32 %v6310_v20, %v2172_v26  ;;  %v8155_v26 = vrot.slane %v6290_v49, 2 }
 0x4c1   :  { %8397 = vst [vmem:[#allocation170_spill] sm:$0xff] %v6333_v48 }
 0x4c2   :  { %2691 = vrot.lane.b32.xlu1 %v6046_v23, %s8224_s22  ;;  %v2192_v51 = vsel %vm542_vm7, %v8157_v19, %v2191_v39 }
 0x4c3   :  { %2445 = vrot.lane.b32.xlu2 %v6125_v1, %s8303_s11  ;;  %2687 = vrot.lane.b32.xlu0 %v6027_v35, %s8224_s22 }
 0x4c4   :  { %v2239_v4 = vpop.permute.xlu1 %2238 }
 0x4c5   :  { %v6251_v52 = vpop.permute.xlu2 %2435  ;;  %v2263_v61 = vsel %vm177_vm4, %v2261_v41, %v2239_v4  ;;  %v2237_v53 = vpop.permute.xlu0 %2236  ;;  %v2077_v41 = vsel %vm182_vm5, %v2075_v40, %v6162_v12  ;;  %v2167_v4 = vsel %vm172_vm3, %v2165_v43, %v6172_v30  ;;  %v8156_v12 = vrot.slane %v6314_v24, 1 }
 0x4c6   :  { %v6266_v29 = vsel %vm182_vm5, %v2263_v61, %v2245_v7  ;;  %v2258_v7 = vsel %vm167_vm2, %v2256_v37, %v2225_v3  ;;  %v8158_v3 = vrot.slane %v6270_v45, 1  ;;  %v2169_v61 = vsel %vm177_vm4, %v2167_v4, %v6192_v60 }
 0x4c7   :  { %v2260_v50 = vsel %vm172_vm3, %v2258_v7, %v6170_v10  ;;  %v2171_v30 = vsel %vm182_vm5, %v2169_v61, %v6200_v22  ;;  %v6370_v60 = vmul.f32 %v6344_v54, %v6102_v8  ;;  %v6405_v43 = vmul.f32 %v6256_v2, %v5892_v62 }
 0x4c8   :  { %v2262_v10 = vsel %vm177_vm4, %v2260_v50, %v2237_v53  ;;  %v2098_v25 = vsel %vm542_vm7, %v8158_v3, %v2097_v34  ;;  %v2317_v53 = vrot.slane %v2304_v47, 2  ;;  %v2173_v7 = vsel %vm187_vm6, %v2171_v30, %v6182_v13  ;;  %v8434_v3 = vld [vmem:[#allocation17_spill] sm:$0xff] }
 0x4c9   :  { %v2109_v33 = vadd.f32 %v2098_v25, %v6108_v46  ;;  %8398 = vst [vmem:[#allocation171_spill] sm:$0xff] %v6370_v60  ;;  %v2349_v46 = vrot.slane %v2336_v18, 2  ;;  %v6396_v47 = vmul.f32 %v6240_v0, %v5779_v56 }
 0x4ca   :  { %2479 = vrot.lane.b32.xlu1 %v6027_v35, %s8235_s14  ;;  %v2318_v50 = vsel %vm763_vm8, %v8155_v26, %v2317_v53  ;;  %v6422_v53 = vmul.f32 %v6295_v55, %v6065_v44  ;;  %v8432_v26 = vld [vmem:[#allocation10_spill] sm:$0xff] }
 0x4cb   :  { %2483 = vrot.lane.b32.xlu2 %v6046_v23, %s8235_s14  ;;  %2449 = vrot.lane.b32.xlu0 %v6130_v15, %s8303_s11  ;;  %v2203_v6 = vadd.f32 %v2192_v51, %v2109_v33  ;;  %v8164_v51 = vrot.slane %v6396_v47, 1 }
 0x4cc   :  { %v2243_v36 = vpop.permute.xlu1 %2242 }
 0x4cd   :  { %v6322_v17 = vpop.permute.xlu2 %2541  ;;  %v2264_v27 = vsel %vm182_vm5, %v2262_v10, %v2243_v36  ;;  %v2412_v21 = vpop.permute.xlu0 %2411 }
 0x4ce   :  { %v2266_v59 = vsel %vm187_vm6, %v2264_v27, %v6214_v38  ;;  %v2079_v38 = vsel %vm187_vm6, %v2077_v41, %v6180_v42  ;;  %v8154_v42 = vrot.slane %v6333_v48, 2  ;;  %v2493_v34 = vsel %vm157_vm0, %v6046_v23, %v2412_v21 }
 0x4cf   :  { %v2272_v9 = vmul.f32 %v6295_v55, %v2266_v59  ;;  %v2368_v37 = vmul.f32 %v6344_v54, %v2266_v59  ;;  %v2087_v32 = vmul.f32 %v6240_v0, %v2079_v38  ;;  %v8153_v27 = vrot.slane %v6370_v60, 2  ;;  %v8503_v60 = vld [vmem:[#allocation100_spill] sm:$0xff] }
 0x4d0   :  { %v2181_v21 = vmul.f32 %v6256_v2, %v2173_v7  ;;  %v2350_v16 = vsel %vm763_vm8, %v8154_v42, %v2349_v46 }
 0x4d1   :  { %v2285_v31 = vrot.slane %v2272_v9, 1  ;;  %v2381_v40 = vrot.slane %v2368_v37, 2  ;;  %v8163_v9 = vrot.slane %v6405_v43, 1 }
 0x4d2   :  { %2559 = vrot.lane.b32.xlu1 %v6130_v15, %s8239_s29  ;;  %v2196_v18 = vrot.slane %v2181_v21, 1 }
 0x4d3   :  { %2589 = vrot.lane.b32.xlu2 %v6027_v35, %s8250_s26  ;;  %v2286_v22 = vsel %vm542_vm7, %v8156_v12, %v2285_v31  ;;  %2555 = vrot.lane.b32.xlu0 %v6125_v1, %s8239_s29  ;;  %v2382_v59 = vsel %vm763_vm8, %v8153_v27, %v2381_v40  ;;  %v2307_v31 = vmul.f32 %v6281_v5, %v2079_v38 }
 0x4d4   :  { %v2297_v11 = vadd.f32 %v2286_v22, %v2203_v6  ;;  %v2424_v39 = vpop.permute.xlu1 %2423  ;;  %v6433_v22 = vmul.f32 %v6281_v5, %v5779_v56  ;;  %v6442_v38 = vmul.f32 %v6310_v20, %v5892_v62 }
 0x4d5   :  { %v2414_v8 = vpop.permute.xlu2 %2413  ;;  %v2497_v10 = vsel %vm162_vm1, %v2493_v34, %v2424_v39  ;;  %v2420_v36 = vpop.permute.xlu0 %2419 }
 0x4d6   :  { %v2495_v13 = vsel %vm162_vm1, %v2491_v63, %v2420_v36  ;;  %v6392_v58 = vsel %vm167_vm2, %v2497_v10, %v6251_v52  ;;  %v2329_v25 = vadd.f32 %v2318_v50, %v2297_v11  ;;  %v2102_v52 = vrot.slane %v2087_v32, 1 }
 0x4d7   :  { %v2197_v32 = vsel %vm542_vm7, %v8163_v9, %v2196_v18  ;;  %v2339_v11 = vmul.f32 %v6310_v20, %v2173_v7  ;;  %v2322_v50 = vrot.slane %v2307_v31, 2  ;;  %v2494_v40 = vsel %vm157_vm0, %v6130_v15, %v2414_v8 }
 0x4d8   :  { %v2361_v41 = vadd.f32 %v2350_v16, %v2329_v25  ;;  %v2103_v30 = vsel %vm542_vm7, %v8164_v51, %v2102_v52  ;;  %v8161_v62 = vrot.slane %v6433_v22, 2  ;;  %v8160_v21 = vrot.slane %v6442_v38, 2 }
 0x4d9   :  { %v2111_v39 = vadd.f32 %v2103_v30, %v6069_v28  ;;  %v6456_v28 = vmul.f32 %v6344_v54, %v6065_v44  ;;  %v2354_v7 = vrot.slane %v2339_v11, 2 }
 0x4da   :  { %2699 = vrot.lane.b32.xlu1 %v6027_v35, %s8225_s10  ;;  %v6414_v4 = vadd.f32 %v2382_v59, %v2361_v41  ;;  %v2323_v16 = vsel %vm763_vm8, %v8161_v62, %v2322_v50  ;;  %v8445_v62 = vld [vmem:[#allocation47_spill] sm:$0xff] }
 0x4db   :  { %2703 = vrot.lane.b32.xlu2 %v6046_v23, %s8225_s10  ;;  %2593 = vrot.lane.b32.xlu0 %v6046_v23, %s8250_s26  ;;  %v2205_v10 = vadd.f32 %v2197_v32, %v2111_v39  ;;  %v2355_v30 = vsel %vm763_vm8, %v8160_v21, %v2354_v7  ;;  %v8435_v21 = vld [vmem:[#allocation35_spill] sm:$0xff] }
 0x4dc   :  { %8399 = vst [vmem:[#allocation172_spill] sm:$0xff] %v6414_v4  ;;  %v2432_v33 = vpop.permute.xlu1 %2431  ;;  %v8457_v4 = vld [vmem:[#allocation84_spill] sm:$0xff] }
 0x4dd   :  { %v2554_v61 = vpop.permute.xlu2 %2553  ;;  %v2499_v37 = vsel %vm167_vm2, %v2495_v13, %v2432_v33  ;;  %v2251_v6 = vpop.permute.xlu0 %2250  ;;  %v8159_v33 = vrot.slane %v6456_v28, 2 }
 0x4de   :  { %v2267_v46 = vsel %vm187_vm6, %v6266_v29, %v2251_v6  ;;  %v8162_v29 = vrot.slane %v6422_v53, 1 }
 0x4df   :  { %v2275_v34 = vmul.f32 %v6295_v55, %v2267_v46  ;;  %v2371_v56 = vmul.f32 %v6344_v54, %v2267_v46 }
 0x4e1   :  { %v2290_v63 = vrot.slane %v2275_v34, 1  ;;  %v2386_v41 = vrot.slane %v2371_v56, 2 }
 0x4e2   :  { %2461 = vrot.lane.b32.xlu1 %v6130_v15, %s8306_s8 }
 0x4e3   :  { %2567 = vrot.lane.b32.xlu2 %v6125_v1, %s8241_s30  ;;  %v2291_v36 = vsel %vm542_vm7, %v8162_v29, %v2290_v63  ;;  %2457 = vrot.lane.b32.xlu0 %v6125_v1, %s8306_s8  ;;  %v2387_v46 = vsel %vm763_vm8, %v8159_v33, %v2386_v41  ;;  %v8402_v41 = vld [vmem:[#allocation26_spill] sm:$0xff] }
 0x4e4   :  { %v2299_v8 = vadd.f32 %v2291_v36, %v2205_v10  ;;  %v2534_v13 = vpop.permute.xlu1 %2533 }
 0x4e5   :  { %v2426_v25 = vpop.permute.xlu2 %2425  ;;  %v2530_v52 = vpop.permute.xlu0 %2529 }
 0x4e6   :  { %v6468_v44 = vsel %vm162_vm1, %v2494_v40, %v2426_v25  ;;  %v2331_v59 = vadd.f32 %v2323_v16, %v2299_v8  ;;  %v2625_v18 = vsel %vm157_vm0, %v2530_v52, %v6322_v17  ;;  %v8401_v16 = vld [vmem:[#allocation27_spill] sm:$0xff] }
 0x4e7   :  { %v2629_v31 = vsel %vm162_vm1, %v2625_v18, %v2554_v61  ;;  %v300_v52 = vsel %vm157_vm0, %v8402_v41, %v8401_v16  ;;  %v8403_v18 = vld [vmem:[#allocation11_spill] sm:$0xff] }
 0x4e8   :  { %v2363_v6 = vadd.f32 %v2355_v30, %v2331_v59  ;;  %v3722_v59 = vld [vmem:[%s8036_s0 + $0x60] sm:$0xff] }
 0x4e9   :  { %v160_v30 = vsel %vm157_vm0, %v3722_v59, %v8403_v18  ;;  %v8412_v59 = vld [vmem:[#allocation13_spill] sm:$0xff] }
 0x4ea   :  { %2601 = vrot.lane.b32.xlu1 %v6027_v35, %s8254_s25  ;;  %v6484_v17 = vadd.f32 %v2387_v46, %v2363_v6  ;;  %v8405_v46 = vld [vmem:[#allocation45_spill] sm:$0xff] }
 0x4eb   :  { %2605 = vrot.lane.b32.xlu2 %v6046_v23, %s8254_s25  ;;  %2571 = vrot.lane.b32.xlu0 %v6130_v15, %s8241_s30 }
 0x4ec   :  { %8400 = vst [vmem:[#allocation173_spill] sm:$0xff] %v6484_v17  ;;  %v2410_v32 = vpop.permute.xlu1 %2409 }
 0x4ed   :  { %v2566_v11 = vpop.permute.xlu2 %2565  ;;  %v2546_v34 = vpop.permute.xlu0 %2545  ;;  %v2492_v7 = vsel %vm157_vm0, %v6125_v1, %v2410_v32  ;;  %v8406_v32 = vld [vmem:[#allocation37_spill] sm:$0xff] }
 0x4ee   :  { %v6489_v61 = vsel %vm167_vm2, %v2629_v31, %v2566_v11  ;;  %v2627_v39 = vsel %vm157_vm0, %v2534_v13, %v2546_v34  ;;  %v8404_v31 = vld [vmem:[#allocation14_spill] sm:$0xff]  ;;  %v434_v11 = vsel %vm157_vm0, %v8406_v32, %v8405_v46  ;;  %v8407_v34 = vld [vmem:[#allocation15_spill] sm:$0xff]  ;;  %v8414_v32 = vld [vmem:[#allocation20_spill] sm:$0xff] }
 0x4ef   :  { %v165_v6 = vsel %vm162_vm1, %v160_v30, %v8404_v31  ;;  %v8413_v30 = vld [vmem:[#allocation44_spill] sm:$0xff] }
 0x4f2   :  { %2669 = vrot.lane.b32.xlu1 %v6130_v15, %s8220_s24 }
 0x4f3   :  { %2677 = vrot.lane.b32.xlu2 %v6125_v1, %s8222_s19  ;;  %2665 = vrot.lane.b32.xlu0 %v6125_v1, %s8220_s24 }
 0x4f4   :  { %v2448_v50 = vpop.permute.xlu1 %2447 }
 0x4f5   :  { %v6498_v63 = vpop.permute.xlu2 %2667  ;;  %v2505_v56 = vsel %vm172_vm3, %v6392_v58, %v2448_v50  ;;  %v2444_v40 = vpop.permute.xlu0 %2443  ;;  %v8408_v50 = vld [vmem:[#allocation25_spill] sm:$0xff] }
 0x4f6   :  { %v2503_v10 = vsel %vm172_vm3, %v2499_v37, %v2444_v40  ;;  %v304_v40 = vsel %vm162_vm1, %v300_v52, %v8408_v50 }
 0x4fa   :  { %2711 = vrot.lane.b32.xlu1 %v6027_v35, %s8227_s16 }
 0x4fb   :  { %2715 = vrot.lane.b32.xlu2 %v6046_v23, %s8227_s16  ;;  %2681 = vrot.lane.b32.xlu0 %v6130_v15, %s8222_s19 }
 0x4fc   :  { %v2422_v36 = vpop.permute.xlu1 %2421 }
 0x4fd   :  { %v2434_v8 = vpop.permute.xlu2 %2433  ;;  %v2496_v13 = vsel %vm162_vm1, %v2492_v7, %v2422_v36  ;;  %v2558_v58 = vpop.permute.xlu0 %2557  ;;  %v8409_v7 = vld [vmem:[#allocation46_spill] sm:$0xff] }
 0x4fe   :  { %v6513_v25 = vsel %vm167_vm2, %v2496_v13, %v2434_v8  ;;  %v2631_v37 = vsel %vm162_vm1, %v2627_v39, %v2558_v58  ;;  %v170_v39 = vsel %vm167_vm2, %v165_v6, %v8407_v34  ;;  %v438_v36 = vsel %vm162_vm1, %v434_v11, %v8409_v7  ;;  %v8410_v8 = vld [vmem:[#allocation32_spill] sm:$0xff]  ;;  %v8411_v58 = vld [vmem:[#allocation33_spill] sm:$0xff]  ;;  %v8415_v34 = vld [vmem:[#allocation51_spill] sm:$0xff] }
 0x4ff   :  { %v308_v13 = vsel %vm167_vm2, %v304_v40, %v8410_v8  ;;  %v175_v18 = vsel %vm172_vm3, %v170_v39, %v8412_v59  ;;  %v442_v31 = vsel %vm167_vm2, %v438_v36, %v8413_v30  ;;  %v8416_v8 = vld [vmem:[#allocation21_spill] sm:$0xff] }
 0x500   :  { %v312_v16 = vsel %vm172_vm3, %v308_v13, %v8411_v58  ;;  %v180_v11 = vsel %vm177_vm4, %v175_v18, %v8414_v32  ;;  %v446_v50 = vsel %vm172_vm3, %v442_v31, %v8415_v34  ;;  %v8417_v13 = vld [vmem:[#allocation31_spill] sm:$0xff]  ;;  %v8420_v18 = vld [vmem:[#allocation40_spill] sm:$0xff] }
 0x501   :  { %v185_v39 = vsel %vm182_vm5, %v180_v11, %v8416_v8  ;;  %v316_v36 = vsel %vm177_vm4, %v312_v16, %v8417_v13  ;;  %v8424_v11 = vld [vmem:[#allocation22_spill] sm:$0xff]  ;;  %v8425_v34 = vld [vmem:[#allocation24_spill] sm:$0xff] }
 0x502   :  { %2473 = vrot.lane.b32.xlu1 %v6130_v15, %s8234_s28  ;;  %v8426_v8 = vld [vmem:[#allocation56_spill] sm:$0xff] }
 0x503   :  { %2579 = vrot.lane.b32.xlu2 %v6125_v1, %s8243_s27  ;;  %2469 = vrot.lane.b32.xlu0 %v6125_v1, %s8234_s28 }
 0x504   :  { %v2460_v41 = vpop.permute.xlu1 %2459 }
 0x505   :  { %v2472_v52 = vpop.permute.xlu2 %2471  ;;  %v2509_v6 = vsel %vm177_vm4, %v2505_v56, %v2460_v41  ;;  %v2456_v46 = vpop.permute.xlu0 %2455  ;;  %v8418_v56 = vld [vmem:[#allocation52_spill] sm:$0xff]  ;;  %v8419_v41 = vld [vmem:[#allocation38_spill] sm:$0xff] }
 0x506   :  { %v6555_v40 = vsel %vm182_vm5, %v2509_v6, %v2472_v52  ;;  %v6558_v7 = vsel %vm177_vm4, %v2503_v10, %v2456_v46  ;;  %v450_v58 = vsel %vm177_vm4, %v446_v50, %v8418_v56  ;;  %v320_v59 = vsel %vm182_vm5, %v316_v36, %v8419_v41  ;;  %v3723_v10 = vld [vmem:[%s8036_s0] sm:$0xff]  ;;  %v8422_v6 = vld [vmem:[#allocation19_spill] sm:$0xff]  ;;  %v8423_v46 = vld [vmem:[#allocation50_spill] sm:$0xff] }
 0x507   :  { %v6570_v30 = vsel %vm187_vm6, %v320_v59, %v8420_v18  ;;  %v8421_v52 = vld [vmem:[#allocation12_spill] sm:$0xff]  ;;  %v190_v16 = vsel %vm187_vm6, %v185_v39, %v8422_v6  ;;  %v454_v32 = vsel %vm182_vm5, %v450_v58, %v8423_v46  ;;  %v298_v50 = vsel %vm157_vm0, %v8425_v34, %v8424_v11  ;;  %v8427_v39 = vld [vmem:[#allocation29_spill] sm:$0xff]  ;;  %v8429_v46 = vld [vmem:[#allocation30_spill] sm:$0xff] }
 0x508   :  { %v158_v31 = vsel %vm157_vm0, %v3723_v10, %v8421_v52  ;;  %v6590_v13 = vsel %vm187_vm6, %v454_v32, %v8426_v8  ;;  %v302_v36 = vsel %vm162_vm1, %v298_v50, %v8427_v39  ;;  %v3724_v56 = vld [vmem:[%s8038_s2 + $0x1] ss:$0 sm:$0xff]  ;;  %v8428_v18 = vld [vmem:[#allocation9_spill] sm:$0xff]  ;;  %v3725_v52 = vld [vmem:[%s8038_s2] ss:$0 sm:$0xff] }
 0x509   :  { %v330_v58 = vmul.f32 %v3724_v56, %v6570_v30  ;;  %v163_v10 = vsel %vm162_vm1, %v158_v31, %v8428_v18  ;;  %v196_v6 = vmul.f32 %v3725_v52, %v190_v16  ;;  %v306_v32 = vsel %vm167_vm2, %v302_v36, %v8429_v46  ;;  %v3726_v34 = vld [vmem:[%s8038_s2 + $0x3] ss:$0 sm:$0xff]  ;;  %v8430_v8 = vld [vmem:[#allocation43_spill] sm:$0xff]  ;;  %v8431_v39 = vld [vmem:[#allocation42_spill] sm:$0xff] }
 0x50a   :  { %2613 = vrot.lane.b32.xlu1 %v6027_v35, %s8219_s21  ;;  %v533_v50 = vmul.f32 %v3726_v34, %v190_v16  ;;  %v432_v27 = vsel %vm157_vm0, %v8431_v39, %v8430_v8  ;;  %v3727_v31 = vld [vmem:[%s8038_s2 + $0x2] ss:$0 sm:$0xff]  ;;  %v168_v36 = vsel %vm167_vm2, %v163_v10, %v8432_v26  ;;  %v6631_v39 = vld [vmem:[%s8038_s2 + $0x4] ss:$0 sm:$0xff] }
 0x50b   :  { %2617 = vrot.lane.b32.xlu2 %v6046_v23, %s8219_s21  ;;  %2583 = vrot.lane.b32.xlu0 %v6130_v15, %s8243_s27  ;;  %v464_v18 = vmul.f32 %v3727_v31, %v6590_v13  ;;  %v8433_v46 = vld [vmem:[#allocation28_spill] sm:$0xff]  ;;  %v334_v19 = vadd.f32 %v330_v58, %v196_v6  ;;  %v173_v33 = vsel %vm172_vm3, %v168_v36, %v8434_v3 }
 0x50c   :  { %v2664_v41 = vpop.permute.xlu1 %2663  ;;  %v310_v12 = vsel %vm172_vm3, %v306_v32, %v8433_v46  ;;  %v548_v10 = vrot.slane %v533_v50, 1  ;;  %v8437_v32 = vld [vmem:[#allocation36_spill] sm:$0xff]  ;;  %v8440_v46 = vld [vmem:[#allocation49_spill] sm:$0xff]  ;;  %v8441_v50 = vld [vmem:[#allocation79_spill] sm:$0xff] }
 0x50d   :  { %v6600_v59 = vpop.permute.xlu2 %2543  ;;  %v2570_v11 = vpop.permute.xlu0 %2569  ;;  %v314_v8 = vsel %vm177_vm4, %v310_v12, %v8435_v21  ;;  %v8438_v6 = vld [vmem:[#allocation48_spill] sm:$0xff]  ;;  %v468_v36 = vadd.f32 %v464_v18, %v334_v19  ;;  %v8439_v12 = vld [vmem:[#allocation18_spill] sm:$0xff]  ;;  %v6657_v19 = vld [vmem:[%s8038_s2 + $0x5] ss:$0 sm:$0xff] }
 0x50e   :  { %v2635_v42 = vsel %vm167_vm2, %v2631_v37, %v2570_v11  ;;  %v628_v37 = vmul.f32 %v6631_v39, %v6570_v30  ;;  %v8436_v11 = vld [vmem:[#allocation41_spill] sm:$0xff]  ;;  %v318_v58 = vsel %vm182_vm5, %v314_v8, %v8437_v32  ;;  %v178_v21 = vsel %vm177_vm4, %v173_v33, %v8439_v12  ;;  %v8443_v32 = vld [vmem:[#allocation34_spill] sm:$0xff] }
 0x50f   :  { %v436_v26 = vsel %vm162_vm1, %v432_v27, %v8436_v11  ;;  %v8442_v8 = vrot.slane %v8441_v50, 1  ;;  %v722_v18 = vmul.f32 %v6657_v19, %v6590_v13  ;;  %v8444_v50 = vld [vmem:[#allocation16_spill] sm:$0xff] }
 0x510   :  { %v440_v3 = vsel %vm167_vm2, %v436_v26, %v8438_v6  ;;  %v6663_v6 = vsel %vm187_vm6, %v318_v58, %v8443_v32  ;;  %v8446_v58 = vld [vmem:[#allocation23_spill] sm:$0xff] }
 0x511   :  { %v444_v27 = vsel %vm172_vm3, %v440_v3, %v8440_v46  ;;  %v550_v11 = vsel %vm542_vm7, %v548_v10, %v8442_v8  ;;  %v642_v3 = vrot.slane %v628_v37, 1  ;;  %v183_v8 = vsel %vm182_vm5, %v178_v21, %v8444_v50  ;;  %v8449_v50 = vld [vmem:[#allocation39_spill] sm:$0xff] }
 0x512   :  { %2693 = vrot.lane.b32.xlu1 %v6130_v15, %s8224_s22  ;;  %v448_v29 = vsel %vm177_vm4, %v444_v27, %v8445_v62  ;;  %v559_v9 = vadd.f32 %v550_v11, %v468_v36  ;;  %v6681_v37 = vsel %vm187_vm6, %v183_v8, %v8446_v58  ;;  %v736_v21 = vrot.slane %v722_v18, 1  ;;  %v6708_v18 = vld [vmem:[%s8038_s2 + $0x7] ss:$0 sm:$0xff]  ;;  %v8452_v8 = vld [vmem:[#allocation55_spill] sm:$0xff] }
 0x513   :  { %2723 = vrot.lane.b32.xlu2 %v6027_v35, %s8229_s17  ;;  %2689 = vrot.lane.b32.xlu0 %v6125_v1, %s8224_s22  ;;  %v8450_v62 = vrot.slane %v8449_v50, 1  ;;  %v8453_v58 = vrot.slane %v8452_v8, 1  ;;  %v8455_v50 = vld [vmem:[#allocation70_spill] sm:$0xff] }
 0x514   :  { %v2680_v26 = vpop.permute.xlu1 %2679 }
 0x515   :  { %v2582_v33 = vpop.permute.xlu2 %2581  ;;  %v6667_v12 = vsel %vm157_vm0, %v6498_v63, %v2680_v26  ;;  %v2676_v46 = vpop.permute.xlu0 %2675  ;;  %v8447_v63 = vld [vmem:[#allocation53_spill] sm:$0xff]  ;;  %v644_v36 = vsel %vm542_vm7, %v642_v3, %v8450_v62  ;;  %v787_v3 = vmul.f32 %v6708_v18, %v6570_v30 }
 0x516   :  { %v6670_v10 = vsel %vm172_vm3, %v2635_v42, %v2582_v33  ;;  %v6677_v51 = vsel %vm157_vm0, %v2664_v41, %v2676_v46  ;;  %v452_v26 = vsel %vm182_vm5, %v448_v29, %v8447_v63  ;;  %v328_v42 = vmul.f32 %v3724_v56, %v6663_v6  ;;  %v8448_v33 = vld [vmem:[#allocation54_spill] sm:$0xff]  ;;  %v6696_v41 = vld [vmem:[%s8038_s2 + $0x6] ss:$0 sm:$0xff] }
 0x517   :  { %v6688_v32 = vsel %vm187_vm6, %v452_v26, %v8448_v33  ;;  %v754_v27 = vmul.f32 %v6696_v41, %v190_v16  ;;  %v194_v29 = vmul.f32 %v3725_v52, %v6681_v37  ;;  %v653_v11 = vadd.f32 %v644_v36, %v559_v9  ;;  %v3732_v9 = vld [vmem:[%s8036_s0 + $0x78] sm:$0xff]  ;;  %v8451_v52 = vld [vmem:[#allocation58_spill] sm:$0xff]  ;;  %v8454_v26 = vld [vmem:[#allocation69_spill] sm:$0xff] }
 0x518   :  { %v530_v56 = vmul.f32 %v3726_v34, %v6681_v37  ;;  %v462_v16 = vmul.f32 %v3727_v31, %v6688_v32  ;;  %v943_v46 = vsel %vm157_vm0, %v3732_v9, %v8451_v52  ;;  %v738_v63 = vsel %vm542_vm7, %v736_v21, %v8453_v58  ;;  %v8456_v36 = vld [vmem:[#allocation85_spill] sm:$0xff] }
 0x519   :  { %v332_v34 = vadd.f32 %v328_v42, %v194_v29  ;;  %v947_v30 = vsel %vm162_vm1, %v943_v46, %v8454_v26  ;;  %v1077_v9 = vsel %vm157_vm0, %v8457_v4, %v8456_v36  ;;  %v769_v29 = vrot.slane %v754_v27, 2  ;;  %v8459_v4 = vld [vmem:[#allocation95_spill] sm:$0xff]  ;;  %v8460_v27 = vld [vmem:[#allocation65_spill] sm:$0xff] }
 0x51a   :  { %2481 = vrot.lane.b32.xlu1 %v6125_v1, %s8235_s14  ;;  %v951_v62 = vsel %vm167_vm2, %v947_v30, %v8455_v50  ;;  %v747_v46 = vadd.f32 %v738_v63, %v653_v11  ;;  %v543_v58 = vrot.slane %v530_v56, 1  ;;  %v801_v26 = vrot.slane %v787_v3, 2  ;;  %v8458_v50 = vld [vmem:[#allocation103_spill] sm:$0xff]  ;;  %v8462_v3 = vld [vmem:[#allocation104_spill] sm:$0xff] }
 0x51b   :  { %2485 = vrot.lane.b32.xlu2 %v6130_v15, %s8235_s14  ;;  %2727 = vrot.lane.b32.xlu0 %v6046_v23, %s8229_s17  ;;  %v466_v30 = vadd.f32 %v462_v16, %v332_v34  ;;  %v1211_v36 = vsel %vm157_vm0, %v8459_v4, %v8458_v50  ;;  %v955_v11 = vsel %vm172_vm3, %v951_v62, %v8460_v27  ;;  %v8463_v34 = vld [vmem:[#allocation61_spill] sm:$0xff]  ;;  %v8467_v27 = vld [vmem:[#allocation82_spill] sm:$0xff] }
 0x51c   :  { %v2468_v33 = vpop.permute.xlu1 %2467  ;;  %v1215_v16 = vsel %vm162_vm1, %v1211_v36, %v8462_v3  ;;  %v8464_v63 = vrot.slane %v8463_v34, 2  ;;  %v8471_v3 = vld [vmem:[#allocation73_spill] sm:$0xff] }
 0x51d   :  { %v2446_v31 = vpop.permute.xlu2 %2445  ;;  %v6732_v52 = vsel %vm182_vm5, %v6558_v7, %v2468_v33  ;;  %v2438_v21 = vpop.permute.xlu0 %2437  ;;  %v6748_v7 = vld [vmem:[%s8038_s2 + $0x8] ss:$0 sm:$0xff]  ;;  %v8472_v34 = vrot.slane %v8471_v3, 1 }
 0x51e   :  { %v6736_v42 = vsel %vm172_vm3, %v6513_v25, %v2446_v31  ;;  %v6740_v8 = vsel %vm167_vm2, %v6468_v44, %v2438_v21  ;;  %v819_v25 = vmul.f32 %v6748_v7, %v6590_v13  ;;  %v8461_v44 = vld [vmem:[#allocation62_spill] sm:$0xff]  ;;  %v771_v33 = vsel %vm763_vm8, %v769_v29, %v8464_v63 }
 0x51f   :  { %v1081_v56 = vsel %vm162_vm1, %v1077_v9, %v8461_v44  ;;  %v625_v31 = vmul.f32 %v6631_v39, %v6663_v6  ;;  %v8465_v21 = vld [vmem:[#allocation78_spill] sm:$0xff]  ;;  %v780_v62 = vadd.f32 %v771_v33, %v747_v46  ;;  %v8468_v44 = vld [vmem:[#allocation91_spill] sm:$0xff]  ;;  %v8469_v39 = vld [vmem:[#allocation57_spill] sm:$0xff]  ;;  %v545_v46 = vsel %vm542_vm7, %v543_v58, %v8472_v34 }
 0x520   :  { %v959_v50 = vsel %vm177_vm4, %v955_v11, %v8465_v21  ;;  %v8466_v13 = vld [vmem:[#allocation90_spill] sm:$0xff]  ;;  %v8470_v29 = vrot.slane %v8469_v39, 2  ;;  %v557_v33 = vadd.f32 %v545_v46, %v466_v30  ;;  %v719_v21 = vmul.f32 %v6657_v19, %v6688_v32  ;;  %v8476_v58 = vld [vmem:[#allocation89_spill] sm:$0xff]  ;;  %v8478_v34 = vld [vmem:[#allocation96_spill] sm:$0xff] }
 0x521   :  { %v1085_v4 = vsel %vm167_vm2, %v1081_v56, %v8466_v13  ;;  %v963_v9 = vsel %vm182_vm5, %v959_v50, %v8467_v27  ;;  %v8473_v56 = vld [vmem:[#allocation102_spill] sm:$0xff]  ;;  %v833_v50 = vrot.slane %v819_v25, 2  ;;  %v8474_v13 = vld [vmem:[#allocation109_spill] sm:$0xff]  ;;  %v637_v25 = vrot.slane %v625_v31, 1 }
 0x522   :  { %v1089_v36 = vsel %vm172_vm3, %v1085_v4, %v8468_v44  ;;  %2595 = vrot.lane.b32.xlu1 %v6130_v15, %s8250_s26  ;;  %v803_v11 = vsel %vm763_vm8, %v801_v26, %v8470_v29  ;;  %v1219_v63 = vsel %vm167_vm2, %v1215_v16, %v8473_v56  ;;  %v8475_v44 = vld [vmem:[#allocation75_spill] sm:$0xff]  ;;  %v8477_v29 = vld [vmem:[#allocation110_spill] sm:$0xff]  ;;  %v731_v31 = vrot.slane %v719_v21, 1 }
 0x523   :  { %2701 = vrot.lane.b32.xlu2 %v6125_v1, %s8225_s10  ;;  %2591 = vrot.lane.b32.xlu0 %v6125_v1, %s8250_s26  ;;  %v1223_v4 = vsel %vm172_vm3, %v1219_v63, %v8474_v13  ;;  %v6791_v39 = vsel %vm187_vm6, %v963_v9, %v8475_v44  ;;  %v1093_v16 = vsel %vm177_vm4, %v1089_v36, %v8476_v58  ;;  %v8479_v63 = vld [vmem:[#allocation98_spill] sm:$0xff] }
 0x524   :  { %v2536_v27 = vpop.permute.xlu1 %2535  ;;  %v1227_v3 = vsel %vm177_vm4, %v1223_v4, %v8477_v29  ;;  %v1097_v46 = vsel %vm182_vm5, %v1093_v16, %v8478_v34  ;;  %v812_v56 = vadd.f32 %v803_v11, %v780_v62  ;;  %v751_v36 = vmul.f32 %v6696_v41, %v6681_v37  ;;  %v8480_v4 = vld [vmem:[#allocation76_spill] sm:$0xff]  ;;  %v6819_v62 = vld [vmem:[%s8038_s2 + $0x9] ss:$0 sm:$0xff]  ;;  %v8483_v44 = vld [vmem:[#allocation66_spill] sm:$0xff] }
 0x525   :  { %v2484_v26 = vpop.permute.xlu2 %2483  ;;  %v2532_v19 = vpop.permute.xlu0 %2531  ;;  %v6811_v13 = vsel %vm187_vm6, %v1097_v46, %v8479_v63  ;;  %v8482_v11 = vld [vmem:[#allocation108_spill] sm:$0xff]  ;;  %v8484_v58 = vrot.slane %v8483_v44, 2  ;;  %v8485_v29 = vld [vmem:[#allocation114_spill] sm:$0xff] }
 0x526   :  { %v6799_v30 = vsel %vm187_vm6, %v6555_v40, %v2484_v26  ;;  %v6805_v9 = vsel %vm157_vm0, %v2532_v19, %v6600_v59  ;;  %v8481_v40 = vrot.slane %v8480_v4, 1  ;;  %v973_v59 = vmul.f32 %v6819_v62, %v6791_v39  ;;  %v6853_v4 = vld [vmem:[%s8038_s2 + $0xb] ss:$0 sm:$0xff] }
 0x527   :  { %v1231_v37 = vsel %vm182_vm5, %v1227_v3, %v8482_v11  ;;  %v835_v16 = vsel %vm763_vm8, %v833_v50, %v8484_v58  ;;  %v784_v50 = vmul.f32 %v6708_v18, %v6663_v6  ;;  %v8486_v3 = vld [vmem:[#allocation77_spill] sm:$0xff]  ;;  %v3737_v6 = vld [vmem:[%s8036_s0 + $0x18] sm:$0xff] }
 0x528   :  { %v639_v26 = vsel %vm542_vm7, %v637_v25, %v8481_v40  ;;  %v6830_v19 = vsel %vm187_vm6, %v1231_v37, %v8485_v29  ;;  %v844_v21 = vadd.f32 %v835_v16, %v812_v56  ;;  %v6835_v25 = vld [vmem:[%s8038_s2 + $0xa] ss:$0 sm:$0xff]  ;;  %v8487_v46 = vrot.slane %v8486_v3, 1  ;;  %v8488_v18 = vld [vmem:[#allocation63_spill] sm:$0xff] }
 0x529   :  { %v651_v41 = vadd.f32 %v639_v26, %v557_v33  ;;  %v1107_v34 = vmul.f32 %v6835_v25, %v6811_v13  ;;  %v764_v33 = vrot.slane %v751_v36, 2  ;;  %v1241_v40 = vmul.f32 %v6853_v4, %v6830_v19 }
 0x52a   :  { %2735 = vrot.lane.b32.xlu1 %v6027_v35, %s8230_s18  ;;  %v733_v56 = vsel %vm542_vm7, %v731_v31, %v8487_v46  ;;  %v977_v63 = vadd.f32 %v973_v59, %v844_v21  ;;  %v941_v37 = vsel %vm157_vm0, %v3737_v6, %v8488_v18  ;;  %v6865_v31 = vld [vmem:[%s8038_s2 + $0xc] ss:$0 sm:$0xff]  ;;  %v6882_v46 = vld [vmem:[%s8038_s2 + $0xd] ss:$0 sm:$0xff] }
 0x52b   :  { %2739 = vrot.lane.b32.xlu2 %v6046_v23, %s8230_s18  ;;  %2705 = vrot.lane.b32.xlu0 %v6130_v15, %s8225_s10  ;;  %v745_v11 = vadd.f32 %v733_v56, %v651_v41  ;;  %v1310_v59 = vmul.f32 %v6865_v31, %v6791_v39  ;;  %v8489_v41 = vld [vmem:[#allocation64_spill] sm:$0xff]  ;;  %v1404_v56 = vmul.f32 %v6882_v46, %v6811_v13 }
 0x52c   :  { %v2578_v36 = vpop.permute.xlu1 %2577  ;;  %v945_v16 = vsel %vm162_vm1, %v941_v37, %v8489_v41  ;;  %v1111_v29 = vadd.f32 %v1107_v34, %v977_v63  ;;  %v8492_v34 = vld [vmem:[#allocation60_spill] sm:$0xff]  ;;  %v796_v37 = vrot.slane %v784_v50, 2  ;;  %v8496_v50 = vrot.slane %v5638_v57, 1 }
 0x52d   :  { %v2590_v26 = vpop.permute.xlu2 %2589  ;;  %v2637_v44 = vsel %vm172_vm3, %v6489_v61, %v2578_v36  ;;  %v2548_v58 = vpop.permute.xlu0 %2547  ;;  %v8490_v36 = vld [vmem:[#allocation80_spill] sm:$0xff]  ;;  %v949_v63 = vsel %vm167_vm2, %v945_v16, %v8492_v34  ;;  %v1418_v16 = vrot.slane %v1404_v56, 1 }
 0x52e   :  { %v6874_v21 = vsel %vm177_vm4, %v2637_v44, %v2590_v26  ;;  %v6877_v3 = vsel %vm157_vm0, %v2536_v27, %v2548_v58  ;;  %v1245_v61 = vadd.f32 %v1241_v40, %v1111_v29  ;;  %v8491_v6 = vrot.slane %v8490_v36, 2  ;;  %v8493_v44 = vld [vmem:[#allocation72_spill] sm:$0xff]  ;;  %v8494_v40 = vld [vmem:[#allocation83_spill] sm:$0xff] }
 0x52f   :  { %v1324_v26 = vrot.slane %v1310_v59, 1  ;;  %v816_v27 = vmul.f32 %v6748_v7, %v6688_v32  ;;  %v953_v58 = vsel %vm172_vm3, %v949_v63, %v8493_v44  ;;  %v6908_v32 = vld [vmem:[%s8038_s2 + $0xe] ss:$0 sm:$0xff]  ;;  %v8499_v63 = vld [vmem:[#allocation81_spill] sm:$0xff] }
 0x530   :  { %v766_v18 = vsel %vm763_vm8, %v764_v33, %v8491_v6  ;;  %v8495_v33 = vld [vmem:[#allocation67_spill] sm:$0xff]  ;;  %v1498_v7 = vmul.f32 %v6908_v32, %v6830_v19 }
 0x531   :  { %v778_v41 = vadd.f32 %v766_v18, %v745_v11  ;;  %v1075_v29 = vsel %vm157_vm0, %v8495_v33, %v8494_v40  ;;  %v1326_v59 = vsel %vm542_vm7, %v1324_v26, %v8496_v50  ;;  %v8497_v11 = vld [vmem:[#allocation74_spill] sm:$0xff]  ;;  %v8498_v6 = vld [vmem:[#allocation87_spill] sm:$0xff]  ;;  %v8500_v26 = vrot.slane %v8499_v63, 2  ;;  %v8501_v40 = vld [vmem:[#allocation88_spill] sm:$0xff] }
 0x532   :  { %2607 = vrot.lane.b32.xlu1 %v6130_v15, %s8254_s25  ;;  %v957_v36 = vsel %vm177_vm4, %v953_v58, %v8497_v11  ;;  %v1079_v56 = vsel %vm162_vm1, %v1075_v29, %v8498_v6  ;;  %v1335_v57 = vadd.f32 %v1326_v59, %v1245_v61  ;;  %v8502_v50 = vld [vmem:[#allocation101_spill] sm:$0xff]  ;;  %v828_v48 = vrot.slane %v816_v27, 2  ;;  %v6931_v61 = vld [vmem:[%s8038_s2 + $0xf] ss:$0 sm:$0xff]  ;;  %v8504_v6 = vld [vmem:[#allocation71_spill] sm:$0xff] }
 0x533   :  { %2713 = vrot.lane.b32.xlu2 %v6125_v1, %s8227_s16  ;;  %2603 = vrot.lane.b32.xlu0 %v6125_v1, %s8254_s25  ;;  %v798_v44 = vsel %vm763_vm8, %v796_v37, %v8500_v26  ;;  %v1083_v33 = vsel %vm167_vm2, %v1079_v56, %v8501_v40  ;;  %v1209_v17 = vsel %vm157_vm0, %v8503_v60, %v8502_v50  ;;  %v8505_v27 = vld [vmem:[#allocation97_spill] sm:$0xff]  ;;  %v1512_v63 = vrot.slane %v1498_v7, 1  ;;  %v8507_v26 = vld [vmem:[#allocation68_spill] sm:$0xff]  ;;  %v8509_v50 = vld [vmem:[#allocation99_spill] sm:$0xff] }
 0x534   :  { %v2692_v18 = vpop.permute.xlu1 %2691  ;;  %v1530_v37 = vmul.f32 %v6931_v61, %v6791_v39  ;;  %v810_v60 = vadd.f32 %v798_v44, %v778_v41  ;;  %v8506_v56 = vrot.slane %v8505_v27, 1  ;;  %v8508_v39 = vld [vmem:[#allocation86_spill] sm:$0xff]  ;;  %v8510_v41 = vld [vmem:[#allocation93_spill] sm:$0xff] }
 0x535   :  { %v2704_v34 = vpop.permute.xlu2 %2703  ;;  %v2765_v58 = vsel %vm162_vm1, %v6667_v12, %v2692_v18  ;;  %v2688_v11 = vpop.permute.xlu0 %2687  ;;  %v961_v12 = vsel %vm182_vm5, %v957_v36, %v8504_v6  ;;  %v6960_v36 = vld [vmem:[%s8038_s2 + $0x10] ss:$0 sm:$0xff] }
 0x536   :  { %v6936_v29 = vsel %vm167_vm2, %v2765_v58, %v2704_v34  ;;  %v6940_v59 = vsel %vm162_vm1, %v6677_v51, %v2688_v11  ;;  %v1420_v18 = vsel %vm542_vm7, %v1418_v16, %v8506_v56  ;;  %v6949_v40 = vsel %vm187_vm6, %v961_v12, %v8507_v26  ;;  %v8511_v7 = vld [vmem:[#allocation106_spill] sm:$0xff]  ;;  %v8514_v56 = vld [vmem:[#allocation107_spill] sm:$0xff] }
 0x537   :  { %v1087_v34 = vsel %vm172_vm3, %v1083_v33, %v8508_v39  ;;  %v1213_v51 = vsel %vm162_vm1, %v1209_v17, %v8509_v50  ;;  %v1429_v58 = vadd.f32 %v1420_v18, %v1335_v57  ;;  %v1562_v16 = vmul.f32 %v6960_v36, %v6811_v13  ;;  %v3743_v33 = vld [vmem:[%s8036_s0 + $0x90] sm:$0xff]  ;;  %v8512_v17 = vld [vmem:[#allocation116_spill] sm:$0xff] }
 0x538   :  { %v1091_v44 = vsel %vm177_vm4, %v1087_v34, %v8510_v41  ;;  %v1217_v11 = vsel %vm167_vm2, %v1213_v51, %v8511_v7  ;;  %v1718_v57 = vsel %vm157_vm0, %v3743_v33, %v8512_v17  ;;  %v1544_v6 = vrot.slane %v1530_v37, 2  ;;  %v8513_v12 = vld [vmem:[#allocation94_spill] sm:$0xff]  ;;  %v8515_v26 = vld [vmem:[#allocation127_spill] sm:$0xff]  ;;  %v8518_v37 = vld [vmem:[#allocation113_spill] sm:$0xff] }
 0x539   :  { %v1095_v27 = vsel %vm182_vm5, %v1091_v44, %v8513_v12  ;;  %v1221_v18 = vsel %vm172_vm3, %v1217_v11, %v8514_v56  ;;  %v1722_v13 = vsel %vm162_vm1, %v1718_v57, %v8515_v26  ;;  %v8516_v39 = vld [vmem:[#allocation59_spill] sm:$0xff]  ;;  %v8519_v51 = vrot.slane %v8518_v37, 1  ;;  %v8520_v44 = vld [vmem:[#allocation128_spill] sm:$0xff]  ;;  %v8521_v11 = vld [vmem:[#allocation142_spill] sm:$0xff] }
 0x53a   :  { %2747 = vrot.lane.b32.xlu1 %v6027_v35, %s8294_s4  ;;  %v8517_v34 = vrot.slane %v8516_v39, 2  ;;  %v1726_v7 = vsel %vm167_vm2, %v1722_v13, %v8520_v44  ;;  %v8522_v33 = vld [vmem:[#allocation141_spill] sm:$0xff]  ;;  %v8523_v57 = vld [vmem:[#allocation119_spill] sm:$0xff]  ;;  %v8525_v39 = vld [vmem:[#allocation92_spill] sm:$0xff] }
 0x53b   :  { %2751 = vrot.lane.b32.xlu2 %v6046_v23, %s8294_s4  ;;  %v1514_v41 = vsel %vm542_vm7, %v1512_v63, %v8519_v51  ;;  %v1852_v17 = vsel %vm157_vm0, %v8522_v33, %v8521_v11  ;;  %2717 = vrot.lane.b32.xlu0 %v6130_v15, %s8227_s16  ;;  %v971_v23 = vmul.f32 %v6819_v62, %v6949_v40  ;;  %v8526_v37 = vld [vmem:[#allocation105_spill] sm:$0xff]  ;;  %v8531_v33 = vld [vmem:[#allocation147_spill] sm:$0xff] }
 0x53c   :  { %v830_v50 = vsel %vm763_vm8, %v828_v48, %v8517_v34  ;;  %v8524_v48 = vrot.slane %v8523_v57, 2  ;;  %v1523_v56 = vadd.f32 %v1514_v41, %v1429_v58  ;;  %v2480_v63 = vpop.permute.xlu1 %2479  ;;  %v7001_v13 = vsel %vm187_vm6, %v1095_v27, %v8525_v39  ;;  %v8529_v41 = vld [vmem:[#allocation120_spill] sm:$0xff]  ;;  %v7022_v27 = vld [vmem:[%s8038_s2 + $0x11] ss:$0 sm:$0xff]  ;;  %v8534_v39 = vld [vmem:[#allocation139_spill] sm:$0xff] }
 0x53d   :  { %v842_v35 = vadd.f32 %v830_v50, %v810_v60  ;;  %v2568_v26 = vpop.permute.xlu2 %2567  ;;  %v1576_v34 = vrot.slane %v1562_v16, 2  ;;  %v1225_v51 = vsel %vm177_vm4, %v1221_v18, %v8526_v37  ;;  %v7007_v15 = vsel %vm187_vm6, %v6732_v52, %v2480_v63  ;;  %v2450_v62 = vpop.permute.xlu0 %2449  ;;  %v8527_v60 = vld [vmem:[#allocation111_spill] sm:$0xff]  ;;  %v8530_v18 = vld [vmem:[#allocation136_spill] sm:$0xff] }
 0x53e   :  { %v1546_v12 = vsel %vm763_vm8, %v1544_v6, %v8524_v48  ;;  %v1229_v50 = vsel %vm182_vm5, %v1225_v51, %v8527_v60  ;;  %v8528_v6 = vld [vmem:[#allocation123_spill] sm:$0xff]  ;;  %v1856_v44 = vsel %vm162_vm1, %v1852_v17, %v8529_v41  ;;  %v7017_v16 = vsel %vm172_vm3, %v6740_v8, %v2450_v62  ;;  %v8532_v57 = vld [vmem:[#allocation160_spill] sm:$0xff]  ;;  %v8536_v62 = vld [vmem:[#allocation161_spill] sm:$0xff] }
 0x53f   :  { %v1730_v58 = vsel %vm172_vm3, %v1726_v7, %v8528_v6  ;;  %v1594_v52 = vmul.f32 %v7022_v27, %v6830_v19  ;;  %v1860_v7 = vsel %vm167_vm2, %v1856_v44, %v8531_v33  ;;  %v8533_v17 = vld [vmem:[#allocation152_spill] sm:$0xff]  ;;  %v7036_v8 = vld [vmem:[%s8036_s0 + $0xb8] sm:$0x3]  ;;  %v1555_v63 = vadd.f32 %v1546_v12, %v1523_v56 }
 0x540   :  { %v1734_v11 = vsel %vm177_vm4, %v1730_v58, %v8530_v18  ;;  %v1986_v48 = vsel %vm157_vm0, %v8533_v17, %v8532_v57  ;;  %v8535_v19 = vld [vmem:[#allocation148_spill] sm:$0xff]  ;;  %v7047_v6 = vld [vmem:[%s8036_s0 + $0x58] sm:$0x3]  ;;  %v1307_v58 = vmul.f32 %v6865_v31, %v6949_v40  ;;  %v975_v56 = vadd.f32 %v971_v23, %v842_v35  ;;  %v8540_v31 = vld [vmem:[#allocation133_spill] sm:$0xff] }
 0x541   :  { %v1738_v37 = vsel %vm182_vm5, %v1734_v11, %v8534_v39  ;;  %v1864_v51 = vsel %vm172_vm3, %v1860_v7, %v8535_v19  ;;  %v1990_v60 = vsel %vm162_vm1, %v1986_v48, %v8536_v62  ;;  %v8537_v41 = vld [vmem:[#allocation112_spill] sm:$0xff]  ;;  %v1105_v44 = vmul.f32 %v6835_v25, %v7001_v13  ;;  %v8538_v18 = vld [vmem:[#allocation115_spill] sm:$0xff]  ;;  %v8542_v23 = vld [vmem:[#allocation158_spill] sm:$0xff] }
 0x542   :  { %v7053_v12 = vsel %vm187_vm6, %v1229_v50, %v8537_v41  ;;  %v8539_v11 = vrot.slane %v8538_v18, 2  ;;  %2801 = vrot.lane.b32.xlu1 %v7036_v8, %s8297_s12  ;;  %v1608_v7 = vrot.slane %v1594_v52, 2  ;;  %v7066_v57 = vsel %vm187_vm6, %v1738_v37, %v8540_v31  ;;  %v8541_v50 = vld [vmem:[#allocation146_spill] sm:$0xff]  ;;  %v8543_v17 = vld [vmem:[#allocation153_spill] sm:$0xff]  ;;  %v8544_v48 = vld [vmem:[#allocation164_spill] sm:$0xff] }
 0x543   :  { %2615 = vrot.lane.b32.xlu2 %v6125_v1, %s8219_s21  ;;  %v1868_v35 = vsel %vm177_vm4, %v1864_v51, %v8541_v50  ;;  %v1994_v25 = vsel %vm167_vm2, %v1990_v60, %v8542_v23  ;;  %2799 = vrot.lane.b32.xlu0 %v7047_v6, %s8297_s12  ;;  %v1527_v51 = vmul.f32 %v6931_v61, %v6949_v40  ;;  %v8545_v62 = vld [vmem:[#allocation154_spill] sm:$0xff]  ;;  %v8547_v40 = vld [vmem:[#allocation167_spill] sm:$0xff]  ;;  %v8548_v23 = vld [vmem:[#allocation124_spill] sm:$0xff] }
 0x544   :  { %v1578_v33 = vsel %vm763_vm8, %v1576_v34, %v8539_v11  ;;  %v1239_v34 = vmul.f32 %v6853_v4, %v7053_v12  ;;  %v1872_v1 = vsel %vm182_vm5, %v1868_v35, %v8543_v17  ;;  %v1998_v39 = vsel %vm172_vm3, %v1994_v25, %v8544_v48  ;;  %v2560_v37 = vpop.permute.xlu1 %2559  ;;  %v8546_v41 = vld [vmem:[#allocation166_spill] sm:$0xff] }
 0x545   :  { %v1587_v52 = vadd.f32 %v1578_v33, %v1555_v63  ;;  %v2606_v19 = vpop.permute.xlu2 %2605  ;;  %v7084_v60 = vsel %vm187_vm6, %v1872_v1, %v8545_v62  ;;  %v2002_v18 = vsel %vm177_vm4, %v1998_v39, %v8546_v41  ;;  %v7090_v4 = vsel %vm162_vm1, %v6877_v3, %v2560_v37  ;;  %v2556_v63 = vpop.permute.xlu0 %2555  ;;  %v7095_v33 = vld [vmem:[%s8038_s2 + $0x12] ss:$0 sm:$0xff]  ;;  %v7125_v37 = vld [vmem:[%s8038_s2 + $0x14] ss:$0 sm:$0xff] }
 0x546   :  { %v1109_v11 = vadd.f32 %v1105_v44, %v975_v56  ;;  %v1748_v61 = vmul.f32 %v7095_v33, %v7066_v57  ;;  %v2006_v31 = vsel %vm182_vm5, %v2002_v18, %v8547_v40  ;;  %v2630_v50 = vsel %vm162_vm1, %v6805_v9, %v2556_v63  ;;  %v8550_v56 = vld [vmem:[#allocation168_spill] sm:$0xff]  ;;  %v7118_v9 = vld [vmem:[%s8038_s2 + $0x13] ss:$0 sm:$0xff] }
 0x547   :  { %v1319_v35 = vrot.slane %v1307_v58, 1  ;;  %v8549_v3 = vrot.slane %v8548_v23, 2  ;;  %v7108_v44 = vsel %vm187_vm6, %v2006_v31, %v8550_v56  ;;  %v7111_v17 = vsel %vm167_vm2, %v2630_v50, %v2568_v26 }
 0x548   :  { %v1401_v1 = vmul.f32 %v6882_v46, %v7001_v13  ;;  %v1243_v48 = vadd.f32 %v1239_v34, %v1109_v11  ;;  %v1882_v58 = vmul.f32 %v7118_v9, %v7084_v60  ;;  %v2016_v26 = vmul.f32 %v7125_v37, %v7108_v44  ;;  %v7132_v46 = vld [vmem:[%s8036_s0 + $0x50] sm:$0xff] }
 0x549   :  { %v1610_v25 = vsel %vm763_vm8, %v1608_v7, %v8549_v3  ;;  %v7139_v34 = vld [vmem:[%s8036_s0 + $0xb0] sm:$0xff]  ;;  %v1495_v18 = vmul.f32 %v6908_v32, %v7053_v12  ;;  %v2085_v63 = vmul.f32 %v6240_v0, %v7066_v57  ;;  %v1539_v11 = vrot.slane %v1527_v51, 2 }
 0x54a   :  { %v1619_v39 = vadd.f32 %v1610_v25, %v1587_v52  ;;  %2725 = vrot.lane.b32.xlu1 %v7132_v46, %s8229_s17  ;;  %v8551_v52 = vld [vmem:[#allocation131_spill] sm:$0xff]  ;;  %v2179_v3 = vmul.f32 %v6256_v2, %v7084_v60  ;;  %v8553_v25 = vld [vmem:[#allocation134_spill] sm:$0xff] }
 0x54b   :  { %2729 = vrot.lane.b32.xlu2 %v7139_v34, %s8229_s17  ;;  %v8552_v62 = vrot.slane %v8551_v52, 1  ;;  %2619 = vrot.lane.b32.xlu0 %v7139_v34, %s8219_s21  ;;  %v8554_v0 = vrot.slane %v8553_v25, 1 }
 0x54c   :  { %v1752_v7 = vadd.f32 %v1748_v61, %v1619_v39  ;;  %v1413_v61 = vrot.slane %v1401_v1, 1  ;;  %v2700_v50 = vpop.permute.xlu1 %2699  ;;  %v1507_v1 = vrot.slane %v1495_v18, 1  ;;  %v1559_v18 = vmul.f32 %v6960_v36, %v7001_v13  ;;  %v8562_v36 = vld [vmem:[#allocation135_spill] sm:$0xff] }
 0x54d   :  { %v1321_v41 = vsel %vm542_vm7, %v1319_v35, %v8552_v62  ;;  %v7152_v23 = vpop.permute.xlu2 %2677  ;;  %v7158_v35 = vsel %vm167_vm2, %v6940_v59, %v2700_v50  ;;  %v2594_v32 = vpop.permute.xlu0 %2593  ;;  %v8561_v50 = vld [vmem:[#allocation125_spill] sm:$0xff]  ;;  %v8563_v13 = vrot.slane %v8562_v36, 1  ;;  %v8573_v36 = vld [vmem:[#allocation132_spill] sm:$0xff] }
 0x54e   :  { %v1333_v40 = vadd.f32 %v1321_v41, %v1243_v48  ;;  %v1886_v31 = vadd.f32 %v1882_v58, %v1752_v7  ;;  %v1415_v56 = vsel %vm542_vm7, %v1413_v61, %v8554_v0  ;;  %v2643_v51 = vsel %vm177_vm4, %v6670_v10, %v2594_v32  ;;  %v8555_v7 = vld [vmem:[#allocation137_spill] sm:$0xff] }
 0x54f   :  { %v2099_v48 = vrot.slane %v2085_v63, 1  ;;  %v2273_v58 = vmul.f32 %v6295_v55, %v7108_v44  ;;  %v7168_v2 = vsel %vm182_vm5, %v2643_v51, %v2606_v19  ;;  %v8556_v59 = vrot.slane %v8555_v7, 2  ;;  %v8557_v41 = vld [vmem:[#allocation121_spill] sm:$0xff]  ;;  %v8558_v63 = vld [vmem:[#allocation122_spill] sm:$0xff] }
 0x550   :  { %v2020_v39 = vadd.f32 %v2016_v26, %v1886_v31  ;;  %v1427_v62 = vadd.f32 %v1415_v56, %v1333_v40  ;;  %v3750_v26 = vld [vmem:[%s8036_s0 + $0x30] sm:$0xff]  ;;  %v2193_v19 = vrot.slane %v2179_v3, 1  ;;  %v8559_v61 = vrot.slane %v6396_v47, 1  ;;  %v8560_v40 = vld [vmem:[#allocation140_spill] sm:$0xff]  ;;  %v8565_v56 = vld [vmem:[#allocation157_spill] sm:$0xff] }
 0x551   :  { %v1541_v52 = vsel %vm763_vm8, %v1539_v11, %v8556_v59  ;;  %v1716_v10 = vsel %vm157_vm0, %v3750_v26, %v8557_v41  ;;  %v1591_v11 = vmul.f32 %v7022_v27, %v7053_v12  ;;  %v1850_v32 = vsel %vm157_vm0, %v8561_v50, %v8560_v40  ;;  %v8564_v3 = vld [vmem:[#allocation144_spill] sm:$0xff]  ;;  %v8568_v26 = vld [vmem:[#allocation145_spill] sm:$0xff]  ;;  %v8572_v50 = vld [vmem:[#allocation155_spill] sm:$0xff] }
 0x552   :  { %v1720_v55 = vsel %vm162_vm1, %v1716_v10, %v8558_v63  ;;  %v2101_v31 = vsel %vm542_vm7, %v2099_v48, %v8559_v61  ;;  %2807 = vrot.lane.b32.xlu1 %v7036_v8, %s8299_s13  ;;  %v1509_v47 = vsel %vm542_vm7, %v1507_v1, %v8563_v13  ;;  %v1854_v0 = vsel %vm162_vm1, %v1850_v32, %v8564_v3  ;;  %v8566_v27 = vld [vmem:[#allocation156_spill] sm:$0xff]  ;;  %v8567_v48 = vld [vmem:[#allocation118_spill] sm:$0xff]  ;;  %v8574_v13 = vld [vmem:[#allocation163_spill] sm:$0xff] }
 0x553   :  { %v2110_v25 = vadd.f32 %v2101_v31, %v2020_v39  ;;  %2737 = vrot.lane.b32.xlu2 %v7132_v46, %s8230_s18  ;;  %v1984_v12 = vsel %vm157_vm0, %v8566_v27, %v8565_v56  ;;  %v2287_v51 = vrot.slane %v2273_v58, 1  ;;  %2805 = vrot.lane.b32.xlu0 %v7047_v6, %s8299_s13  ;;  %v1521_v39 = vadd.f32 %v1509_v47, %v1427_v62  ;;  %v8576_v27 = vld [vmem:[#allocation165_spill] sm:$0xff]  ;;  %s8606_s13 = sld [smem:[#allocation177_spill]] }
 0x554   :  { %v1724_v7 = vsel %vm167_vm2, %v1720_v55, %v8567_v48  ;;  %v2305_v59 = vmul.f32 %v6281_v5, %v7066_v57  ;;  %v1858_v1 = vsel %vm167_vm2, %v1854_v0, %v8568_v26  ;;  %v2462_v41 = vpop.permute.xlu1 %2461  ;;  %v8569_v63 = vrot.slane %v6405_v43, 1  ;;  %v8571_v55 = vld [vmem:[#allocation130_spill] sm:$0xff]  ;;  %v8575_v0 = vld [vmem:[#allocation143_spill] sm:$0xff] }
 0x555   :  { %v2716_v10 = vpop.permute.xlu2 %2715  ;;  %v8570_v58 = vrot.slane %v6422_v53, 1  ;;  %v7218_v62 = vsel %vm177_vm4, %v7017_v16, %v2462_v41  ;;  %v2458_v57 = vpop.permute.xlu0 %2457  ;;  %v1728_v40 = vsel %vm172_vm3, %v1724_v7, %v8571_v55  ;;  %v1988_v43 = vsel %vm162_vm1, %v1984_v12, %v8572_v50  ;;  %v8578_v48 = vld [vmem:[#allocation138_spill] sm:$0xff]  ;;  %v8585_v50 = vld [vmem:[#allocation149_spill] sm:$0xff] }
 0x556   :  { %v2195_v61 = vsel %vm542_vm7, %v2193_v19, %v8569_v63  ;;  %v7222_v5 = vsel %vm172_vm3, %v6936_v29, %v2716_v10  ;;  %v7230_v53 = vsel %vm177_vm4, %v6736_v42, %v2458_v57  ;;  %v1571_v32 = vrot.slane %v1559_v18, 2 }
 0x557   :  { %v2289_v31 = vsel %vm542_vm7, %v2287_v51, %v8570_v58  ;;  %v2204_v19 = vadd.f32 %v2195_v61, %v2110_v25  ;;  %v1732_v16 = vsel %vm177_vm4, %v1728_v40, %v8573_v36  ;;  %v2337_v29 = vmul.f32 %v6310_v20, %v7084_v60  ;;  %v8577_v51 = vld [vmem:[#allocation150_spill] sm:$0xff]  ;;  %v8580_v60 = vld [vmem:[#allocation129_spill] sm:$0xff]  ;;  %v8584_v61 = vld [vmem:[#allocation159_spill] sm:$0xff] }
 0x558   :  { %v1992_v47 = vsel %vm167_vm2, %v1988_v43, %v8574_v13  ;;  %v1553_v3 = vadd.f32 %v1541_v52, %v1521_v39  ;;  %v1862_v56 = vsel %vm172_vm3, %v1858_v1, %v8575_v0  ;;  %v2319_v42 = vrot.slane %v2305_v59, 2  ;;  %v8581_v52 = vld [vmem:[#allocation151_spill] sm:$0xff]  ;;  %v8582_v59 = vld [vmem:[#allocation126_spill] sm:$0xff]  ;;  %v8590_v0 = vld [vmem:[#allocation169_spill] sm:$0xff] }
 0x559   :  { %v1996_v25 = vsel %vm172_vm3, %v1992_v47, %v8576_v27  ;;  %v2298_v12 = vadd.f32 %v2289_v31, %v2204_v19  ;;  %v1866_v18 = vsel %vm177_vm4, %v1862_v56, %v8577_v51  ;;  %v8579_v7 = vrot.slane %v8578_v48, 2  ;;  %v7284_v47 = vld [vmem:[%s8038_s2 + $0x1b] ss:$0 sm:$0xff] }
 0x55a   :  { %v1603_v20 = vrot.slane %v1591_v11, 2  ;;  %v1736_v41 = vsel %vm182_vm5, %v1732_v16, %v8580_v60  ;;  %v1870_v39 = vsel %vm182_vm5, %v1866_v18, %v8581_v52  ;;  %2811 = vrot.lane.b32.xlu1 %v7047_v6, %s8302_s9  ;;  %v8583_v10 = vrot.slane %v6433_v22, 2 }
 0x55b   :  { %v1573_v26 = vsel %vm763_vm8, %v1571_v32, %v8579_v7  ;;  %2813 = vrot.lane.b32.xlu2 %v7036_v8, %s8302_s9  ;;  %v1740_v1 = vsel %vm187_vm6, %v1736_v41, %v8582_v59  ;;  %v2351_v11 = vrot.slane %v2337_v29, 2  ;;  %v2000_v58 = vsel %vm177_vm4, %v1996_v25, %v8584_v61  ;;  %2741 = vrot.lane.b32.xlu0 %v7139_v34, %s8230_s18  ;;  %v8586_v29 = vld [vmem:[#allocation162_spill] sm:$0xff]  ;;  %v3752_v61 = vld [vmem:[%s8038_s2 + $0x16] ss:$0 sm:$0xff] }
 0x55c   :  { %v2321_v63 = vsel %vm763_vm8, %v2319_v42, %v8583_v10  ;;  %v1585_v31 = vadd.f32 %v1573_v26, %v1553_v3  ;;  %v2602_v55 = vpop.permute.xlu1 %2601  ;;  %v7266_v43 = vsel %vm187_vm6, %v1870_v39, %v8585_v50  ;;  %v2369_v22 = vmul.f32 %v6344_v54, %v7108_v44 }
 0x55d   :  { %v2330_v57 = vadd.f32 %v2321_v63, %v2298_v12  ;;  %v2580_v40 = vpop.permute.xlu2 %2579  ;;  %v7272_v19 = vsel %vm182_vm5, %v6874_v21, %v2602_v55  ;;  %v2572_v36 = vpop.permute.xlu0 %2571  ;;  %v1746_v16 = vmul.f32 %v7095_v33, %v1740_v1  ;;  %v2004_v13 = vsel %vm182_vm5, %v2000_v58, %v8586_v29  ;;  %v8587_v21 = vld [vmem:[#allocation117_spill] sm:$0xff] }
 0x55e   :  { %v7276_v32 = vsel %vm172_vm3, %v7111_v17, %v2580_v40  ;;  %v7288_v54 = vsel %vm167_vm2, %v7090_v4, %v2572_v36  ;;  %v8588_v44 = vrot.slane %v8587_v21, 2  ;;  %v8589_v3 = vrot.slane %v6442_v38, 2  ;;  %v3751_v4 = vld [vmem:[%s8038_s2 + $0x15] ss:$0 sm:$0xff] }
 0x55f   :  { %v2008_v56 = vsel %vm187_vm6, %v2004_v13, %v8590_v0  ;;  %v1880_v25 = vmul.f32 %v7118_v9, %v7266_v43  ;;  %v2082_v42 = vmul.f32 %v3751_v4, %v1740_v1  ;;  %v2383_v51 = vrot.slane %v2369_v22, 2  ;;  %v7313_v9 = vld [vmem:[%s8038_s2 + $0x1c] ss:$0 sm:$0xff] }
 0x560   :  { %v1605_v17 = vsel %vm763_vm8, %v1603_v20, %v8588_v44  ;;  %v2353_v33 = vsel %vm763_vm8, %v2351_v11, %v8589_v3  ;;  %v2014_v48 = vmul.f32 %v7125_v37, %v2008_v56  ;;  %v2523_v38 = vmul.f32 %v7284_v47, %v6799_v30 }
 0x561   :  { %v1617_v27 = vadd.f32 %v1605_v17, %v1585_v31  ;;  %v2362_v12 = vadd.f32 %v2353_v33, %v2330_v57  ;;  %v8591_v7 = vrot.slane %v6456_v28, 2  ;;  %v2094_v52 = vrot.slane %v2082_v42, 1 }
 0x562   :  { %2889 = vrot.lane.b32.xlu1 %v7036_v8, %s8236_s15  ;;  %v2176_v58 = vmul.f32 %v3752_v61, %v7266_v43  ;;  %v8592_v55 = vrot.slane %v6270_v45, 1  ;;  %v8593_v13 = vrot.slane %v6274_v14, 1  ;;  %v3755_v14 = vld [vmem:[%s8038_s2 + $0x19] ss:$0 sm:$0xff] }
 0x563   :  { %v1750_v18 = vadd.f32 %v1746_v16, %v1617_v27  ;;  %2893 = vrot.lane.b32.xlu2 %v7047_v6, %s8237_s23  ;;  %v2385_v26 = vsel %vm763_vm8, %v2383_v51, %v8591_v7  ;;  %2887 = vrot.lane.b32.xlu0 %v7047_v6, %s8236_s15 }
 0x564   :  { %v2394_v20 = vadd.f32 %v2385_v26, %v2362_v12  ;;  %v2670_v60 = vpop.permute.xlu1 %2669  ;;  %v2096_v40 = vsel %vm542_vm7, %v2094_v52, %v8592_v55  ;;  %v2188_v36 = vrot.slane %v2176_v58, 1  ;;  %v8596_v26 = vld [vmem:[#allocation170_spill] sm:$0xff] }
 0x565   :  { %v1884_v37 = vadd.f32 %v1880_v25, %v1750_v18  ;;  %v2618_v41 = vpop.permute.xlu2 %2617  ;;  %v2666_v59 = vpop.permute.xlu0 %2665 }
 0x566   :  { %v7322_v39 = vsel %vm187_vm6, %v7168_v2, %v2618_v41  ;;  %v2527_v63 = vadd.f32 %v2523_v38, %v2394_v20  ;;  %v7328_v11 = vsel %vm157_vm0, %v2666_v59, %v7152_v23  ;;  %v3753_v2 = vld [vmem:[%s8038_s2 + $0x17] ss:$0 sm:$0xff]  ;;  %v3754_v23 = vld [vmem:[%s8038_s2 + $0x18] ss:$0 sm:$0xff]  ;;  %v2190_v21 = vsel %vm542_vm7, %v2188_v36, %v8593_v13 }
 0x567   :  { %v2018_v10 = vadd.f32 %v2014_v48, %v1884_v37  ;;  %v2657_v28 = vmul.f32 %v7313_v9, %v7322_v39  ;;  %v2270_v31 = vmul.f32 %v3753_v2, %v2008_v56  ;;  %v2302_v22 = vmul.f32 %v3754_v23, %v1740_v1 }
 0x568   :  { %v8597_v37 = vrot.slane %v8596_v26, 2 }
 0x569   :  { %v7337_v57 = vadd.f32 %v2657_v28, %v2527_v63  ;;  %v2108_v50 = vadd.f32 %v2096_v40, %v2018_v10  ;;  %v2282_v16 = vrot.slane %v2270_v31, 1  ;;  %v2314_v0 = vrot.slane %v2302_v22, 2 }
 0x56a   :  { %2749 = vrot.lane.b32.xlu1 %v7132_v46, %s8294_s4  ;;  %v8594_v46 = vrot.slane %v6314_v24, 1  ;;  %v2334_v24 = vmul.f32 %v3755_v14, %v7266_v43  ;;  %v3756_v43 = vld [vmem:[%s8038_s2 + $0x1a] ss:$0 sm:$0xff] }
 0x56b   :  { %2753 = vrot.lane.b32.xlu2 %v7139_v34, %s8294_s4  ;;  %2895 = vrot.lane.b32.xlu0 %v7036_v8, %s8237_s23  ;;  %v2202_v1 = vadd.f32 %v2190_v21, %v2108_v50  ;;  %v2366_v18 = vmul.f32 %v3756_v43, %v2008_v56  ;;  %v8598_v56 = vld [vmem:[#allocation173_spill] sm:$0xff] }
 0x56c   :  { %v2712_v45 = vpop.permute.xlu1 %2711  ;;  %v2284_v34 = vsel %vm542_vm7, %v2282_v16, %v8594_v46  ;;  %v2346_v51 = vrot.slane %v2334_v24, 2 }
 0x56d   :  { %v2724_v29 = vpop.permute.xlu2 %2723  ;;  %v2771_v44 = vsel %vm172_vm3, %v7158_v35, %v2712_v45  ;;  %v2682_v17 = vpop.permute.xlu0 %2681  ;;  %v2296_v27 = vadd.f32 %v2284_v34, %v2202_v1  ;;  %v8595_v35 = vrot.slane %v6290_v49, 2  ;;  %v2378_v52 = vrot.slane %v2366_v18, 2 }
 0x56e   :  { %v7360_v3 = vsel %vm177_vm4, %v2771_v44, %v2724_v29  ;;  %v2762_v33 = vsel %vm157_vm0, %v2670_v60, %v2682_v17  ;;  %v2348_v20 = vsel %vm763_vm8, %v2346_v51, %v8597_v37  ;;  %v7447_v44 = vld [vmem:[%s8038_s2 + $0x1e] ss:$0 sm:$0xff] }
 0x56f   :  { %v2316_v25 = vsel %vm763_vm8, %v2314_v0, %v8595_v35  ;;  %v8601_v17 = vld [vmem:[#allocation172_spill] sm:$0xff] }
 0x570   :  { %v2328_v12 = vadd.f32 %v2316_v25, %v2296_v27 }
 0x572   :  { %2819 = vrot.lane.b32.xlu1 %v7036_v8, %s8303_s11  ;;  %v2360_v41 = vadd.f32 %v2348_v20, %v2328_v12 }
 0x573   :  { %2899 = vrot.lane.b32.xlu2 %v7047_v6, %s8239_s29  ;;  %2817 = vrot.lane.b32.xlu0 %v7047_v6, %s8303_s11 }
 0x574   :  { %v2474_v4 = vpop.permute.xlu1 %2473 }
 0x575   :  { %v2486_v42 = vpop.permute.xlu2 %2485  ;;  %v2514_v48 = vsel %vm182_vm5, %v7218_v62, %v2474_v4  ;;  %v2470_v38 = vpop.permute.xlu0 %2469  ;;  %v2521_v62 = vmul.f32 %v7284_v47, %v7007_v15 }
 0x576   :  { %v7382_v49 = vsel %vm187_vm6, %v2514_v48, %v2486_v42  ;;  %v2512_v7 = vsel %vm182_vm5, %v7230_v53, %v2470_v38  ;;  %v8599_v53 = vld [vmem:[#allocation171_spill] sm:$0xff] }
 0x577   :  { %v2524_v60 = vmul.f32 %v7284_v47, %v7382_v49  ;;  %v8600_v10 = vrot.slane %v8599_v53, 2  ;;  %v2857_v53 = vmul.f32 %v7447_v44, %v7007_v15 }
 0x579   :  { %v7392_v59 = vadd.f32 %v2524_v60, %v8598_v56  ;;  %v2380_v63 = vsel %vm763_vm8, %v2378_v52, %v8600_v10  ;;  %v7508_v52 = vld [vmem:[%s8038_s2 + $0x1f] ss:$0 sm:$0xff] }
 0x57a   :  { %2823 = vrot.lane.b32.xlu1 %v7047_v6, %s8306_s8  ;;  %v2392_v28 = vadd.f32 %v2380_v63, %v2360_v41 }
 0x57b   :  { %2825 = vrot.lane.b32.xlu2 %v7036_v8, %s8306_s8  ;;  %2901 = vrot.lane.b32.xlu0 %v7036_v8, %s8239_s29 }
 0x57c   :  { %v2614_v61 = vpop.permute.xlu1 %2613  ;;  %v2525_v55 = vadd.f32 %v2521_v62, %v2392_v28 }
 0x57d   :  { %v2702_v58 = vpop.permute.xlu2 %2701  ;;  %v7407_v2 = vsel %vm187_vm6, %v7272_v19, %v2614_v61  ;;  %v2584_v31 = vpop.permute.xlu0 %2583 }
 0x57e   :  { %v2655_v40 = vmul.f32 %v7313_v9, %v7407_v2  ;;  %v2640_v50 = vsel %vm172_vm3, %v7288_v54, %v2584_v31 }
 0x580   :  { %v7413_v23 = vadd.f32 %v2655_v40, %v2525_v55 }
 0x582   :  { %2907 = vrot.lane.b32.xlu1 %v7036_v8, %s8241_s30 }
 0x583   :  { %2981 = vrot.lane.b32.xlu2 %v7047_v6, %s8220_s24  ;;  %2905 = vrot.lane.b32.xlu0 %v7047_v6, %s8241_s30 }
 0x584   :  { %v2694_v19 = vpop.permute.xlu1 %2693 }
 0x585   :  { %v2740_v22 = vpop.permute.xlu2 %2739  ;;  %v7422_v36 = vsel %vm162_vm1, %v2762_v33, %v2694_v19  ;;  %v2690_v16 = vpop.permute.xlu0 %2689  ;;  %v7452_v33 = vmul.f32 %v7447_v44, %v7382_v49  ;;  %v2869_v19 = vrot.slane %v2857_v53, 1  ;;  %v3211_v53 = vld [vmem:[#allocation3 + $0x68] sm:$0xff] }
 0x586   :  { %v2764_v54 = vsel %vm162_vm1, %v7328_v11, %v2690_v16 }
 0x587   :  { %v7427_v45 = vsel %vm167_vm2, %v2764_v54, %v2702_v58  ;;  %v2875_v24 = vrot.slane %v7452_v33, 1  ;;  %v2951_v58 = vmul.f32 %v7508_v52, %v7407_v2  ;;  %v3392_v33 = vld [vmem:[#allocation3 + $0x1f8] sm:$0xff] }
 0x588   :  { %3397 = vmatpush.msra.mxu3 %v3392_v33 }
 0x589   :  { %v2963_v16 = vrot.slane %v2951_v58, 1 }
 0x58a   :  { %2987 = vrot.lane.b32.xlu1 %v7047_v6, %s8222_s19 }
 0x58b   :  { %2989 = vrot.lane.b32.xlu2 %v7036_v8, %s8222_s19  ;;  %2983 = vrot.lane.b32.xlu0 %v7036_v8, %s8220_s24  ;;  %s8608_s24 = sld [smem:[#allocation180_spill]] }
 0x58c   :  { %v2482_v29 = vpop.permute.xlu1 %2481 }
 0x58d   :  { %v7435_v13 = vpop.permute.xlu2 %2713  ;;  %v7438_v21 = vsel %vm187_vm6, %v2512_v7, %v2482_v29  ;;  %v2728_v46 = vpop.permute.xlu0 %2727 }
 0x58e   :  { %v2522_v11 = vmul.f32 %v7284_v47, %v7438_v21  ;;  %v2777_v34 = vsel %vm177_vm4, %v7222_v5, %v2728_v46  ;;  %v7461_v5 = vld [vmem:[%s8038_s2 + $0x1d] ss:$0 sm:$0xff]  ;;  %v2860_v47 = vmul.f32 %v7447_v44, %v6799_v30  ;;  %v7512_v56 = vmul.f32 %v7447_v44, %v7438_v21 }
 0x58f   :  { %v2781_v14 = vsel %vm182_vm5, %v2777_v34, %v2740_v22 }
 0x590   :  { %v2526_v1 = vadd.f32 %v2522_v11, %v8601_v17  ;;  %v2874_v51 = vrot.slane %v2860_v47, 1  ;;  %v2870_v31 = vrot.slane %v7512_v56, 1 }
 0x592   :  { %2831 = vrot.lane.b32.xlu1 %v7036_v8, %s8234_s28  ;;  %v2876_v18 = vsel %vm542_vm7, %v2874_v51, %v2875_v24  ;;  %v2871_v54 = vsel %vm542_vm7, %v2869_v19, %v2870_v31  ;;  %v3213_v51 = vld [vmem:[#allocation3 + $0x78] sm:$0xff]  ;;  %v3248_v19 = vld [vmem:[#allocation3 + $0xe8] sm:$0xff] }
 0x593   :  { %2911 = vrot.lane.b32.xlu2 %v7047_v6, %s8243_s27  ;;  %2829 = vrot.lane.b32.xlu0 %v7047_v6, %s8234_s28 }
 0x594   :  { %v2596_v0 = vpop.permute.xlu1 %2595  ;;  %3280 = vmatpush.msra.mxu1 %v3213_v51 }
 0x595   :  { %v2752_v27 = vpop.permute.xlu2 %2751  ;;  %v2644_v35 = vsel %vm177_vm4, %v2640_v50, %v2596_v0  ;;  %v2592_v12 = vpop.permute.xlu0 %2591  ;;  %v2954_v0 = vmul.f32 %v7508_v52, %v7322_v39 }
 0x596   :  { %v7471_v25 = vsel %vm187_vm6, %v2781_v14, %v2752_v27  ;;  %v2642_v42 = vsel %vm177_vm4, %v7276_v32, %v2592_v12 }
 0x597   :  { %v2791_v4 = vmul.f32 %v7461_v5, %v7471_v25 }
 0x599   :  { %v2795_v43 = vadd.f32 %v2791_v4, %v7337_v57 }
 0x59a   :  { %2993 = vrot.lane.b32.xlu1 %v7047_v6, %s8224_s22 }
 0x59b   :  { %v7481_v48 = vadd.f32 %v2876_v18, %v2795_v43  ;;  %2995 = vrot.lane.b32.xlu2 %v7036_v8, %s8224_s22  ;;  %2913 = vrot.lane.b32.xlu0 %v7036_v8, %s8243_s27  ;;  %v2968_v43 = vrot.slane %v2954_v0, 1  ;;  %s8609_s22 = sld [smem:[#allocation181_spill]] }
 0x59c   :  { %v2736_v38 = vpop.permute.xlu1 %2735 }
 0x59d   :  { %v2616_v32 = vpop.permute.xlu2 %2615  ;;  %v7489_v7 = vpop.permute.xlu0 %2705  ;;  %v2779_v63 = vsel %vm182_vm5, %v7360_v3, %v2736_v38 }
 0x5a2   :  { %2837 = vrot.lane.b32.xlu1 %v7036_v8, %s8235_s14 }
 0x5a3   :  { %2917 = vrot.lane.b32.xlu2 %v7047_v6, %s8250_s26  ;;  %2835 = vrot.lane.b32.xlu0 %v7047_v6, %s8235_s14 }
 0x5a4   :  { %v2608_v57 = vpop.permute.xlu1 %2607 }
 0x5a5   :  { %v7497_v26 = vpop.permute.xlu2 %2729  ;;  %v2604_v37 = vpop.permute.xlu0 %2603  ;;  %v2648_v27 = vsel %vm182_vm5, %v2644_v35, %v2608_v57  ;;  %v3250_v35 = vld [vmem:[#allocation3 + $0xf8] sm:$0xff] }
 0x5a6   :  { %v2646_v20 = vsel %vm182_vm5, %v2642_v42, %v2604_v37  ;;  %3256 = vmatpush.msra.mxu0 %v3250_v35 }
 0x5a7   :  { %v7501_v60 = vsel %vm187_vm6, %v2646_v20, %v2616_v32 }
 0x5a8   :  { %v2656_v41 = vmul.f32 %v7313_v9, %v7501_v60  ;;  %v7524_v10 = vmul.f32 %v7508_v52, %v7501_v60 }
 0x5aa   :  { %2999 = vrot.lane.b32.xlu1 %v7047_v6, %s8225_s10  ;;  %v7518_v62 = vadd.f32 %v2656_v41, %v2526_v1  ;;  %v2964_v22 = vrot.slane %v7524_v10, 1  ;;  %v3249_v41 = vld [vmem:[#allocation3 + $0xf0] sm:$0xff] }
 0x5ab   :  { %3001 = vrot.lane.b32.xlu2 %v7036_v8, %s8225_s10  ;;  %2919 = vrot.lane.b32.xlu0 %v7036_v8, %s8250_s26  ;;  %s3836_s10 = smov [#allocation6]  }
 0x5ac   :  { %v2748_v28 = vpop.permute.xlu1 %2747  ;;  %v2965_v46 = vsel %vm542_vm7, %v2963_v16, %v2964_v22  ;;  %3257 = vmatpush.msra.mxu0 %v3249_v41  ;;  %v3247_v16 = vld [vmem:[#allocation3 + $0xe0] sm:$0xff] }
 0x5ad   :  { %v7530_v61 = vpop.permute.xlu2 %2737  ;;  %v7536_v55 = vsel %vm187_vm6, %v2779_v63, %v2748_v28  ;;  %v7538_v40 = vpop.permute.xlu0 %2717 }
 0x5ae   :  { %v2789_v50 = vmul.f32 %v7461_v5, %v7536_v55  ;;  %3258 = vmatpush.msra.mxu0 %v3248_v19 }
 0x5b0   :  { %v2793_v3 = vadd.f32 %v2789_v50, %v7413_v23  ;;  %3259 = vmatpush.msra.mxu0 %v3247_v16  ;;  %v3204_v16 = vld [vmem:[#allocation3 + $0x30] sm:$0xff] }
 0x5b2   :  { %v2883_v29 = vadd.f32 %v2871_v54, %v2793_v3  ;;  %2925 = vrot.lane.b32.xlu1 %v7036_v8, %s8254_s25  ;;  %v3210_v3 = vld [vmem:[#allocation3 + $0x60] sm:$0xff]  ;;  %v3209_v54 = vld [vmem:[#allocation3 + $0x58] sm:$0xff] }
 0x5b3   :  { %3005 = vrot.lane.b32.xlu2 %v7047_v6, %s8227_s16  ;;  %2923 = vrot.lane.b32.xlu0 %v7047_v6, %s8254_s25 }
 0x5b4   :  { %v7556_v23 = vadd.f32 %v2965_v46, %v2883_v29  ;;  %v2802_v11 = vpop.permute.xlu1 %2801  ;;  %v2770_v29 = vsel %vm167_vm2, %v7422_v36, %v7489_v7  ;;  %v7611_v46 = vld [vmem:[%s8038_s2 + $0x20] ss:$0 sm:$0xff]  ;;  %v7622_v36 = vld [vmem:[%s8038_s2 + $0x21] ss:$0 sm:$0xff]  ;;  %v3245_v7 = vld [vmem:[#allocation3 + $0xd0] sm:$0xff] }
 0x5b5   :  { %v2814_v34 = vpop.permute.xlu2 %2813  ;;  %v2800_v17 = vpop.permute.xlu0 %2799  ;;  %v3048_v35 = vmul.f32 %v7611_v46, %v7471_v25 }
 0x5b6   :  { %v2841_v63 = vsel %vm157_vm0, %v7047_v6, %v2800_v17  ;;  %v3208_v17 = vld [vmem:[#allocation3 + $0x50] sm:$0xff] }
 0x5ba   :  { %2929 = vrot.lane.b32.xlu1 %v7047_v6, %s8219_s21 }
 0x5bb   :  { %2931 = vrot.lane.b32.xlu2 %v7036_v8, %s8219_s21  ;;  %3007 = vrot.lane.b32.xlu0 %v7036_v8, %s8227_s16  ;;  %s8610_s16 = sld [smem:[#allocation182_spill]]  ;;  %s3612_s21 = sshll.u32 %s3836_s10, 4  ;;  %s3613_s21 = int_to_ptr.vmem [resolvable:$true] %s3612_s21 }
 0x5bc   :  { %v7564_v1 = vpop.permute.xlu1 %2725 }
 0x5bd   :  { %v7566_v47 = vpop.permute.xlu2 %2893  ;;  %v2620_v14 = vpop.permute.xlu0 %2619 }
 0x5be   :  { %v7572_v12 = vsel %vm187_vm6, %v2648_v27, %v2620_v14  ;;  %v3207_v27 = vld [vmem:[#allocation3 + $0x48] sm:$0xff]  ;;  %v7633_v14 = vmul.f32 %v7622_v36, %v7382_v49  ;;  %v3243_v49 = vld [vmem:[#allocation3 + $0xc0] sm:$0xff] }
 0x5bf   :  { %v2658_v4 = vmul.f32 %v7313_v9, %v7572_v12  ;;  %v7578_v42 = vmul.f32 %v7508_v52, %v7572_v12  ;;  %v3212_v9 = vld [vmem:[#allocation3 + $0x70] sm:$0xff] }
 0x5c0   :  { %3281 = vmatpush.msra.mxu1 %v3212_v9 }
 0x5c1   :  { %v7581_v18 = vadd.f32 %v2658_v4, %v7392_v59  ;;  %v2969_v38 = vrot.slane %v7578_v42, 1  ;;  %v2842_v59 = vsel %vm157_vm0, %v7036_v8, %v2802_v11  ;;  %v2774_v11 = vsel %vm172_vm3, %v2770_v29, %v7538_v40 }
 0x5c2   :  { %3013 = vrot.lane.b32.xlu1 %v7036_v8, %s8229_s17  ;;  %3282 = vmatpush.msra.mxu1 %v3211_v53 }
 0x5c3   :  { %3017 = vrot.lane.b32.xlu2 %v7047_v6, %s8230_s18  ;;  %v2970_v32 = vsel %vm542_vm7, %v2968_v43, %v2969_v38  ;;  %3011 = vrot.lane.b32.xlu0 %v7047_v6, %s8229_s17  ;;  %v3244_v43 = vld [vmem:[#allocation3 + $0xc8] sm:$0xff] }
 0x5c4   :  { %v7596_v57 = vadd.f32 %v2970_v32, %v7481_v48  ;;  %v2808_v37 = vpop.permute.xlu1 %2807  ;;  %3283 = vmatpush.msra.mxu1 %v3210_v3  ;;  %v3206_v32 = vld [vmem:[#allocation3 + $0x40] sm:$0xff] }
 0x5c5   :  { %v2754_v20 = vpop.permute.xlu2 %2753  ;;  %v2844_v28 = vsel %vm162_vm1, %v2842_v59, %v2808_v37  ;;  %v2806_v58 = vpop.permute.xlu0 %2805  ;;  %v3080_v37 = vmul.f32 %v7622_v36, %v6799_v30  ;;  %v3095_v30 = vrot.slane %v7633_v14, 2 }
 0x5c6   :  { %v2843_v50 = vsel %vm162_vm1, %v2841_v63, %v2806_v58  ;;  %v7603_v48 = vsel %vm167_vm2, %v2844_v28, %v2814_v34  ;;  %v3246_v34 = vld [vmem:[#allocation3 + $0xd8] sm:$0xff]  ;;  %3284 = vmatpush.msra.mxu1 %v3209_v54  ;;  %v3241_v54 = vld [vmem:[#allocation3 + $0xb0] sm:$0xff] }
 0x5c7   :  { %3260 = vmatpush.msra.mxu0 %v3246_v34  ;;  %v3242_v58 = vld [vmem:[#allocation3 + $0xb8] sm:$0xff]  ;;  %v3094_v29 = vrot.slane %v3080_v37, 2 }
 0x5c8   :  { %3285 = vmatpush.msra.mxu1 %v3208_v17  ;;  %v3203_v17 = vld [vmem:[#allocation3 + $0x28] sm:$0xff] }
 0x5c9   :  { %3261 = vmatpush.msra.mxu0 %v3245_v7 }
 0x5ca   :  { %3023 = vrot.lane.b32.xlu1 %v7047_v6, %s8294_s4  ;;  %v7629_v6 = vld [vmem:[%s8038_s2 + $0x22] ss:$0 sm:$0xff]  ;;  %3286 = vmatpush.msra.mxu1 %v3207_v27 }
 0x5cb   :  { %3025 = vrot.lane.b32.xlu2 %v7036_v8, %s8294_s4  ;;  %3019 = vrot.lane.b32.xlu0 %v7036_v8, %s8230_s18  ;;  %v2778_v8 = vsel %vm177_vm4, %v2774_v11, %v7497_v26  ;;  %v7649_v26 = vld [vmem:[%s8038_s2 + $0x23] ss:$0 sm:$0xff]  ;;  %v7653_v41 = vmul.f32 %v7629_v6, %v7572_v12  ;;  %v3112_v28 = vmul.f32 %v7629_v6, %v7322_v39  ;;  %s8602_s4 = sld [smem:[#allocation175_spill]] }
 0x5cc   :  { %v2812_v0 = vpop.permute.xlu1 %2811  ;;  %3262 = vmatpush.msra.mxu0 %v3244_v43  ;;  %3287 = vmatpush.msra.mxu1 %v3206_v32  ;;  %v3144_v39 = vmul.f32 %v7649_v26, %v7471_v25  ;;  %v3096_v25 = vsel %vm763_vm8, %v3094_v29, %v3095_v30  ;;  %s8611_s18 = sld [smem:[#allocation183_spill]] }
 0x5cd   :  { %v2900_v40 = vpop.permute.xlu2 %2899  ;;  %v7636_v4 = vsel %vm167_vm2, %v2843_v50, %v2812_v0  ;;  %v2742_v51 = vpop.permute.xlu0 %2741  ;;  %v3062_v50 = vrot.slane %v3048_v35, 1  ;;  %v3127_v11 = vrot.slane %v7653_v41, 2 }
 0x5ce   :  { %v2782_v9 = vsel %vm182_vm5, %v2778_v8, %v2742_v51  ;;  %3263 = vmatpush.msra.mxu0 %v3243_v49  ;;  %v3240_v8 = vld [vmem:[#allocation3 + $0xa8] sm:$0xff]  ;;  %v3126_v51 = vrot.slane %v3112_v28, 2  ;;  %v2772_v49 = vsel %vm172_vm3, %v7427_v45, %v7435_v13  ;;  %v3158_v37 = vrot.slane %v3144_v39, 2  ;;  %v3200_v13 = vld [vmem:[#allocation3 + $0x10] sm:$0xff] }
 0x5cf   :  { %v2786_v59 = vsel %vm187_vm6, %v2782_v9, %v2754_v20  ;;  %v3205_v20 = vld [vmem:[#allocation3 + $0x38] sm:$0xff]  ;;  %v3202_v9 = vld [vmem:[#allocation3 + $0x20] sm:$0xff] }
 0x5d0   :  { %v2792_v53 = vmul.f32 %v7461_v5, %v2786_v59  ;;  %v7657_v63 = vmul.f32 %v7611_v46, %v2786_v59  ;;  %v7667_v3 = vmul.f32 %v7649_v26, %v2786_v59  ;;  %3288 = vmatpush.msra.mxu1 %v3205_v20  ;;  %3264 = vmatpush.msra.mxu0 %v3242_v58  ;;  %v3239_v59 = vld [vmem:[#allocation3 + $0xa0] sm:$0xff]  ;;  %v3201_v20 = vld [vmem:[#allocation3 + $0x18] sm:$0xff] }
 0x5d1   :  { %v3238_v58 = vld [vmem:[#allocation3 + $0x98] sm:$0xff] }
 0x5d2   :  { %v7663_v19 = vadd.f32 %v2792_v53, %v7581_v18  ;;  %v3063_v12 = vrot.slane %v7657_v63, 1  ;;  %3289 = vmatpush.msra.mxu1 %v3204_v16  ;;  %v3159_v43 = vrot.slane %v7667_v3, 2  ;;  %3265 = vmatpush.msra.mxu0 %v3241_v54  ;;  %v3128_v53 = vsel %vm763_vm8, %v3126_v51, %v3127_v11  ;;  %v3237_v54 = vld [vmem:[#allocation3 + $0x90] sm:$0xff]  ;;  %s3614_s28 = sshll.u32 %s8611_s18, 4  ;;  %s3615_s28 = int_to_ptr.hbm [resolvable:$true] %s3614_s28 }
 0x5d3   :  { %v3077_v51 = vmul.f32 %v7622_v36, %v7007_v15  ;;  %v3235_v15 = vld [vmem:[#allocation3 + $0x80] sm:$0xff] }
 0x5d4   :  { %v3064_v18 = vsel %vm542_vm7, %v3062_v50, %v3063_v12  ;;  %v2890_v34 = vpop.permute.xlu1 %2889  ;;  %3290 = vmatpush.msra.mxu1 %v3203_v17  ;;  %3266 = vmatpush.msra.mxu0 %v3240_v8  ;;  %v3160_v45 = vsel %vm763_vm8, %v3158_v37, %v3159_v43  ;;  %v7705_v50 = vmul.f32 %v7622_v36, %v7438_v21 }
 0x5d5   :  { %v3073_v7 = vadd.f32 %v3064_v18, %v7596_v57  ;;  %v7676_v0 = vpop.permute.xlu2 %2825  ;;  %v2888_v27 = vpop.permute.xlu0 %2887  ;;  %v3199_v18 = vld [vmem:[#allocation3 + $0x8] sm:$0xff]  ;;  %v7713_v17 = vmul.f32 %v7629_v6, %v7501_v60  ;;  %v3198_v60 = vld [vmem:[#allocation3] sm:$0xff] }
 0x5d6   :  { %v2935_v35 = vsel %vm157_vm0, %v2888_v27, %v7566_v47  ;;  %v2776_v47 = vsel %vm177_vm4, %v2772_v49, %v7564_v1  ;;  %3291 = vmatpush.msra.mxu1 %v3202_v9  ;;  %3267 = vmatpush.msra.mxu0 %v3239_v59  ;;  %v3045_v1 = vmul.f32 %v7611_v46, %v7536_v55  ;;  %v3236_v27 = vld [vmem:[#allocation3 + $0x88] sm:$0xff] }
 0x5d7   :  { %v3105_v32 = vadd.f32 %v3096_v25, %v3073_v7  ;;  %v7685_v57 = vsel %vm162_vm1, %v2935_v35, %v2900_v40  ;;  %v7698_v40 = vld [vmem:[%s8602_s4] ss:$0 sm:$0xff]  ;;  %v2780_v39 = vsel %vm182_vm5, %v2776_v47, %v7530_v61  ;;  %v3109_v9 = vmul.f32 %v7629_v6, %v7407_v2 }
 0x5d8   :  { %3292 = vmatpush.msra.mxu1 %v3201_v20  ;;  %3268 = vmatpush.msra.mxu0 %v3238_v58  ;;  %v3057_v59 = vrot.slane %v3045_v1, 1  ;;  %v3122_v2 = vrot.slane %v7713_v17, 2  ;;  %v3089_v47 = vrot.slane %v3077_v51, 2 }
 0x5d9   :  { %v3137_v28 = vadd.f32 %v3128_v53, %v3105_v32  ;;  %v3090_v32 = vrot.slane %v7705_v50, 2  ;;  %v3121_v58 = vrot.slane %v3109_v9, 2 }
 0x5da   :  { %3293 = vmatpush.msra.mxu1 %v3200_v13  ;;  %3269 = vmatpush.msra.mxu0 %v3237_v54 }
 0x5db   :  { %v3169_v16 = vadd.f32 %v3160_v45, %v3137_v28  ;;  %v3141_v28 = vmul.f32 %v7649_v26, %v7536_v55  ;;  %v3091_v1 = vsel %vm763_vm8, %v3089_v47, %v3090_v32  ;;  %v3123_v55 = vsel %vm763_vm8, %v3121_v58, %v3122_v2 }
 0x5dc   :  { %v2750_v29 = vpop.permute.xlu1 %2749  ;;  %3294 = vmatpush.msra.mxu1 %v3199_v18  ;;  %3270 = vmatpush.msra.mxu0 %v3236_v27 }
 0x5dd   :  { %v2784_v7 = vsel %vm187_vm6, %v2780_v39, %v2750_v29  ;;  %v2896_v21 = vpop.permute.xlu0 %2895  ;;  %v3177_v8 = vadd.f32 %v7698_v40, %v3169_v16  ;;  %v7727_v49 = vpop.permute.xlu2 %2981 }
 0x5de   :  { %v2790_v25 = vmul.f32 %v7461_v5, %v2784_v7  ;;  %v7721_v61 = vmul.f32 %v7611_v46, %v2784_v7  ;;  %v2936_v35 = vsel %vm157_vm0, %v2890_v34, %v2896_v21  ;;  %v7734_v34 = vmul.f32 %v7649_v26, %v2784_v7  ;;  %3295 = vmatpush.msra.mxu1 %v3198_v60 }
 0x5df   :  { %v3181_v37 = vmax.f32 %v3177_v8, 0.0  ;;  %3271 = vmatpush.msra.mxu0 %v3235_v15  ;;  %v3153_v7 = vrot.slane %v3141_v28, 2 }
 0x5e0   :  { %v7730_v5 = vadd.f32 %v2790_v25, %v7518_v62  ;;  %v3058_v53 = vrot.slane %v7721_v61, 1  ;;  %v3154_v16 = vrot.slane %v7734_v34, 2 }
 0x5e1   :  { %v3217_v20 = vrot.slane %v3181_v37, 4  ;;  %v3191_v13 = vsel %vm3183_vm9, %v3181_v37, 0.0 }
 0x5e2   :  { %v3059_v62 = vsel %vm542_vm7, %v3057_v59, %v3058_v53  ;;  %v3192_v27 = vrot.slane %v3191_v13, 4  ;;  %v3155_v25 = vsel %vm763_vm8, %v3153_v7, %v3154_v16 }
 0x5e3   :  { %v3071_v45 = vadd.f32 %v3059_v62, %v7556_v23  ;;  %v3227_v23 = vsel %vm3183_vm9, %v3217_v20, 0.0 }
 0x5e4   :  { %v2820_v54 = vpop.permute.xlu1 %2819  ;;  %v3228_v60 = vrot.slane %v3227_v23, 4 }
 0x5e5   :  { %v3103_v29 = vadd.f32 %v3091_v1, %v3071_v45  ;;  %v2848_v39 = vsel %vm172_vm3, %v7603_v48, %v2820_v54  ;;  %v2818_v18 = vpop.permute.xlu0 %2817  ;;  %v7761_v59 = vpop.permute.xlu2 %2989  ;;  %v3193_v48 = vadd.f32 %v3192_v27, %v3191_v13 }
 0x5e6   :  { %v2847_v21 = vsel %vm172_vm3, %v7636_v4, %v2818_v18  ;;  %v2850_v8 = vsel %vm177_vm4, %v2848_v39, %v7676_v0  ;;  %v3229_v20 = vadd.f32 %v3228_v60, %v3227_v23 }
 0x5e7   :  { %v3135_v51 = vadd.f32 %v3123_v55, %v3103_v29  ;;  %v3194_v62 = vrot.slane %v3193_v48, 2 }
 0x5e8   :  { %v3230_v54 = vrot.slane %v3229_v20, 2 }
 0x5e9   :  { %v3167_v9 = vadd.f32 %v3155_v25, %v3135_v51  ;;  %v3195_v13 = vadd.f32 %v3194_v62, %v3193_v48 }
 0x5ea   :  { %v3231_v27 = vadd.f32 %v3230_v54, %v3229_v20 }
 0x5eb   :  { %v3175_v37 = vadd.f32 %v7698_v40, %v3167_v9  ;;  %v3196_v9 = vrot.slane %v3195_v13, 1 }
 0x5ec   :  { %v2824_v15 = vpop.permute.xlu1 %2823  ;;  %v3232_v48 = vrot.slane %v3231_v27, 1 }
 0x5ed   :  { %v2849_v4 = vsel %vm177_vm4, %v2847_v21, %v2824_v15  ;;  %v2902_v47 = vpop.permute.xlu0 %2901  ;;  %v3179_v28 = vmax.f32 %v3175_v37, 0.0  ;;  %v7768_v18 = vpop.permute.xlu2 %2911  ;;  %v3197_v62 = vadd.f32 %v3196_v9, %v3195_v13 }
 0x5ee   :  { %v2938_v0 = vsel %vm162_vm1, %v2936_v35, %v2902_v47 }
 0x5ef   :  { %v3184_v58 = vsel %vm3183_vm9, %v3179_v28, 0.0  ;;  %v3216_v45 = vrot.slane %v3179_v28, 4 }
 0x5f0   :  { %v3185_v1 = vrot.slane %v3184_v58, 4 }
 0x5f1   :  { %v3220_v55 = vsel %vm3183_vm9, %v3216_v45, 0.0 }
 0x5f2   :  { %v3186_v29 = vadd.f32 %v3185_v1, %v3184_v58  ;;  %v3221_v39 = vrot.slane %v3220_v55, 4  ;;  %v3233_v1 = vadd.f32 %v3232_v48, %v3231_v27 }
 0x5f4   :  { %v2908_v23 = vpop.permute.xlu1 %2907  ;;  %v3187_v7 = vrot.slane %v3186_v29, 2  ;;  %v3222_v21 = vadd.f32 %v3221_v39, %v3220_v55 }
 0x5f5   :  { %v2940_v51 = vsel %vm167_vm2, %v2938_v0, %v2908_v23  ;;  %v2906_v35 = vpop.permute.xlu0 %2905  ;;  %v7778_v54 = vpop.permute.xlu2 %2995 }
 0x5f6   :  { %v7773_v25 = vsel %vm167_vm2, %v7685_v57, %v2906_v35  ;;  %v3188_v60 = vadd.f32 %v3187_v7, %v3186_v29  ;;  %v3223_v37 = vrot.slane %v3222_v21, 2 }
 0x5f8   :  { %v3189_v15 = vrot.slane %v3188_v60, 1  ;;  %v3224_v47 = vadd.f32 %v3223_v37, %v3222_v21 }
 0x5fa   :  { %v3190_v28 = vadd.f32 %v3189_v15, %v3188_v60  ;;  %v3225_v58 = vrot.slane %v3224_v47, 1 }
 0x5fc   :  { %v7775_v45 = vpop.permute.xlu1 %2987  ;;  %v3278_v20 = vsel %vm3253_vm10, %v3197_v62, %v3190_v28  ;;  %v3226_v0 = vadd.f32 %v3225_v58, %v3224_v47 }
 0x5fd   :  { %v7780_v57 = vpop.permute.xlu0 %2983  ;;  %3296 = vmatmul.f32.vlgmr.msra.gmra.mxu1 %v3278_v20  ;;  %v2918_v23 = vpop.permute.xlu2 %2917 }
 0x5fe   :  { %v3254_v55 = vsel %vm3253_vm10, %v3233_v1, %v3226_v0 }
 0x5ff   :  { %3272 = vmatmul.f32.vlgmr.msra.gmra.mxu0 %v3254_v55 }
 0x604   :  { %v2832_v29 = vpop.permute.xlu1 %2831 }
 0x605   :  { %v2830_v39 = vpop.permute.xlu0 %2829  ;;  %v7785_v21 = vpop.permute.xlu2 %3001  ;;  %v2852_v35 = vsel %vm182_vm5, %v2850_v8, %v2832_v29 }
 0x606   :  { %v2851_v27 = vsel %vm182_vm5, %v2849_v4, %v2830_v39 }
 0x60c   :  { %v7783_v7 = vpop.permute.xlu1 %2993 }
 0x60d   :  { %v2914_v13 = vpop.permute.xlu0 %2913  ;;  %v7799_v58 = vpop.permute.xlu2 %3005 }
 0x60e   :  { %v2942_v29 = vsel %vm172_vm3, %v2940_v51, %v2914_v13  ;;  %v3327_v13 = vld [vmem:[#allocation3 + $0x160] sm:$0xff] }
 0x614   :  { %v2838_v60 = vpop.permute.xlu1 %2837 }
 0x615   :  { %v7790_v9 = vsel %vm187_vm6, %v2852_v35, %v2838_v60  ;;  %v2836_v37 = vpop.permute.xlu0 %2835  ;;  %v2932_v39 = vpop.permute.xlu2 %2931  ;;  %v3329_v35 = vld [vmem:[#allocation3 + $0x170] sm:$0xff] }
 0x616   :  { %v2862_v15 = vmul.f32 %v7447_v44, %v7790_v9  ;;  %v7795_v47 = vsel %vm187_vm6, %v2851_v27, %v2836_v37  ;;  %v3390_v37 = vld [vmem:[#allocation3 + $0x1e8] sm:$0xff] }
 0x617   :  { %v2859_v48 = vmul.f32 %v7447_v44, %v7795_v47  ;;  %v3330_v44 = vld [vmem:[#allocation3 + $0x178] sm:$0xff] }
 0x618   :  { %v2877_v28 = vrot.slane %v2862_v15, 1  ;;  %3335 = vmatpush.msra.mxu2 %v3330_v44  ;;  %v3388_v44 = vld [vmem:[#allocation3 + $0x1d8] sm:$0xff] }
 0x619   :  { %v2872_v62 = vrot.slane %v2859_v48, 1  ;;  %v3326_v48 = vld [vmem:[#allocation3 + $0x158] sm:$0xff] }
 0x61a   :  { %v2878_v8 = vsel %vm542_vm7, %v2875_v24, %v2877_v28  ;;  %3336 = vmatpush.msra.mxu2 %v3329_v35  ;;  %v3389_v28 = vld [vmem:[#allocation3 + $0x1e0] sm:$0xff] }
 0x61b   :  { %v2886_v4 = vadd.f32 %v2878_v8, %v7663_v19  ;;  %v2873_v20 = vsel %vm542_vm7, %v2870_v31, %v2872_v62  ;;  %v3328_v19 = vld [vmem:[#allocation3 + $0x168] sm:$0xff]  ;;  %v2941_v62 = vsel %vm172_vm3, %v7773_v25, %v7768_v18 }
 0x61c   :  { %v2884_v0 = vadd.f32 %v2873_v20, %v7730_v5  ;;  %v7809_v1 = vpop.permute.xlu1 %2999  ;;  %v3391_v5 = vld [vmem:[#allocation3 + $0x1f0] sm:$0xff]  ;;  %3337 = vmatpush.msra.mxu2 %v3328_v19  ;;  %v2943_v8 = vsel %vm177_vm4, %v2941_v62, %v2918_v23  ;;  %v3324_v25 = vld [vmem:[#allocation3 + $0x148] sm:$0xff]  ;;  %v3384_v19 = vld [vmem:[#allocation3 + $0x1b8] sm:$0xff] }
 0x61d   :  { %v2920_v55 = vpop.permute.xlu0 %2919  ;;  %3398 = vmatpush.msra.mxu3 %v3391_v5  ;;  %v3386_v23 = vld [vmem:[#allocation3 + $0x1c8] sm:$0xff] }
 0x61e   :  { %v2944_v24 = vsel %vm177_vm4, %v2942_v29, %v2920_v55  ;;  %3338 = vmatpush.msra.mxu2 %v3327_v13  ;;  %v3325_v55 = vld [vmem:[#allocation3 + $0x150] sm:$0xff] }
 0x61f   :  { %3399 = vmatpush.msra.mxu3 %v3390_v37  ;;  %v3320_v37 = vld [vmem:[#allocation3 + $0x128] sm:$0xff] }
 0x620   :  { %3339 = vmatpush.msra.mxu2 %v3326_v48  ;;  %v3419_v48 = vld [vmem:[%s8603_s5] sm:$0xff] }
 0x621   :  { %3400 = vmatpush.msra.mxu3 %v3389_v28  ;;  %3443 = vmatpush.msrb.mxu0 %v3419_v48 }
 0x622   :  { %3340 = vmatpush.msra.mxu2 %v3325_v55 }
 0x623   :  { %3401 = vmatpush.msra.mxu3 %v3388_v44  ;;  %v3380_v44 = vld [vmem:[#allocation3 + $0x198] sm:$0xff] }
 0x624   :  { %v2926_v60 = vpop.permute.xlu1 %2925  ;;  %3341 = vmatpush.msra.mxu2 %v3324_v25  ;;  %v3379_v25 = vld [vmem:[#allocation3 + $0x190] sm:$0xff] }
 0x625   :  { %v2946_v56 = vsel %vm182_vm5, %v2944_v24, %v2926_v60  ;;  %v2924_v31 = vpop.permute.xlu0 %2923  ;;  %v3387_v24 = vld [vmem:[#allocation3 + $0x1d0] sm:$0xff]  ;;  %v3322_v60 = vld [vmem:[#allocation3 + $0x138] sm:$0xff] }
 0x626   :  { %v7815_v27 = vsel %vm187_vm6, %v2946_v56, %v2932_v39  ;;  %v2945_v29 = vsel %vm182_vm5, %v2943_v8, %v2924_v31  ;;  %3402 = vmatpush.msra.mxu3 %v3387_v24  ;;  %v3321_v31 = vld [vmem:[#allocation3 + $0x130] sm:$0xff]  ;;  %v3319_v8 = vld [vmem:[#allocation3 + $0x120] sm:$0xff] }
 0x627   :  { %v2956_v51 = vmul.f32 %v7508_v52, %v7815_v27 }
 0x628   :  { %3403 = vmatpush.msra.mxu3 %v3386_v23 }
 0x629   :  { %v2971_v15 = vrot.slane %v2956_v51, 1  ;;  %v3018_v51 = vpop.permute.xlu2 %3017 }
 0x62b   :  { %v2972_v20 = vsel %vm542_vm7, %v2969_v38, %v2971_v15  ;;  %v3323_v38 = vld [vmem:[#allocation3 + $0x140] sm:$0xff]  ;;  %v3383_v15 = vld [vmem:[#allocation3 + $0x1b0] sm:$0xff] }
 0x62c   :  { %v7827_v39 = vadd.f32 %v2972_v20, %v2886_v4  ;;  %v2930_v35 = vpop.permute.xlu1 %2929  ;;  %3342 = vmatpush.msra.mxu2 %v3323_v38  ;;  %v3385_v4 = vld [vmem:[#allocation3 + $0x1c0] sm:$0xff] }
 0x62d   :  { %v7830_v33 = vsel %vm187_vm6, %v2945_v29, %v2930_v35  ;;  %v3008_v18 = vpop.permute.xlu0 %3007  ;;  %3404 = vmatpush.msra.mxu3 %v3385_v4  ;;  %v3381_v20 = vld [vmem:[#allocation3 + $0x1a0] sm:$0xff] }
 0x62e   :  { %v2953_v42 = vmul.f32 %v7508_v52, %v7830_v33  ;;  %3343 = vmatpush.msra.mxu2 %v3322_v60  ;;  %v3029_v52 = vsel %vm157_vm0, %v7727_v49, %v7775_v45  ;;  %v3382_v49 = vld [vmem:[#allocation3 + $0x1a8] sm:$0xff]  ;;  %v3030_v45 = vsel %vm157_vm0, %v7780_v57, %v7761_v59  ;;  %v3079_v59 = vmul.f32 %v7622_v36, %v7795_v47 }
 0x62f   :  { %v3031_v10 = vsel %vm162_vm1, %v3029_v52, %v7783_v7  ;;  %3405 = vmatpush.msra.mxu3 %v3384_v19  ;;  %v3032_v29 = vsel %vm162_vm1, %v3030_v45, %v7778_v54  ;;  %v3316_v57 = vld [vmem:[#allocation3 + $0x108] sm:$0xff]  ;;  %v3082_v54 = vmul.f32 %v7622_v36, %v7790_v9  ;;  %v3111_v4 = vmul.f32 %v7629_v6, %v7830_v33  ;;  %v3377_v36 = vld [vmem:[#allocation3 + $0x180] sm:$0xff] }
 0x630   :  { %v2966_v56 = vrot.slane %v2953_v42, 1  ;;  %3344 = vmatpush.msra.mxu2 %v3321_v31  ;;  %v3034_v35 = vsel %vm167_vm2, %v3032_v29, %v7785_v21  ;;  %v3378_v47 = vld [vmem:[#allocation3 + $0x188] sm:$0xff]  ;;  %v3092_v19 = vrot.slane %v3079_v59, 2  ;;  %v3418_v9 = vld [vmem:[%s8604_s6] sm:$0x3] }
 0x631   :  { %3406 = vmatpush.msra.mxu3 %v3383_v15  ;;  %v3026_v38 = vpop.permute.xlu2 %3025  ;;  %v3097_v15 = vrot.slane %v3082_v54, 2  ;;  %3642 = vmatmul.msk.f32.vlgmr.msrb.gmra.mxu0 %vm3424_vm11, %v3418_v9  ;;  %v3124_v48 = vrot.slane %v3111_v4, 2 }
 0x632   :  { %v2967_v5 = vsel %vm542_vm7, %v2964_v22, %v2966_v56  ;;  %v3033_v22 = vsel %vm167_vm2, %v3031_v10, %v7809_v1  ;;  %3345 = vmatpush.msra.mxu2 %v3320_v37  ;;  %v3317_v1 = vld [vmem:[#allocation3 + $0x110] sm:$0xff]  ;;  %v3315_v56 = vld [vmem:[#allocation3 + $0x100] sm:$0xff] }
 0x633   :  { %v7840_v13 = vadd.f32 %v2967_v5, %v2884_v0  ;;  %v3318_v0 = vld [vmem:[#allocation3 + $0x118] sm:$0xff]  ;;  %v3035_v7 = vsel %vm172_vm3, %v3033_v22, %v7799_v58  ;;  %3407 = vmatpush.msra.mxu3 %v3382_v49  ;;  %v3036_v58 = vsel %vm172_vm3, %v3034_v35, %v3008_v18 }
 0x634   :  { %v3014_v28 = vpop.permute.xlu1 %3013  ;;  %3346 = vmatpush.msra.mxu2 %v3319_v8 }
 0x635   :  { %v3012_v62 = vpop.permute.xlu0 %3011  ;;  %3408 = vmatpush.msra.mxu3 %v3381_v20  ;;  %v3038_v23 = vsel %vm177_vm4, %v3036_v58, %v3014_v28 }
 0x636   :  { %v3037_v55 = vsel %vm177_vm4, %v3035_v7, %v3012_v62  ;;  %3347 = vmatpush.msra.mxu2 %v3318_v0 }
 0x637   :  { %v3039_v24 = vsel %vm182_vm5, %v3037_v55, %v3018_v51  ;;  %3409 = vmatpush.msra.mxu3 %v3380_v44  ;;  %v3114_v51 = vmul.f32 %v7629_v6, %v7815_v27  ;;  %v3093_v27 = vsel %vm763_vm8, %v3090_v32, %v3092_v19  ;;  %v3471_v19 = vld [vmem:[%s8605_s7 + $0x78] sm:$0xff] }
 0x638   :  { %3348 = vmatpush.msra.mxu2 %v3317_v1  ;;  %3476 = vmatpush.msrb.mxu1 %v3471_v19 }
 0x639   :  { %3410 = vmatpush.msra.mxu3 %v3379_v25 }
 0x63a   :  { %3349 = vmatpush.msra.mxu2 %v3316_v57 }
 0x63b   :  { %3411 = vmatpush.msra.mxu3 %v3378_v47 }
 0x63c   :  { %v3024_v42 = vpop.permute.xlu1 %3023  ;;  %3350 = vmatpush.msra.mxu2 %v3315_v56 }
 0x63d   :  { %v3041_v21 = vsel %vm187_vm6, %v3039_v24, %v3024_v42  ;;  %v3020_v60 = vpop.permute.xlu0 %3019  ;;  %3412 = vmatpush.msra.mxu3 %v3377_v36 }
 0x63e   :  { %v3047_v18 = vmul.f32 %v7611_v46, %v3041_v21  ;;  %v3040_v31 = vsel %vm182_vm5, %v3038_v23, %v3020_v60  ;;  %v3143_v33 = vmul.f32 %v7649_v26, %v3041_v21 }
 0x63f   :  { %v3042_v5 = vsel %vm187_vm6, %v3040_v31, %v3026_v38 }
 0x640   :  { %v3060_v52 = vrot.slane %v3047_v18, 1  ;;  %v3050_v37 = vmul.f32 %v7611_v46, %v3042_v5  ;;  %v3146_v22 = vmul.f32 %v7649_v26, %v3042_v5  ;;  %v3129_v46 = vrot.slane %v3114_v51, 2  ;;  %v3470_v5 = vld [vmem:[%s8605_s7 + $0x70] sm:$0xff]  ;;  %v3469_v51 = vld [vmem:[%s8605_s7 + $0x68] sm:$0xff] }
 0x641   :  { %v3156_v62 = vrot.slane %v3143_v33, 2  ;;  %v3098_v26 = vsel %vm763_vm8, %v3095_v30, %v3097_v15  ;;  %3477 = vmatpush.msrb.mxu1 %v3470_v5  ;;  %v3468_v33 = vld [vmem:[%s8605_s7 + $0x60] sm:$0xff]  ;;  %v3466_v15 = vld [vmem:[%s8605_s7 + $0x50] sm:$0xff] }
 0x642   :  { %v3061_v10 = vsel %vm542_vm7, %v3058_v53, %v3060_v52  ;;  %v3065_v28 = vrot.slane %v3050_v37, 1  ;;  %v3125_v53 = vsel %vm763_vm8, %v3122_v2, %v3124_v48  ;;  %v3161_v50 = vrot.slane %v3146_v22, 2  ;;  %v3467_v37 = vld [vmem:[%s8605_s7 + $0x58] sm:$0xff]  ;;  %v3465_v48 = vld [vmem:[%s8605_s7 + $0x48] sm:$0xff]  ;;  %v3462_v22 = vld [vmem:[%s8605_s7 + $0x30] sm:$0xff] }
 0x643   :  { %v3072_v6 = vadd.f32 %v3061_v10, %v7840_v13  ;;  %v3130_v63 = vsel %vm763_vm8, %v3127_v11, %v3129_v46  ;;  %3478 = vmatpush.msrb.mxu1 %v3469_v51  ;;  %v3464_v10 = vld [vmem:[%s8605_s7 + $0x40] sm:$0xff]  ;;  %v3459_v46 = vld [vmem:[%s8605_s7 + $0x18] sm:$0xff] }
 0x644   :  { %v3066_v8 = vsel %vm542_vm7, %v3063_v12, %v3065_v28  ;;  %v3157_v12 = vsel %vm763_vm8, %v3154_v16, %v3156_v62  ;;  %v3162_v14 = vsel %vm763_vm8, %v3159_v43, %v3161_v50  ;;  %v3463_v28 = vld [vmem:[%s8605_s7 + $0x38] sm:$0xff]  ;;  %v3458_v62 = vld [vmem:[%s8605_s7 + $0x10] sm:$0xff] }
 0x645   :  { %v3104_v49 = vadd.f32 %v3093_v27, %v3072_v6  ;;  %v3074_v61 = vadd.f32 %v3066_v8, %v7827_v39  ;;  %3479 = vmatpush.msrb.mxu1 %v3468_v33  ;;  %v3461_v6 = vld [vmem:[%s8605_s7 + $0x28] sm:$0xff]  ;;  %v3460_v27 = vld [vmem:[%s8605_s7 + $0x20] sm:$0xff]  ;;  %v3580_v33 = vld [vmem:[%s8609_s22 + $0x70] sm:$0xff] }
 0x646   :  { %v3457_v8 = vld [vmem:[%s8605_s7 + $0x8] sm:$0xff] }
 0x647   :  { %v3136_v13 = vadd.f32 %v3125_v53, %v3104_v49  ;;  %v3106_v32 = vadd.f32 %v3098_v26, %v3074_v61  ;;  %3480 = vmatpush.msrb.mxu1 %v3467_v37  ;;  %v3456_v49 = vld [vmem:[%s8605_s7] sm:$0xff]  ;;  %v3579_v37 = vld [vmem:[%s8609_s22 + $0x68] sm:$0xff] }
 0x648   :  { %v3711_v26 = vld [vmem:[%s8606_s13] ss:$0 sm:$0xff] }
 0x649   :  { %v3168_v39 = vadd.f32 %v3157_v12, %v3136_v13  ;;  %v3138_v45 = vadd.f32 %v3130_v63, %v3106_v32  ;;  %3481 = vmatpush.msrb.mxu1 %v3466_v15  ;;  %v3578_v15 = vld [vmem:[%s8609_s22 + $0x60] sm:$0xff] }
 0x64b   :  { %v3176_v30 = vadd.f32 %v7698_v40, %v3168_v39  ;;  %v3170_v17 = vadd.f32 %v3162_v14, %v3138_v45  ;;  %3482 = vmatpush.msrb.mxu1 %v3465_v48  ;;  %v3577_v48 = vld [vmem:[%s8609_s22 + $0x58] sm:$0xff] }
 0x64d   :  { %v3180_v2 = vmax.f32 %v3176_v30, 0.0  ;;  %v3178_v0 = vadd.f32 %v7698_v40, %v3170_v17  ;;  %3483 = vmatpush.msrb.mxu1 %v3464_v10  ;;  %v3576_v10 = vld [vmem:[%s8609_s22 + $0x50] sm:$0xff] }
 0x64f   :  { %v3182_v20 = vmax.f32 %v3178_v0, 0.0  ;;  %v3300_v41 = vsel %vm3183_vm9, %v3180_v2, 0.0  ;;  %v3358_v11 = vrot.slane %v3180_v2, 4  ;;  %3484 = vmatpush.msrb.mxu1 %v3463_v28  ;;  %v3712_v0 = vld [vmem:[%s8607_s3] ss:$0 sm:$0xff]  ;;  %v3575_v28 = vld [vmem:[%s8609_s22 + $0x48] sm:$0xff] }
 0x650   :  { %v3301_v7 = vrot.slane %v3300_v41, 4 }
 0x651   :  { %v3307_v34 = vsel %vm3183_vm9, %v3182_v20, 0.0  ;;  %v3359_v16 = vrot.slane %v3182_v20, 4  ;;  %v3362_v55 = vsel %vm3183_vm9, %v3358_v11, 0.0  ;;  %3485 = vmatpush.msrb.mxu1 %v3462_v22  ;;  %v3713_v11 = vld [vmem:[%s8608_s24] ss:$0 sm:$0xff] }
 0x652   :  { %v3302_v1 = vadd.f32 %v3301_v7, %v3300_v41  ;;  %v3308_v3 = vrot.slane %v3307_v34, 4  ;;  %v3363_v44 = vrot.slane %v3362_v55, 4  ;;  %v3574_v22 = vld [vmem:[%s8609_s22 + $0x40] sm:$0xff] }
 0x653   :  { %v3369_v43 = vsel %vm3183_vm9, %v3359_v16, 0.0  ;;  %3486 = vmatpush.msrb.mxu1 %v3461_v6  ;;  %v3573_v6 = vld [vmem:[%s8609_s22 + $0x38] sm:$0xff] }
 0x654   :  { %v3303_v29 = vrot.slane %v3302_v1, 2  ;;  %v3309_v35 = vadd.f32 %v3308_v3, %v3307_v34  ;;  %v3364_v59 = vadd.f32 %v3363_v44, %v3362_v55  ;;  %v3370_v57 = vrot.slane %v3369_v43, 4  ;;  %v3714_v3 = vld [vmem:[#allocation2] ss:$0 sm:$0xff] }
 0x655   :  { %3487 = vmatpush.msrb.mxu1 %v3460_v27  ;;  %v3572_v27 = vld [vmem:[%s8609_s22 + $0x30] sm:$0xff] }
 0x656   :  { %v3304_v40 = vadd.f32 %v3303_v29, %v3302_v1  ;;  %v3310_v25 = vrot.slane %v3309_v35, 2  ;;  %v3365_v58 = vrot.slane %v3364_v59, 2  ;;  %v3371_v24 = vadd.f32 %v3370_v57, %v3369_v43 }
 0x657   :  { %3488 = vmatpush.msrb.mxu1 %v3459_v46  ;;  %v3835_v1 = vmov 0   ;;  %v3571_v46 = vld [vmem:[%s8609_s22 + $0x28] sm:$0xff] }
 0x658   :  { %v3305_v42 = vrot.slane %v3304_v40, 1  ;;  %v3311_v38 = vadd.f32 %v3310_v25, %v3309_v35  ;;  %v3366_v54 = vadd.f32 %v3365_v58, %v3364_v59  ;;  %v3372_v23 = vrot.slane %v3371_v24, 2  ;;  %3672 = vset.pattern.permute.xlu2 %v3835_v1  ;;  %3671 = vset.pattern.permute.xlu1 %v3835_v1 }
 0x659   :  { %3489 = vmatpush.msrb.mxu1 %v3458_v62  ;;  %3673 = vset.pattern.permute.xlu0 %v3835_v1  ;;  %v3570_v62 = vld [vmem:[%s8609_s22 + $0x20] sm:$0xff] }
 0x65a   :  { %v3306_v21 = vadd.f32 %v3305_v42, %v3304_v40  ;;  %v3312_v60 = vrot.slane %v3311_v38, 1  ;;  %v3367_v56 = vrot.slane %v3366_v54, 1  ;;  %v3373_v47 = vadd.f32 %v3372_v23, %v3371_v24 }
 0x65b   :  { %3490 = vmatpush.msrb.mxu1 %v3457_v8  ;;  %v3569_v8 = vld [vmem:[%s8609_s22 + $0x18] sm:$0xff] }
 0x65c   :  { %v3313_v4 = vadd.f32 %v3312_v60, %v3311_v38  ;;  %v3368_v18 = vadd.f32 %v3367_v56, %v3366_v54  ;;  %v3374_v31 = vrot.slane %v3373_v47, 1 }
 0x65d   :  { %3491 = vmatpush.msrb.mxu1 %v3456_v49  ;;  %v3568_v49 = vld [vmem:[%s8609_s22 + $0x10] sm:$0xff] }
 0x65e   :  { %v3333_v36 = vsel %vm3253_vm10, %v3313_v4, %v3306_v21  ;;  %v3375_v9 = vadd.f32 %v3374_v31, %v3373_v47 }
 0x65f   :  { %3351 = vmatmul.f32.vlgmr.msra.gmra.mxu2 %v3333_v36 }
 0x660   :  { %v3395_v52 = vsel %vm3253_vm10, %v3375_v9, %v3368_v18 }
 0x661   :  { %3413 = vmatmul.f32.vlgmr.msra.gmra.mxu3 %v3395_v52  ;;  %v3581_v52 = vld [vmem:[%s8609_s22 + $0x78] sm:$0xff] }
 0x662   :  { %3586 = vmatpush.msrb.mxu2 %v3581_v52 }
 0x664   :  { %3587 = vmatpush.msrb.mxu2 %v3580_v33 }
 0x666   :  { %3588 = vmatpush.msrb.mxu2 %v3579_v37 }
 0x668   :  { %3589 = vmatpush.msrb.mxu2 %v3578_v15 }
 0x66a   :  { %3590 = vmatpush.msrb.mxu2 %v3577_v48 }
 0x66c   :  { %3591 = vmatpush.msrb.mxu2 %v3576_v10 }
 0x66e   :  { %3592 = vmatpush.msrb.mxu2 %v3575_v28 }
 0x670   :  { %3593 = vmatpush.msrb.mxu2 %v3574_v22 }
 0x672   :  { %3594 = vmatpush.msrb.mxu2 %v3573_v6 }
 0x674   :  { %3595 = vmatpush.msrb.mxu2 %v3572_v27 }
 0x676   :  { %3596 = vmatpush.msrb.mxu2 %v3571_v46 }
 0x678   :  { %3597 = vmatpush.msrb.mxu2 %v3570_v62 }
 0x67a   :  { %v3297_v32 = vpop.f32.mrf.mxu1  ;;  %3598 = vmatpush.msrb.mxu2 %v3569_v8 }
 0x67c   :  { %v3273_v61 = vpop.f32.mrf.mxu0  ;;  %3599 = vmatpush.msrb.mxu2 %v3568_v49 }
 0x67d   :  { %v3298_v63 = vadd.f32 %v3297_v32, %v3273_v61  ;;  %v3567_v61 = vld [vmem:[%s8609_s22 + $0x8] sm:$0xff] }
 0x67e   :  { %3600 = vmatpush.msrb.mxu2 %v3567_v61 }
 0x6ae   :  { %v3445_v53 = vpop.f32.mrf.mxu0 }
 0x6af   :  { %v3446_v50 = vadd.f32 %v3711_v26, %v3445_v53  ;;  %v3566_v26 = vld [vmem:[%s8609_s22] sm:$0xff] }
 0x6b0   :  { %3601 = vmatpush.msrb.mxu2 %v3566_v26 }
 0x6b1   :  { %v3449_v13 = vmul.f32 0.01, %v3446_v50  ;;  %vm3448_vm12 = vcmp.ge.f32.partialorder %v3446_v50, 0.0 }
 0x6b3   :  { %v7965_v12 = vsel %vm3448_vm12, %v3446_v50, %v3449_v13 }
 0x6b4   :  { %v3452_v30 = vrot.slane %v7965_v12, 6 }
 0x6e2   :  { %v3352_v39 = vpop.f32.mrf.mxu2 }
 0x6e3   :  { %v3355_v45 = vadd.f32 %v3352_v39, %v3298_v63 }
 0x6e4   :  { %v3414_v14 = vpop.f32.mrf.mxu3 }
 0x6e5   :  { %v7968_v17 = vadd.f32 %v3414_v14, %v3355_v45  ;;  %v3715_v45 = vld [vmem:[%s8610_s16] ss:$0 sm:$0xff] }
 0x6e7   :  { %v3455_v2 = vsel %vm3454_vm13, %v7968_v17, %v3452_v30 }
 0x6e8   :  { %3492 = vmatmul.f32.vlgmr.msrb.gmra.mxu1 %v3455_v2 }
 0x765   :  { %v3493_v20 = vpop.f32.mrf.mxu1 }
 0x766   :  { %v3494_v41 = vadd.f32 %v3712_v0, %v3493_v20 }
 0x768   :  { %vm3496_vm14 = vcmp.ge.f32.partialorder %v3494_v41, 0.0  ;;  %v3497_v7 = vmul.f32 0.01, %v3494_v41 }
 0x76a   :  { %v3498_v34 = vsel %vm3496_vm14, %v3494_v41, %v3497_v7 }
 0x76b   :  { %v3503_v16 = vmul.f32 %v3713_v11, %v3498_v34 }
 0x76d   :  { %v3505_v55 = vsel %vm3504_vm15, %v3503_v16, 0.0 }
 0x76e   :  { %3506 = vadd.xlane.f32.xlu0 %v3505_v55 }
 0x7e1   :  { %v3507_v44 = vpop.xlane.xlu0 %3506 }
 0x7e2   :  { %v3512_v43 = vadd.f32 %v3714_v3, %v3507_v44 }
 0x7e4   :  { %v3514_v29 = vrot.slane %v3512_v43, 2 }
 0x7e6   :  { %v3516_v35 = vmax.f32 %v3512_v43, %v3514_v29 }
 0x7e8   :  { %v3517_v59 = vsub.f32 %v3512_v43, %v3516_v35  ;;  %v3521_v57 = vrot.slane %v3516_v35, 6 }
 0x7ea   :  { %v3523_v40 = vsub.f32 %v3512_v43, %v3521_v57  ;;  %v3518_v25 = vmul.f32 1.442695, %v3517_v59 }
 0x7ec   :  { %v3524_v58 = vmul.f32 1.442695, %v3523_v40 }
 0x7ee   :  { %3716 = vpow2.f32 %v3524_v58 }
 0x7ef   :  { %3718 = vpow2.f32 %v3518_v25 }
 0x7f4   :  { %v3717_v24 = vpop.eup %3716 }
 0x7f5   :  { %v3527_v42 = vrot.slane %v3717_v24, 2  ;;  %v3719_v38 = vpop.eup %3718 }
 0x7f7   :  { %v3529_v54 = vadd.f32 %v3719_v38, %v3527_v42 }
 0x7f9   :  { %3720 = vrcp.f32 %v3529_v54  ;;  %v3541_v56 = vand.u32 2147483648, %v3529_v54  ;;  %v3539_v4 = vand.u32 2147483647, %v3529_v54  ;;  %vm3535_vm1 = vweird.f32 %v3529_v54 }
 0x7fb   :  { %v3542_v31 = vor.u32 1.1754944e-38, %v3541_v56  ;;  %vm3540_vm3 = vcmp.eq.f32.partialorder %v3539_v4, 8.507059e+37 }
 0x7ff   :  { %v3721_v23 = vpop.eup %3720 }
 0x800   :  { %v3531_v21 = vmul.f32 %v3721_v23, %v3529_v54  ;;  %vm3536_vm0 = vweird.f32 %v3721_v23 }
 0x801   :  { %vm3537_vm2 = vmor %vm3535_vm1, %vm3536_vm0 }
 0x802   :  { %v3532_v60 = vsub.f32 1.0, %v3531_v21 }
 0x804   :  { %v3533_v47 = vmul.f32 %v3721_v23, %v3532_v60 }
 0x806   :  { %v3534_v18 = vadd.f32 %v3721_v23, %v3533_v47 }
 0x808   :  { %v3538_v19 = vsel %vm3537_vm2, %v3721_v23, %v3534_v18 }
 0x809   :  { %v3543_v5 = vsel %vm3540_vm3, %v3542_v31, %v3538_v19 }
 0x80a   :  { %v3545_v36 = vmul.f32 %v3719_v38, %v3543_v5  ;;  %v3553_v9 = vrot.slane %v3543_v5, 6 }
 0x80c   :  { %3548 = vperm.xlu2 %3672, %v3545_v36   ;;  %v3555_v51 = vmul.f32 %v3717_v24, %v3553_v9 }
 0x80e   :  { %3558 = vperm.xlu1 %3671, %v3555_v51  }
 0x866   :  { %v3549_v53 = vpop.permute.xlu2 %3548 }
 0x867   :  { %v3551_v32 = vmul.f32 %v3549_v53, %v7968_v17 }
 0x880   :  { %v3559_v50 = vpop.permute.xlu1 %3558 }
 0x881   :  { %v3561_v13 = vmul.f32 %v3559_v50, %v3452_v30 }
 0x883   :  { %v3563_v63 = vrot.slane %v3561_v13, 2 }
 0x885   :  { %v3565_v39 = vadd.f32 %v3563_v63, %v3551_v32 }
 0x887   :  { %3602 = vmatmul.f32.vlgmr.msrb.gmra.mxu2 %v3565_v39 }
 0x90a   :  { %v3603_v14 = vpop.f32.mrf.mxu2 }
 0x90b   :  { %v3604_v2 = vadd.f32 %v3715_v45, %v3603_v14 }
 0x90d   :  { %3606 = vst [vmem:[#allocation6] sm:$0x3] %v3604_v2 }
 0x90e   :  { %3617 = dma.vmem_to_hbm [thread:$0]  %s3613_s21, 32, %s3615_s28, [#allocation5]  }
 0x90f   :  { %3807 = dma.done.wait [#allocation5], 32  }
 0x910   :  { %3808 = vsyncadd [#allocation5], 4294967264 }
 0x911   :  { %3622 = vsyncpa [#allocation4], 1 }
 0x912   :  { %3623 = vsyncpa [#allocation5], 1 }

</bundles_post_ra>
